<compile_context>
chip_gen: v5e
topology: v5e:2x2
jax: 0.10.0
libtpu: 0.0.40
codegen_flags: <defaults>
</compile_context>

<pallas_src>
import math
import functools

import jax
import jax.numpy as jnp
from jax.experimental import pallas as pl
from jax.experimental.pallas import tpu as pltpu


_TC_CAP = 32   # max time steps per grid step (recurrence is fully unrolled)


# ---------------------------------------------------------------------------
# helpers
# ---------------------------------------------------------------------------

def _round_up(x, m):
    return ((x + m - 1) // m) * m


def _vmem_capacity_bytes():
    """Physical per-core VMEM (v5e/v6e: 128 MiB, v7x: 64 MiB).  Conservative
    64 MiB fallback if the query is unavailable."""
    try:
        return int(pltpu.get_tpu_info().vmem_capacity_bytes)
    except Exception:
        return 64 * 1024 * 1024


def _choose_time_chunk(T, *, bt, hp, din, x_bytes, out_bytes, w_bytes,
                       gx_bytes, vmem_cap):
    """VMEM-budget-driven time-chunk length.  No tc | T requirement: the
    sequence is padded at the end instead (trailing steps never affect t < T)."""
    budget = int(vmem_cap * 0.45)
    fixed = (din + hp) * 4 * hp * w_bytes + 2 * bt * hp * 4 + 2 * 4 * hp * 4
    per_step = bt * (2 * din * x_bytes + 2 * hp * out_bytes + 4 * hp * gx_bytes)
    tc = (budget - fixed) // max(per_step, 1)
    return int(max(1, min(tc, T, _TC_CAP)))


# ---------------------------------------------------------------------------
# kernel: one LSTM layer, one (batch-tile, time-chunk) per grid step
# ---------------------------------------------------------------------------

def _lstm_layer_kernel(x_ref, wih_hbm, whh_hbm, b_ref, hseq_ref,
                       wih_sc, whh_sc, gx_sc, h_sc, c_sc, *, tc, bt, hp, unroll):
    """
    x_ref:    (tc*bt, Din)   chunk of layer input, rows = (time-major, tile-row minor)
    wih_hbm:  (Din, 4*hp)    input->hidden weights (HBM; copied once to wih_sc)
    whh_hbm:  (hp,  4*hp)    hidden->hidden weights (HBM; copied once to whh_sc)
    b_ref:    (1,   4*hp)    combined bias b_ih + b_hh, f32, gate order (i,f,o,g)
    hseq_ref: (tc*bt, hp)    hidden-state sequence output for this chunk
    wih_sc/whh_sc            resident VMEM copies of the weights (single buffer)
    gx_sc:    (tc*bt, 4*hp)  scratch: hoisted input projection for the chunk
    h_sc/c_sc:(bt, hp)       f32 scratch: recurrent state carried across chunks
    """
    chunk = pl.program_id(1)

    @pl.when(chunk == 0)
    def _():
        # One-time (per batch tile) setup: weights into resident VMEM, zero state.
        pltpu.sync_copy(wih_hbm, wih_sc)
        pltpu.sync_copy(whh_hbm, whh_sc)
        h_sc[...] = jnp.zeros_like(h_sc)
        c_sc[...] = jnp.zeros_like(c_sc)

    # Hoisted input projection: one large matmul for the whole chunk (tc*bt rows
    # fill the MXU far better than bt rows per step); bias added once; result
    # kept in VMEM scratch (never round-trips HBM).
    gx_sc[...] = (
        jnp.dot(x_ref[...], wih_sc[...], preferred_element_type=jnp.float32)
        + b_ref[...]
    ).astype(gx_sc.dtype)

    # Sequential recurrence over the chunk; h/c carried as loop values (vregs).
    def step(t, carry):
        h, c_state = carry
        row = pl.multiple_of(t * bt, bt)                       # sublane-aligned
        g = gx_sc[pl.ds(row, bt), :].astype(jnp.float32) + jnp.dot(
            h.astype(whh_sc.dtype), whh_sc[...],
            preferred_element_type=jnp.float32)                # (bt, 4*hp) f32

        # Gate layout (i, f, o, g): one sigmoid over a contiguous (bt, 3*hp)
        # slab and one tanh over (bt, hp); hp multiple of 128 -> lane-dense.
        sig = jax.nn.sigmoid(g[:, : 3 * hp])
        i_g = sig[:, 0 * hp:1 * hp]
        f_g = sig[:, 1 * hp:2 * hp]
        o_g = sig[:, 2 * hp:3 * hp]
        g_g = jnp.tanh(g[:, 3 * hp:])

        c_new = f_g * c_state + i_g * g_g                      # f32 state
        h_new = o_g * jnp.tanh(c_new)
        hseq_ref[pl.ds(row, bt), :] = h_new.astype(hseq_ref.dtype)
        return h_new, c_new

    h_fin, c_fin = jax.lax.fori_loop(0, tc, step, (h_sc[...], c_sc[...]),
                                     unroll=unroll)
    h_sc[...] = h_fin
    c_sc[...] = c_fin


def _run_lstm_layer(x2d, w_ih_t, w_hh_t, bias2d, *, T_pad, tc, bt, hp,
                    out_dtype, gx_dtype, vmem_cap, unroll):
    """x2d: (n_btiles*T_pad*bt, Din), rows ordered (batch-tile, time, tile-row).
    Returns the hidden sequence in the same row ordering: (rows, hp)."""
    rows, din = x2d.shape
    h4 = 4 * hp
    n_chunks = T_pad // tc
    n_btiles = rows // (T_pad * bt)

    xb = jnp.dtype(x2d.dtype).itemsize
    wb = jnp.dtype(w_ih_t.dtype).itemsize
    ob = jnp.dtype(out_dtype).itemsize
    gb = jnp.dtype(gx_dtype).itemsize

    vmem_need = (
        2 * tc * bt * din * xb        # input blocks (double-buffered)
        + 2 * tc * bt * hp * ob       # output blocks (double-buffered)
        + (din + hp) * h4 * wb        # resident weights (single copy, scratch)
        + tc * bt * h4 * gb           # hoisted-projection scratch
        + 2 * bt * hp * 4             # h / c state (f32)
        + 2 * h4 * 4                  # bias (double-buffered, tiny)
    )
    # Clamp to the chip's physical VMEM (v7x: 64 MiB -> <= 56 MiB).
    cap_limit = min(100 * 1024 * 1024, (vmem_cap * 7) // 8)
    vmem_limit = int(min(cap_limit, max(32 * 1024 * 1024, (3 * vmem_need) // 2)))

    kernel = functools.partial(_lstm_layer_kernel, tc=tc, bt=bt, hp=hp,
                               unroll=unroll)

    return pl.pallas_call(
        kernel,
        out_shape=jax.ShapeDtypeStruct((rows, hp), out_dtype),
        grid_spec=pltpu.PrefetchScalarGridSpec(
            num_scalar_prefetch=0,
            grid=(n_btiles, n_chunks),
            in_specs=[
                pl.BlockSpec((tc * bt, din), lambda b, c: (b * n_chunks + c, 0)),
                pl.BlockSpec(memory_space=pl.ANY),   # W_ih^T: copied to VMEM once
                pl.BlockSpec(memory_space=pl.ANY),   # W_hh^T: copied to VMEM once
                pl.BlockSpec((1, h4), lambda b, c: (0, 0)),
            ],
            out_specs=pl.BlockSpec((tc * bt, hp),
                                   lambda b, c: (b * n_chunks + c, 0)),
            scratch_shapes=[
                pltpu.VMEM((din, h4), w_ih_t.dtype),   # resident W_ih^T
                pltpu.VMEM((hp, h4), w_hh_t.dtype),    # resident W_hh^T
                pltpu.VMEM((tc * bt, h4), gx_dtype),   # hoisted input projection
                pltpu.VMEM((bt, hp), jnp.float32),     # h state
                pltpu.VMEM((bt, hp), jnp.float32),     # c state
            ],
        ),
        compiler_params=pltpu.CompilerParams(
            dimension_semantics=("parallel", "arbitrary"),
            vmem_limit_bytes=vmem_limit,
        ),
    )(x2d, w_ih_t, w_hh_t, bias2d)


# ---------------------------------------------------------------------------
# parameter preparation (gate-aware padding + (i,f,o,g) reorder)
# ---------------------------------------------------------------------------

def _pad_gate_rows(w, H, hp):
    """w: (4H, K) PyTorch gate-stacked -> (4*hp, K); gates reordered to
    (i, f, o, g); gate k occupies rows [k*hp, k*hp+H).  Zero gate-padding keeps
    the padded hidden columns exactly zero through the recurrence."""
    K = w.shape[1]
    w4 = w.reshape(4, H, K)[jnp.array([0, 1, 3, 2])]      # (i,f,g,o) -> (i,f,o,g)
    w4 = jnp.pad(w4, ((0, 0), (0, hp - H), (0, 0)))
    return w4.reshape(4 * hp, K)


def _prep_layer_params(w_ih, w_hh, b_ih, b_hh, H, hp, in_pad, compute_dtype):
    w_ih_p = _pad_gate_rows(w_ih, H, hp)                      # (4hp, Din)
    if in_pad:
        w_ih_p = jnp.pad(w_ih_p, ((0, 0), (0, in_pad)))       # pad input (col) dim
    w_hh_p = _pad_gate_rows(w_hh, H, hp)                      # (4hp, H)
    w_hh_p = jnp.pad(w_hh_p, ((0, 0), (0, hp - H)))           # (4hp, hp)
    b = (b_ih + b_hh).reshape(4, H)[jnp.array([0, 1, 3, 2])]
    b = jnp.pad(b, ((0, 0), (0, hp - H))).reshape(1, 4 * hp)
    return (jnp.transpose(w_ih_p).astype(compute_dtype),      # (Din_pad, 4hp)
            jnp.transpose(w_hh_p).astype(compute_dtype),      # (hp, 4hp)
            b.astype(jnp.float32))


def init_lstm_params(key, input_size, hidden_size, num_layers):
    """PyTorch nn.LSTM-style shapes/init: U(-1/sqrt(H), 1/sqrt(H))."""
    params = []
    bound = 1.0 / math.sqrt(hidden_size)
    for layer in range(num_layers):
        d_in = input_size if layer == 0 else hidden_size
        key, k1, k2, k3, k4 = jax.random.split(key, 5)
        w_ih = jax.random.uniform(k1, (4 * hidden_size, d_in), jnp.float32, -bound, bound)
        w_hh = jax.random.uniform(k2, (4 * hidden_size, hidden_size), jnp.float32, -bound, bound)
        b_ih = jax.random.uniform(k3, (4 * hidden_size,), jnp.float32, -bound, bound)
        b_hh = jax.random.uniform(k4, (4 * hidden_size,), jnp.float32, -bound, bound)
        params.append((w_ih, w_hh, b_ih, b_hh))
    return params


# ---------------------------------------------------------------------------
# public forward
# ---------------------------------------------------------------------------

def _lstm_forward_impl(x_btd, params, hidden_size, compute_dtype):
    """x_btd: (B, T, input_size) batch-first.  Returns sigmoid(h_T) of last layer."""
    B, T, D0 = x_btd.shape
    H = hidden_size
    cdt = jnp.dtype(compute_dtype)

    # Batch: pad to a sublane multiple; tile at 128 rows (fills the MXU M dim
    # and makes the "parallel" grid axis >1 on large batches -> both v7x TCs).
    bp = max(8, _round_up(B, 8))
    if bp > 128:
        bp = _round_up(bp, 128)
        bt = 128
    else:
        bt = bp
    n_btiles = bp // bt
    hp = max(128, _round_up(H, 128))      # lane-dense gates & stores

    gx_dtype = jnp.float32 if cdt == jnp.dtype(jnp.float32) else jnp.bfloat16
    vmem_cap = _vmem_capacity_bytes()
    din_max = max(D0, hp)
    tc = _choose_time_chunk(
        T, bt=bt, hp=hp, din=din_max,
        x_bytes=cdt.itemsize, out_bytes=cdt.itemsize, w_bytes=cdt.itemsize,
        gx_bytes=jnp.dtype(gx_dtype).itemsize, vmem_cap=vmem_cap)
    n_chunks = (T + tc - 1) // tc
    T_pad = n_chunks * tc                 # trailing pad steps never affect t < T

    # Single boundary layout change of the raw input:
    # batch-first -> (batch-tile, time, tile-row); everything downstream keeps
    # this ordering, so there are no inter-layer transposes.
    x = jnp.transpose(x_btd, (1, 0, 2)).astype(cdt)               # (T, B, D0)
    x = jnp.pad(x, ((0, T_pad - T), (0, bp - B), (0, 0)))         # (T_pad, bp, D0)
    x = x.reshape(T_pad, n_btiles, bt, D0).transpose(1, 0, 2, 3)
    x = x.reshape(n_btiles * T_pad * bt, D0)

    # TODO(synk): fuse all layers into a single kernel (layer-over-time
    # wavefront) to avoid the per-layer HBM round-trip of the hidden sequence.
    for (w_ih, w_hh, b_ih, b_hh) in params:
        in_pad = x.shape[-1] - w_ih.shape[1]
        w_ih_t, w_hh_t, bias2d = _prep_layer_params(
            w_ih, w_hh, b_ih, b_hh, H, hp, in_pad, cdt)
        x = _run_lstm_layer(x, w_ih_t, w_hh_t, bias2d,
                            T_pad=T_pad, tc=tc, bt=bt, hp=hp,
                            out_dtype=cdt, gx_dtype=gx_dtype,
                            vmem_cap=vmem_cap, unroll=tc)

    h_seq = x.reshape(n_btiles, T_pad, bt, hp)
    h_last = h_seq[:, T - 1, :, :].reshape(bp, hp)[:B, :H]        # == r_out[:, -1, :]
    return jax.nn.sigmoid(h_last.astype(jnp.float32))


lstm_forward = jax.jit(_lstm_forward_impl, static_argnums=(2, 3))


# ---------------------------------------------------------------------------
# pure-JAX reference (lax.scan) for correctness checking
# ---------------------------------------------------------------------------

def _reference_lstm(x_btd, params):
    B = x_btd.shape[0]
    h_seq = jnp.transpose(x_btd, (1, 0, 2))  # (T, B, D)
    for (w_ih, w_hh, b_ih, b_hh) in params:
        H = w_hh.shape[1]
        h0 = jnp.zeros((B, H), jnp.float32)
        c0 = jnp.zeros((B, H), jnp.float32)

        def step(carry, x_t):
            h, c = carry
            gates = x_t @ w_ih.T + h @ w_hh.T + b_ih + b_hh
            i = jax.nn.sigmoid(gates[:, 0 * H:1 * H])
            f = jax.nn.sigmoid(gates[:, 1 * H:2 * H])
            g = jnp.tanh(gates[:, 2 * H:3 * H])
            o = jax.nn.sigmoid(gates[:, 3 * H:4 * H])
            c = f * c + i * g
            h = o * jnp.tanh(c)
            return (h, c), h

        (_, _), h_seq = jax.lax.scan(step, (h0, c0), h_seq)
    return jax.nn.sigmoid(h_seq[-1])


if __name__ == "__main__":
    # Small shapes consistent with the module's forward: x is (batch, seq, input_size).
    batch, seq, input_size, hidden_size, num_layers = 2, 8, 16, 32, 2

    key = jax.random.PRNGKey(0)
    key, kx = jax.random.split(key)
    x = jax.random.normal(kx, (batch, seq, input_size), jnp.float32)
    params = init_lstm_params(key, input_size, hidden_size, num_layers)

    ref = _reference_lstm(x, params)

    # f32 path (tolerance covers MXU accumulation-order / precision differences).
    out = jax.block_until_ready(lstm_forward(x, params, hidden_size, jnp.float32))
    assert out.shape == (batch, hidden_size), out.shape
    err = float(jnp.max(jnp.abs(out - ref)))
    assert err < 2e-3, f"f32 path max abs err {err}"

    # bf16 weight/matmul path (perf knob); gate math and h/c state stay f32.
    out_bf16 = jax.block_until_ready(lstm_forward(x, params, hidden_size, jnp.bfloat16))
    assert out_bf16.shape == (batch, hidden_size), out_bf16.shape
    err_bf = float(jnp.max(jnp.abs(out_bf16 - ref)))
    assert err_bf < 5e-2, f"bf16 path max abs err {err_bf}"

    print("KERNEL_OK")
</pallas_src>

<mosaic_0001>
module attributes {stable_mosaic.version = 11 : i64} {
  func.func @_lstm_layer_kernel(%arg0: i32, %arg1: i32, %arg2: memref<64x128xf32, #tpu.memory_space<vmem>>, %arg3: memref<128x512xf32, #tpu.memory_space<any>>, %arg4: memref<128x512xf32, #tpu.memory_space<any>>, %arg5: memref<1x512xf32, #tpu.memory_space<vmem>>, %arg6: memref<64x128xf32, #tpu.memory_space<vmem>>, %arg7: memref<128x512xf32, #tpu.memory_space<vmem>>, %arg8: memref<128x512xf32, #tpu.memory_space<vmem>>, %arg9: memref<64x512xf32, #tpu.memory_space<vmem>>, %arg10: memref<8x128xf32, #tpu.memory_space<vmem>>, %arg11: memref<8x128xf32, #tpu.memory_space<vmem>>) attributes {dimension_semantics = [#tpu.dimension_semantics<parallel>, #tpu.dimension_semantics<arbitrary>], iteration_bounds = array<i64: 1, 1>, scalar_prefetch = 0 : i64, scratch_operands = 5 : i64, tpu.core_type = #tpu.core_type<tc>, window_params = [{transform_indices = @transform_0, window_bounds = array<i64: 64, 128>}, {}, {}, {pipeline_mode = #tpu.pipeline_mode<synchronous>, transform_indices = @transform_3, window_bounds = array<i64: 1, 512>}, {transform_indices = @transform_4, window_bounds = array<i64: 64, 128>}]} {
    %c0_i32 = arith.constant 0 : i32
    %0 = arith.cmpi eq, %arg1, %c0_i32 : i32
    %1 = arith.extui %0 : i1 to i32
    %c0_i32_0 = arith.constant 0 : i32
    %2 = arith.cmpi ne, %1, %c0_i32_0 : i32
    scf.if %2 {
      "tpu.region"() ({
        %218 = tpu.sem_alloc : memref<!tpu.dma_semaphore, #tpu.memory_space<semaphore_mem>>
        tpu.enqueue_dma source(%arg3 : memref<128x512xf32, #tpu.memory_space<any>>) target(%arg7 : memref<128x512xf32, #tpu.memory_space<vmem>>) target_semaphore(%218 : memref<!tpu.dma_semaphore, #tpu.memory_space<semaphore_mem>>)
        tpu.wait_dma2 semaphore(%218 : memref<!tpu.dma_semaphore, #tpu.memory_space<semaphore_mem>>) src(%arg3 : memref<128x512xf32, #tpu.memory_space<any>>) dst(%arg7 : memref<128x512xf32, #tpu.memory_space<vmem>>)
        tpu.yield
      }) : () -> ()
      "tpu.region"() ({
        %218 = tpu.sem_alloc : memref<!tpu.dma_semaphore, #tpu.memory_space<semaphore_mem>>
        tpu.enqueue_dma source(%arg4 : memref<128x512xf32, #tpu.memory_space<any>>) target(%arg8 : memref<128x512xf32, #tpu.memory_space<vmem>>) target_semaphore(%218 : memref<!tpu.dma_semaphore, #tpu.memory_space<semaphore_mem>>)
        tpu.wait_dma2 semaphore(%218 : memref<!tpu.dma_semaphore, #tpu.memory_space<semaphore_mem>>) src(%arg4 : memref<128x512xf32, #tpu.memory_space<any>>) dst(%arg8 : memref<128x512xf32, #tpu.memory_space<vmem>>)
        tpu.yield
      }) : () -> ()
      %cst_73 = arith.constant 0.000000e+00 : f32
      %214 = vector.broadcast %cst_73 : f32 to vector<8x128xf32>
      %c0_74 = arith.constant 0 : index
      %c0_75 = arith.constant 0 : index
      %215 = vector.load %arg10[%c0_74, %c0_75] : memref<8x128xf32, #tpu.memory_space<vmem>>, vector<8x128xf32>
      tpu.vector_store %arg10[%c0_74, %c0_75], %214 {strides = array<i32>} : memref<8x128xf32, #tpu.memory_space<vmem>>, vector<8x128xf32>,
      %cst_76 = arith.constant 0.000000e+00 : f32
      %216 = vector.broadcast %cst_76 : f32 to vector<8x128xf32>
      %c0_77 = arith.constant 0 : index
      %c0_78 = arith.constant 0 : index
      %217 = vector.load %arg11[%c0_77, %c0_78] : memref<8x128xf32, #tpu.memory_space<vmem>>, vector<8x128xf32>
      tpu.vector_store %arg11[%c0_77, %c0_78], %216 {strides = array<i32>} : memref<8x128xf32, #tpu.memory_space<vmem>>, vector<8x128xf32>,
    } else {
    }
    %c0 = arith.constant 0 : index
    %c0_1 = arith.constant 0 : index
    %3 = vector.load %arg2[%c0, %c0_1] : memref<64x128xf32, #tpu.memory_space<vmem>>, vector<64x128xf32>
    %c0_2 = arith.constant 0 : index
    %c0_3 = arith.constant 0 : index
    %4 = vector.load %arg7[%c0_2, %c0_3] : memref<128x512xf32, #tpu.memory_space<vmem>>, vector<128x512xf32>
    %cst = arith.constant dense<0.000000e+00> : vector<64x512xf32>
    %5 = tpu.matmul %3, %4, %cst {dimension_numbers = #tpu.dot_dimension_numbers<[1], [0], [0], [1], [0, 0, 1, 1], [], []>} : vector<64x128xf32>, vector<128x512xf32>, vector<64x512xf32> -> vector<64x512xf32>
    %c0_4 = arith.constant 0 : index
    %c0_5 = arith.constant 0 : index
    %6 = vector.load %arg5[%c0_4, %c0_5] : memref<1x512xf32, #tpu.memory_space<vmem>>, vector<1x512xf32>
    %7 = vector.broadcast %6 : vector<1x512xf32> to vector<64x512xf32>
    %8 = arith.addf %5, %7 : vector<64x512xf32>
    %c0_6 = arith.constant 0 : index
    %c0_7 = arith.constant 0 : index
    %9 = vector.load %arg9[%c0_6, %c0_7] : memref<64x512xf32, #tpu.memory_space<vmem>>, vector<64x512xf32>
    tpu.vector_store %arg9[%c0_6, %c0_7], %8 {strides = array<i32>} : memref<64x512xf32, #tpu.memory_space<vmem>>, vector<64x512xf32>,
    %c0_8 = arith.constant 0 : index
    %c0_9 = arith.constant 0 : index
    %10 = vector.load %arg10[%c0_8, %c0_9] : memref<8x128xf32, #tpu.memory_space<vmem>>, vector<8x128xf32>
    %c0_10 = arith.constant 0 : index
    %c0_11 = arith.constant 0 : index
    %11 = vector.load %arg11[%c0_10, %c0_11] : memref<8x128xf32, #tpu.memory_space<vmem>>, vector<8x128xf32>
    %c0_i32_12 = arith.constant 0 : i32
    %c8_i32 = arith.constant 8 : i32
    %12 = arith.muli %c0_i32_12, %c8_i32 : i32
    %13 = tpu.assume_multiple %12, 8 : i32
    %14 = arith.index_cast %13 : i32 to index
    %c0_13 = arith.constant 0 : index
    %15 = vector.load %arg9[%14, %c0_13] : memref<64x512xf32, #tpu.memory_space<vmem>>, vector<8x512xf32>
    %c0_14 = arith.constant 0 : index
    %c0_15 = arith.constant 0 : index
    %16 = vector.load %arg8[%c0_14, %c0_15] : memref<128x512xf32, #tpu.memory_space<vmem>>, vector<128x512xf32>
    %cst_16 = arith.constant dense<0.000000e+00> : vector<8x512xf32>
    %17 = tpu.matmul %10, %16, %cst_16 {dimension_numbers = #tpu.dot_dimension_numbers<[1], [0], [0], [1], [0, 0, 1, 1], [], []>} : vector<8x128xf32>, vector<128x512xf32>, vector<8x512xf32> -> vector<8x512xf32>
    %18 = arith.addf %15, %17 : vector<8x512xf32>
    %19 = vector.extract_strided_slice %18 {offsets = [0, 0], sizes = [8, 384], strides = [1, 1]} : vector<8x512xf32> to vector<8x384xf32>
    %20 = arith.negf %19 : vector<8x384xf32>
    %21 = math.exp %20 : vector<8x384xf32>
    %cst_17 = arith.constant 1.000000e+00 : f32
    %22 = vector.broadcast %cst_17 : f32 to vector<8x384xf32>
    %23 = arith.addf %22, %21 : vector<8x384xf32>
    %24 = arith.divf %22, %23 : vector<8x384xf32>
    %25 = vector.extract_strided_slice %24 {offsets = [0, 0], sizes = [8, 128], strides = [1, 1]} : vector<8x384xf32> to vector<8x128xf32>
    %26 = vector.extract_strided_slice %24 {offsets = [0, 128], sizes = [8, 128], strides = [1, 1]} : vector<8x384xf32> to vector<8x128xf32>
    %27 = vector.extract_strided_slice %24 {offsets = [0, 256], sizes = [8, 128], strides = [1, 1]} : vector<8x384xf32> to vector<8x128xf32>
    %28 = vector.extract_strided_slice %18 {offsets = [0, 384], sizes = [8, 128], strides = [1, 1]} : vector<8x512xf32> to vector<8x128xf32>
    %29 = math.tanh %28 : vector<8x128xf32>
    %30 = arith.mulf %26, %11 : vector<8x128xf32>
    %31 = arith.mulf %25, %29 : vector<8x128xf32>
    %32 = arith.addf %30, %31 : vector<8x128xf32>
    %33 = math.tanh %32 : vector<8x128xf32>
    %34 = arith.mulf %27, %33 : vector<8x128xf32>
    %35 = arith.index_cast %13 : i32 to index
    %c0_18 = arith.constant 0 : index
    %36 = vector.load %arg6[%35, %c0_18] : memref<64x128xf32, #tpu.memory_space<vmem>>, vector<8x128xf32>
    tpu.vector_store %arg6[%35, %c0_18], %34 {strides = array<i32>} : memref<64x128xf32, #tpu.memory_space<vmem>>, vector<8x128xf32>,
    %c1_i32 = arith.constant 1 : i32
    %c8_i32_19 = arith.constant 8 : i32
    %37 = arith.muli %c1_i32, %c8_i32_19 : i32
    %38 = tpu.assume_multiple %37, 8 : i32
    %39 = arith.index_cast %38 : i32 to index
    %c0_20 = arith.constant 0 : index
    %40 = vector.load %arg9[%39, %c0_20] : memref<64x512xf32, #tpu.memory_space<vmem>>, vector<8x512xf32>
    %c0_21 = arith.constant 0 : index
    %c0_22 = arith.constant 0 : index
    %41 = vector.load %arg8[%c0_21, %c0_22] : memref<128x512xf32, #tpu.memory_space<vmem>>, vector<128x512xf32>
    %cst_23 = arith.constant dense<0.000000e+00> : vector<8x512xf32>
    %42 = tpu.matmul %34, %41, %cst_23 {dimension_numbers = #tpu.dot_dimension_numbers<[1], [0], [0], [1], [0, 0, 1, 1], [], []>} : vector<8x128xf32>, vector<128x512xf32>, vector<8x512xf32> -> vector<8x512xf32>
    %43 = arith.addf %40, %42 : vector<8x512xf32>
    %44 = vector.extract_strided_slice %43 {offsets = [0, 0], sizes = [8, 384], strides = [1, 1]} : vector<8x512xf32> to vector<8x384xf32>
    %45 = arith.negf %44 : vector<8x384xf32>
    %46 = math.exp %45 : vector<8x384xf32>
    %cst_24 = arith.constant 1.000000e+00 : f32
    %47 = vector.broadcast %cst_24 : f32 to vector<8x384xf32>
    %48 = arith.addf %47, %46 : vector<8x384xf32>
    %49 = arith.divf %47, %48 : vector<8x384xf32>
    %50 = vector.extract_strided_slice %49 {offsets = [0, 0], sizes = [8, 128], strides = [1, 1]} : vector<8x384xf32> to vector<8x128xf32>
    %51 = vector.extract_strided_slice %49 {offsets = [0, 128], sizes = [8, 128], strides = [1, 1]} : vector<8x384xf32> to vector<8x128xf32>
    %52 = vector.extract_strided_slice %49 {offsets = [0, 256], sizes = [8, 128], strides = [1, 1]} : vector<8x384xf32> to vector<8x128xf32>
    %53 = vector.extract_strided_slice %43 {offsets = [0, 384], sizes = [8, 128], strides = [1, 1]} : vector<8x512xf32> to vector<8x128xf32>
    %54 = math.tanh %53 : vector<8x128xf32>
    %55 = arith.mulf %51, %32 : vector<8x128xf32>
    %56 = arith.mulf %50, %54 : vector<8x128xf32>
    %57 = arith.addf %55, %56 : vector<8x128xf32>
    %58 = math.tanh %57 : vector<8x128xf32>
    %59 = arith.mulf %52, %58 : vector<8x128xf32>
    %60 = arith.index_cast %38 : i32 to index
    %c0_25 = arith.constant 0 : index
    %61 = vector.load %arg6[%60, %c0_25] : memref<64x128xf32, #tpu.memory_space<vmem>>, vector<8x128xf32>
    tpu.vector_store %arg6[%60, %c0_25], %59 {strides = array<i32>} : memref<64x128xf32, #tpu.memory_space<vmem>>, vector<8x128xf32>,
    %c2_i32 = arith.constant 2 : i32
    %c8_i32_26 = arith.constant 8 : i32
    %62 = arith.muli %c2_i32, %c8_i32_26 : i32
    %63 = tpu.assume_multiple %62, 8 : i32
    %64 = arith.index_cast %63 : i32 to index
    %c0_27 = arith.constant 0 : index
    %65 = vector.load %arg9[%64, %c0_27] : memref<64x512xf32, #tpu.memory_space<vmem>>, vector<8x512xf32>
    %c0_28 = arith.constant 0 : index
    %c0_29 = arith.constant 0 : index
    %66 = vector.load %arg8[%c0_28, %c0_29] : memref<128x512xf32, #tpu.memory_space<vmem>>, vector<128x512xf32>
    %cst_30 = arith.constant dense<0.000000e+00> : vector<8x512xf32>
    %67 = tpu.matmul %59, %66, %cst_30 {dimension_numbers = #tpu.dot_dimension_numbers<[1], [0], [0], [1], [0, 0, 1, 1], [], []>} : vector<8x128xf32>, vector<128x512xf32>, vector<8x512xf32> -> vector<8x512xf32>
    %68 = arith.addf %65, %67 : vector<8x512xf32>
    %69 = vector.extract_strided_slice %68 {offsets = [0, 0], sizes = [8, 384], strides = [1, 1]} : vector<8x512xf32> to vector<8x384xf32>
    %70 = arith.negf %69 : vector<8x384xf32>
    %71 = math.exp %70 : vector<8x384xf32>
    %cst_31 = arith.constant 1.000000e+00 : f32
    %72 = vector.broadcast %cst_31 : f32 to vector<8x384xf32>
    %73 = arith.addf %72, %71 : vector<8x384xf32>
    %74 = arith.divf %72, %73 : vector<8x384xf32>
    %75 = vector.extract_strided_slice %74 {offsets = [0, 0], sizes = [8, 128], strides = [1, 1]} : vector<8x384xf32> to vector<8x128xf32>
    %76 = vector.extract_strided_slice %74 {offsets = [0, 128], sizes = [8, 128], strides = [1, 1]} : vector<8x384xf32> to vector<8x128xf32>
    %77 = vector.extract_strided_slice %74 {offsets = [0, 256], sizes = [8, 128], strides = [1, 1]} : vector<8x384xf32> to vector<8x128xf32>
    %78 = vector.extract_strided_slice %68 {offsets = [0, 384], sizes = [8, 128], strides = [1, 1]} : vector<8x512xf32> to vector<8x128xf32>
    %79 = math.tanh %78 : vector<8x128xf32>
    %80 = arith.mulf %76, %57 : vector<8x128xf32>
    %81 = arith.mulf %75, %79 : vector<8x128xf32>
    %82 = arith.addf %80, %81 : vector<8x128xf32>
    %83 = math.tanh %82 : vector<8x128xf32>
    %84 = arith.mulf %77, %83 : vector<8x128xf32>
    %85 = arith.index_cast %63 : i32 to index
    %c0_32 = arith.constant 0 : index
    %86 = vector.load %arg6[%85, %c0_32] : memref<64x128xf32, #tpu.memory_space<vmem>>, vector<8x128xf32>
    tpu.vector_store %arg6[%85, %c0_32], %84 {strides = array<i32>} : memref<64x128xf32, #tpu.memory_space<vmem>>, vector<8x128xf32>,
    %c3_i32 = arith.constant 3 : i32
    %c8_i32_33 = arith.constant 8 : i32
    %87 = arith.muli %c3_i32, %c8_i32_33 : i32
    %88 = tpu.assume_multiple %87, 8 : i32
    %89 = arith.index_cast %88 : i32 to index
    %c0_34 = arith.constant 0 : index
    %90 = vector.load %arg9[%89, %c0_34] : memref<64x512xf32, #tpu.memory_space<vmem>>, vector<8x512xf32>
    %c0_35 = arith.constant 0 : index
    %c0_36 = arith.constant 0 : index
    %91 = vector.load %arg8[%c0_35, %c0_36] : memref<128x512xf32, #tpu.memory_space<vmem>>, vector<128x512xf32>
    %cst_37 = arith.constant dense<0.000000e+00> : vector<8x512xf32>
    %92 = tpu.matmul %84, %91, %cst_37 {dimension_numbers = #tpu.dot_dimension_numbers<[1], [0], [0], [1], [0, 0, 1, 1], [], []>} : vector<8x128xf32>, vector<128x512xf32>, vector<8x512xf32> -> vector<8x512xf32>
    %93 = arith.addf %90, %92 : vector<8x512xf32>
    %94 = vector.extract_strided_slice %93 {offsets = [0, 0], sizes = [8, 384], strides = [1, 1]} : vector<8x512xf32> to vector<8x384xf32>
    %95 = arith.negf %94 : vector<8x384xf32>
    %96 = math.exp %95 : vector<8x384xf32>
    %cst_38 = arith.constant 1.000000e+00 : f32
    %97 = vector.broadcast %cst_38 : f32 to vector<8x384xf32>
    %98 = arith.addf %97, %96 : vector<8x384xf32>
    %99 = arith.divf %97, %98 : vector<8x384xf32>
    %100 = vector.extract_strided_slice %99 {offsets = [0, 0], sizes = [8, 128], strides = [1, 1]} : vector<8x384xf32> to vector<8x128xf32>
    %101 = vector.extract_strided_slice %99 {offsets = [0, 128], sizes = [8, 128], strides = [1, 1]} : vector<8x384xf32> to vector<8x128xf32>
    %102 = vector.extract_strided_slice %99 {offsets = [0, 256], sizes = [8, 128], strides = [1, 1]} : vector<8x384xf32> to vector<8x128xf32>
    %103 = vector.extract_strided_slice %93 {offsets = [0, 384], sizes = [8, 128], strides = [1, 1]} : vector<8x512xf32> to vector<8x128xf32>
    %104 = math.tanh %103 : vector<8x128xf32>
    %105 = arith.mulf %101, %82 : vector<8x128xf32>
    %106 = arith.mulf %100, %104 : vector<8x128xf32>
    %107 = arith.addf %105, %106 : vector<8x128xf32>
    %108 = math.tanh %107 : vector<8x128xf32>
    %109 = arith.mulf %102, %108 : vector<8x128xf32>
    %110 = arith.index_cast %88 : i32 to index
    %c0_39 = arith.constant 0 : index
    %111 = vector.load %arg6[%110, %c0_39] : memref<64x128xf32, #tpu.memory_space<vmem>>, vector<8x128xf32>
    tpu.vector_store %arg6[%110, %c0_39], %109 {strides = array<i32>} : memref<64x128xf32, #tpu.memory_space<vmem>>, vector<8x128xf32>,
    %c4_i32 = arith.constant 4 : i32
    %c8_i32_40 = arith.constant 8 : i32
    %112 = arith.muli %c4_i32, %c8_i32_40 : i32
    %113 = tpu.assume_multiple %112, 8 : i32
    %114 = arith.index_cast %113 : i32 to index
    %c0_41 = arith.constant 0 : index
    %115 = vector.load %arg9[%114, %c0_41] : memref<64x512xf32, #tpu.memory_space<vmem>>, vector<8x512xf32>
    %c0_42 = arith.constant 0 : index
    %c0_43 = arith.constant 0 : index
    %116 = vector.load %arg8[%c0_42, %c0_43] : memref<128x512xf32, #tpu.memory_space<vmem>>, vector<128x512xf32>
    %cst_44 = arith.constant dense<0.000000e+00> : vector<8x512xf32>
    %117 = tpu.matmul %109, %116, %cst_44 {dimension_numbers = #tpu.dot_dimension_numbers<[1], [0], [0], [1], [0, 0, 1, 1], [], []>} : vector<8x128xf32>, vector<128x512xf32>, vector<8x512xf32> -> vector<8x512xf32>
    %118 = arith.addf %115, %117 : vector<8x512xf32>
    %119 = vector.extract_strided_slice %118 {offsets = [0, 0], sizes = [8, 384], strides = [1, 1]} : vector<8x512xf32> to vector<8x384xf32>
    %120 = arith.negf %119 : vector<8x384xf32>
    %121 = math.exp %120 : vector<8x384xf32>
    %cst_45 = arith.constant 1.000000e+00 : f32
    %122 = vector.broadcast %cst_45 : f32 to vector<8x384xf32>
    %123 = arith.addf %122, %121 : vector<8x384xf32>
    %124 = arith.divf %122, %123 : vector<8x384xf32>
    %125 = vector.extract_strided_slice %124 {offsets = [0, 0], sizes = [8, 128], strides = [1, 1]} : vector<8x384xf32> to vector<8x128xf32>
    %126 = vector.extract_strided_slice %124 {offsets = [0, 128], sizes = [8, 128], strides = [1, 1]} : vector<8x384xf32> to vector<8x128xf32>
    %127 = vector.extract_strided_slice %124 {offsets = [0, 256], sizes = [8, 128], strides = [1, 1]} : vector<8x384xf32> to vector<8x128xf32>
    %128 = vector.extract_strided_slice %118 {offsets = [0, 384], sizes = [8, 128], strides = [1, 1]} : vector<8x512xf32> to vector<8x128xf32>
    %129 = math.tanh %128 : vector<8x128xf32>
    %130 = arith.mulf %126, %107 : vector<8x128xf32>
    %131 = arith.mulf %125, %129 : vector<8x128xf32>
    %132 = arith.addf %130, %131 : vector<8x128xf32>
    %133 = math.tanh %132 : vector<8x128xf32>
    %134 = arith.mulf %127, %133 : vector<8x128xf32>
    %135 = arith.index_cast %113 : i32 to index
    %c0_46 = arith.constant 0 : index
    %136 = vector.load %arg6[%135, %c0_46] : memref<64x128xf32, #tpu.memory_space<vmem>>, vector<8x128xf32>
    tpu.vector_store %arg6[%135, %c0_46], %134 {strides = array<i32>} : memref<64x128xf32, #tpu.memory_space<vmem>>, vector<8x128xf32>,
    %c5_i32 = arith.constant 5 : i32
    %c8_i32_47 = arith.constant 8 : i32
    %137 = arith.muli %c5_i32, %c8_i32_47 : i32
    %138 = tpu.assume_multiple %137, 8 : i32
    %139 = arith.index_cast %138 : i32 to index
    %c0_48 = arith.constant 0 : index
    %140 = vector.load %arg9[%139, %c0_48] : memref<64x512xf32, #tpu.memory_space<vmem>>, vector<8x512xf32>
    %c0_49 = arith.constant 0 : index
    %c0_50 = arith.constant 0 : index
    %141 = vector.load %arg8[%c0_49, %c0_50] : memref<128x512xf32, #tpu.memory_space<vmem>>, vector<128x512xf32>
    %cst_51 = arith.constant dense<0.000000e+00> : vector<8x512xf32>
    %142 = tpu.matmul %134, %141, %cst_51 {dimension_numbers = #tpu.dot_dimension_numbers<[1], [0], [0], [1], [0, 0, 1, 1], [], []>} : vector<8x128xf32>, vector<128x512xf32>, vector<8x512xf32> -> vector<8x512xf32>
    %143 = arith.addf %140, %142 : vector<8x512xf32>
    %144 = vector.extract_strided_slice %143 {offsets = [0, 0], sizes = [8, 384], strides = [1, 1]} : vector<8x512xf32> to vector<8x384xf32>
    %145 = arith.negf %144 : vector<8x384xf32>
    %146 = math.exp %145 : vector<8x384xf32>
    %cst_52 = arith.constant 1.000000e+00 : f32
    %147 = vector.broadcast %cst_52 : f32 to vector<8x384xf32>
    %148 = arith.addf %147, %146 : vector<8x384xf32>
    %149 = arith.divf %147, %148 : vector<8x384xf32>
    %150 = vector.extract_strided_slice %149 {offsets = [0, 0], sizes = [8, 128], strides = [1, 1]} : vector<8x384xf32> to vector<8x128xf32>
    %151 = vector.extract_strided_slice %149 {offsets = [0, 128], sizes = [8, 128], strides = [1, 1]} : vector<8x384xf32> to vector<8x128xf32>
    %152 = vector.extract_strided_slice %149 {offsets = [0, 256], sizes = [8, 128], strides = [1, 1]} : vector<8x384xf32> to vector<8x128xf32>
    %153 = vector.extract_strided_slice %143 {offsets = [0, 384], sizes = [8, 128], strides = [1, 1]} : vector<8x512xf32> to vector<8x128xf32>
    %154 = math.tanh %153 : vector<8x128xf32>
    %155 = arith.mulf %151, %132 : vector<8x128xf32>
    %156 = arith.mulf %150, %154 : vector<8x128xf32>
    %157 = arith.addf %155, %156 : vector<8x128xf32>
    %158 = math.tanh %157 : vector<8x128xf32>
    %159 = arith.mulf %152, %158 : vector<8x128xf32>
    %160 = arith.index_cast %138 : i32 to index
    %c0_53 = arith.constant 0 : index
    %161 = vector.load %arg6[%160, %c0_53] : memref<64x128xf32, #tpu.memory_space<vmem>>, vector<8x128xf32>
    tpu.vector_store %arg6[%160, %c0_53], %159 {strides = array<i32>} : memref<64x128xf32, #tpu.memory_space<vmem>>, vector<8x128xf32>,
    %c6_i32 = arith.constant 6 : i32
    %c8_i32_54 = arith.constant 8 : i32
    %162 = arith.muli %c6_i32, %c8_i32_54 : i32
    %163 = tpu.assume_multiple %162, 8 : i32
    %164 = arith.index_cast %163 : i32 to index
    %c0_55 = arith.constant 0 : index
    %165 = vector.load %arg9[%164, %c0_55] : memref<64x512xf32, #tpu.memory_space<vmem>>, vector<8x512xf32>
    %c0_56 = arith.constant 0 : index
    %c0_57 = arith.constant 0 : index
    %166 = vector.load %arg8[%c0_56, %c0_57] : memref<128x512xf32, #tpu.memory_space<vmem>>, vector<128x512xf32>
    %cst_58 = arith.constant dense<0.000000e+00> : vector<8x512xf32>
    %167 = tpu.matmul %159, %166, %cst_58 {dimension_numbers = #tpu.dot_dimension_numbers<[1], [0], [0], [1], [0, 0, 1, 1], [], []>} : vector<8x128xf32>, vector<128x512xf32>, vector<8x512xf32> -> vector<8x512xf32>
    %168 = arith.addf %165, %167 : vector<8x512xf32>
    %169 = vector.extract_strided_slice %168 {offsets = [0, 0], sizes = [8, 384], strides = [1, 1]} : vector<8x512xf32> to vector<8x384xf32>
    %170 = arith.negf %169 : vector<8x384xf32>
    %171 = math.exp %170 : vector<8x384xf32>
    %cst_59 = arith.constant 1.000000e+00 : f32
    %172 = vector.broadcast %cst_59 : f32 to vector<8x384xf32>
    %173 = arith.addf %172, %171 : vector<8x384xf32>
    %174 = arith.divf %172, %173 : vector<8x384xf32>
    %175 = vector.extract_strided_slice %174 {offsets = [0, 0], sizes = [8, 128], strides = [1, 1]} : vector<8x384xf32> to vector<8x128xf32>
    %176 = vector.extract_strided_slice %174 {offsets = [0, 128], sizes = [8, 128], strides = [1, 1]} : vector<8x384xf32> to vector<8x128xf32>
    %177 = vector.extract_strided_slice %174 {offsets = [0, 256], sizes = [8, 128], strides = [1, 1]} : vector<8x384xf32> to vector<8x128xf32>
    %178 = vector.extract_strided_slice %168 {offsets = [0, 384], sizes = [8, 128], strides = [1, 1]} : vector<8x512xf32> to vector<8x128xf32>
    %179 = math.tanh %178 : vector<8x128xf32>
    %180 = arith.mulf %176, %157 : vector<8x128xf32>
    %181 = arith.mulf %175, %179 : vector<8x128xf32>
    %182 = arith.addf %180, %181 : vector<8x128xf32>
    %183 = math.tanh %182 : vector<8x128xf32>
    %184 = arith.mulf %177, %183 : vector<8x128xf32>
    %185 = arith.index_cast %163 : i32 to index
    %c0_60 = arith.constant 0 : index
    %186 = vector.load %arg6[%185, %c0_60] : memref<64x128xf32, #tpu.memory_space<vmem>>, vector<8x128xf32>
    tpu.vector_store %arg6[%185, %c0_60], %184 {strides = array<i32>} : memref<64x128xf32, #tpu.memory_space<vmem>>, vector<8x128xf32>,
    %c7_i32 = arith.constant 7 : i32
    %c8_i32_61 = arith.constant 8 : i32
    %187 = arith.muli %c7_i32, %c8_i32_61 : i32
    %188 = tpu.assume_multiple %187, 8 : i32
    %189 = arith.index_cast %188 : i32 to index
    %c0_62 = arith.constant 0 : index
    %190 = vector.load %arg9[%189, %c0_62] : memref<64x512xf32, #tpu.memory_space<vmem>>, vector<8x512xf32>
    %c0_63 = arith.constant 0 : index
    %c0_64 = arith.constant 0 : index
    %191 = vector.load %arg8[%c0_63, %c0_64] : memref<128x512xf32, #tpu.memory_space<vmem>>, vector<128x512xf32>
    %cst_65 = arith.constant dense<0.000000e+00> : vector<8x512xf32>
    %192 = tpu.matmul %184, %191, %cst_65 {dimension_numbers = #tpu.dot_dimension_numbers<[1], [0], [0], [1], [0, 0, 1, 1], [], []>} : vector<8x128xf32>, vector<128x512xf32>, vector<8x512xf32> -> vector<8x512xf32>
    %193 = arith.addf %190, %192 : vector<8x512xf32>
    %194 = vector.extract_strided_slice %193 {offsets = [0, 0], sizes = [8, 384], strides = [1, 1]} : vector<8x512xf32> to vector<8x384xf32>
    %195 = arith.negf %194 : vector<8x384xf32>
    %196 = math.exp %195 : vector<8x384xf32>
    %cst_66 = arith.constant 1.000000e+00 : f32
    %197 = vector.broadcast %cst_66 : f32 to vector<8x384xf32>
    %198 = arith.addf %197, %196 : vector<8x384xf32>
    %199 = arith.divf %197, %198 : vector<8x384xf32>
    %200 = vector.extract_strided_slice %199 {offsets = [0, 0], sizes = [8, 128], strides = [1, 1]} : vector<8x384xf32> to vector<8x128xf32>
    %201 = vector.extract_strided_slice %199 {offsets = [0, 128], sizes = [8, 128], strides = [1, 1]} : vector<8x384xf32> to vector<8x128xf32>
    %202 = vector.extract_strided_slice %199 {offsets = [0, 256], sizes = [8, 128], strides = [1, 1]} : vector<8x384xf32> to vector<8x128xf32>
    %203 = vector.extract_strided_slice %193 {offsets = [0, 384], sizes = [8, 128], strides = [1, 1]} : vector<8x512xf32> to vector<8x128xf32>
    %204 = math.tanh %203 : vector<8x128xf32>
    %205 = arith.mulf %201, %182 : vector<8x128xf32>
    %206 = arith.mulf %200, %204 : vector<8x128xf32>
    %207 = arith.addf %205, %206 : vector<8x128xf32>
    %208 = math.tanh %207 : vector<8x128xf32>
    %209 = arith.mulf %202, %208 : vector<8x128xf32>
    %210 = arith.index_cast %188 : i32 to index
    %c0_67 = arith.constant 0 : index
    %211 = vector.load %arg6[%210, %c0_67] : memref<64x128xf32, #tpu.memory_space<vmem>>, vector<8x128xf32>
    tpu.vector_store %arg6[%210, %c0_67], %209 {strides = array<i32>} : memref<64x128xf32, #tpu.memory_space<vmem>>, vector<8x128xf32>,
    %c8_i32_68 = arith.constant 8 : i32
    %c0_69 = arith.constant 0 : index
    %c0_70 = arith.constant 0 : index
    %212 = vector.load %arg10[%c0_69, %c0_70] : memref<8x128xf32, #tpu.memory_space<vmem>>, vector<8x128xf32>
    tpu.vector_store %arg10[%c0_69, %c0_70], %209 {strides = array<i32>} : memref<8x128xf32, #tpu.memory_space<vmem>>, vector<8x128xf32>,
    %c0_71 = arith.constant 0 : index
    %c0_72 = arith.constant 0 : index
    %213 = vector.load %arg11[%c0_71, %c0_72] : memref<8x128xf32, #tpu.memory_space<vmem>>, vector<8x128xf32>
    tpu.vector_store %arg11[%c0_71, %c0_72], %207 {strides = array<i32>} : memref<8x128xf32, #tpu.memory_space<vmem>>, vector<8x128xf32>,
    return
  }
  func.func @transform_0(%arg0: i32, %arg1: i32) -> (i32, i32) {
    %c1_i32 = arith.constant 1 : i32
    %0 = arith.muli %arg0, %c1_i32 : i32
    %1 = arith.addi %0, %arg1 : i32
    %c0_i32 = arith.constant 0 : i32
    %c0_i32_0 = arith.constant 0 : i32
    return %1, %c0_i32 : i32, i32
  }
  func.func @transform_3(%arg0: i32, %arg1: i32) -> (i32, i32) {
    %c0_i32 = arith.constant 0 : i32
    %c0_i32_0 = arith.constant 0 : i32
    %c0_i32_1 = arith.constant 0 : i32
    return %c0_i32, %c0_i32_0 : i32, i32
  }
  func.func @transform_4(%arg0: i32, %arg1: i32) -> (i32, i32) {
    %c1_i32 = arith.constant 1 : i32
    %0 = arith.muli %arg0, %c1_i32 : i32
    %1 = arith.addi %0, %arg1 : i32
    %c0_i32 = arith.constant 0 : i32
    %c0_i32_0 = arith.constant 0 : i32
    return %1, %c0_i32 : i32, i32
  }
}

module attributes {stable_mosaic.version = 11 : i64} {
  func.func @_lstm_layer_kernel(%arg0: i32, %arg1: i32, %arg2: memref<64x16xf32, #tpu.memory_space<vmem>>, %arg3: memref<16x512xf32, #tpu.memory_space<any>>, %arg4: memref<128x512xf32, #tpu.memory_space<any>>, %arg5: memref<1x512xf32, #tpu.memory_space<vmem>>, %arg6: memref<64x128xf32, #tpu.memory_space<vmem>>, %arg7: memref<16x512xf32, #tpu.memory_space<vmem>>, %arg8: memref<128x512xf32, #tpu.memory_space<vmem>>, %arg9: memref<64x512xf32, #tpu.memory_space<vmem>>, %arg10: memref<8x128xf32, #tpu.memory_space<vmem>>, %arg11: memref<8x128xf32, #tpu.memory_space<vmem>>) attributes {dimension_semantics = [#tpu.dimension_semantics<parallel>, #tpu.dimension_semantics<arbitrary>], iteration_bounds = array<i64: 1, 1>, scalar_prefetch = 0 : i64, scratch_operands = 5 : i64, tpu.core_type = #tpu.core_type<tc>, window_params = [{transform_indices = @transform_0, window_bounds = array<i64: 64, 16>}, {}, {}, {pipeline_mode = #tpu.pipeline_mode<synchronous>, transform_indices = @transform_3, window_bounds = array<i64: 1, 512>}, {transform_indices = @transform_4, window_bounds = array<i64: 64, 128>}]} {
    %c0_i32 = arith.constant 0 : i32
    %0 = arith.cmpi eq, %arg1, %c0_i32 : i32
    %1 = arith.extui %0 : i1 to i32
    %c0_i32_0 = arith.constant 0 : i32
    %2 = arith.cmpi ne, %1, %c0_i32_0 : i32
    scf.if %2 {
      "tpu.region"() ({
        %218 = tpu.sem_alloc : memref<!tpu.dma_semaphore, #tpu.memory_space<semaphore_mem>>
        tpu.enqueue_dma source(%arg3 : memref<16x512xf32, #tpu.memory_space<any>>) target(%arg7 : memref<16x512xf32, #tpu.memory_space<vmem>>) target_semaphore(%218 : memref<!tpu.dma_semaphore, #tpu.memory_space<semaphore_mem>>)
        tpu.wait_dma2 semaphore(%218 : memref<!tpu.dma_semaphore, #tpu.memory_space<semaphore_mem>>) src(%arg3 : memref<16x512xf32, #tpu.memory_space<any>>) dst(%arg7 : memref<16x512xf32, #tpu.memory_space<vmem>>)
        tpu.yield
      }) : () -> ()
      "tpu.region"() ({
        %218 = tpu.sem_alloc : memref<!tpu.dma_semaphore, #tpu.memory_space<semaphore_mem>>
        tpu.enqueue_dma source(%arg4 : memref<128x512xf32, #tpu.memory_space<any>>) target(%arg8 : memref<128x512xf32, #tpu.memory_space<vmem>>) target_semaphore(%218 : memref<!tpu.dma_semaphore, #tpu.memory_space<semaphore_mem>>)
        tpu.wait_dma2 semaphore(%218 : memref<!tpu.dma_semaphore, #tpu.memory_space<semaphore_mem>>) src(%arg4 : memref<128x512xf32, #tpu.memory_space<any>>) dst(%arg8 : memref<128x512xf32, #tpu.memory_space<vmem>>)
        tpu.yield
      }) : () -> ()
      %cst_73 = arith.constant 0.000000e+00 : f32
      %214 = vector.broadcast %cst_73 : f32 to vector<8x128xf32>
      %c0_74 = arith.constant 0 : index
      %c0_75 = arith.constant 0 : index
      %215 = vector.load %arg10[%c0_74, %c0_75] : memref<8x128xf32, #tpu.memory_space<vmem>>, vector<8x128xf32>
      tpu.vector_store %arg10[%c0_74, %c0_75], %214 {strides = array<i32>} : memref<8x128xf32, #tpu.memory_space<vmem>>, vector<8x128xf32>,
      %cst_76 = arith.constant 0.000000e+00 : f32
      %216 = vector.broadcast %cst_76 : f32 to vector<8x128xf32>
      %c0_77 = arith.constant 0 : index
      %c0_78 = arith.constant 0 : index
      %217 = vector.load %arg11[%c0_77, %c0_78] : memref<8x128xf32, #tpu.memory_space<vmem>>, vector<8x128xf32>
      tpu.vector_store %arg11[%c0_77, %c0_78], %216 {strides = array<i32>} : memref<8x128xf32, #tpu.memory_space<vmem>>, vector<8x128xf32>,
    } else {
    }
    %c0 = arith.constant 0 : index
    %c0_1 = arith.constant 0 : index
    %3 = vector.load %arg2[%c0, %c0_1] : memref<64x16xf32, #tpu.memory_space<vmem>>, vector<64x16xf32>
    %c0_2 = arith.constant 0 : index
    %c0_3 = arith.constant 0 : index
    %4 = vector.load %arg7[%c0_2, %c0_3] : memref<16x512xf32, #tpu.memory_space<vmem>>, vector<16x512xf32>
    %cst = arith.constant dense<0.000000e+00> : vector<64x512xf32>
    %5 = tpu.matmul %3, %4, %cst {dimension_numbers = #tpu.dot_dimension_numbers<[1], [0], [0], [1], [0, 0, 1, 1], [], []>} : vector<64x16xf32>, vector<16x512xf32>, vector<64x512xf32> -> vector<64x512xf32>
    %c0_4 = arith.constant 0 : index
    %c0_5 = arith.constant 0 : index
    %6 = vector.load %arg5[%c0_4, %c0_5] : memref<1x512xf32, #tpu.memory_space<vmem>>, vector<1x512xf32>
    %7 = vector.broadcast %6 : vector<1x512xf32> to vector<64x512xf32>
    %8 = arith.addf %5, %7 : vector<64x512xf32>
    %c0_6 = arith.constant 0 : index
    %c0_7 = arith.constant 0 : index
    %9 = vector.load %arg9[%c0_6, %c0_7] : memref<64x512xf32, #tpu.memory_space<vmem>>, vector<64x512xf32>
    tpu.vector_store %arg9[%c0_6, %c0_7], %8 {strides = array<i32>} : memref<64x512xf32, #tpu.memory_space<vmem>>, vector<64x512xf32>,
    %c0_8 = arith.constant 0 : index
    %c0_9 = arith.constant 0 : index
    %10 = vector.load %arg10[%c0_8, %c0_9] : memref<8x128xf32, #tpu.memory_space<vmem>>, vector<8x128xf32>
    %c0_10 = arith.constant 0 : index
    %c0_11 = arith.constant 0 : index
    %11 = vector.load %arg11[%c0_10, %c0_11] : memref<8x128xf32, #tpu.memory_space<vmem>>, vector<8x128xf32>
    %c0_i32_12 = arith.constant 0 : i32
    %c8_i32 = arith.constant 8 : i32
    %12 = arith.muli %c0_i32_12, %c8_i32 : i32
    %13 = tpu.assume_multiple %12, 8 : i32
    %14 = arith.index_cast %13 : i32 to index
    %c0_13 = arith.constant 0 : index
    %15 = vector.load %arg9[%14, %c0_13] : memref<64x512xf32, #tpu.memory_space<vmem>>, vector<8x512xf32>
    %c0_14 = arith.constant 0 : index
    %c0_15 = arith.constant 0 : index
    %16 = vector.load %arg8[%c0_14, %c0_15] : memref<128x512xf32, #tpu.memory_space<vmem>>, vector<128x512xf32>
    %cst_16 = arith.constant dense<0.000000e+00> : vector<8x512xf32>
    %17 = tpu.matmul %10, %16, %cst_16 {dimension_numbers = #tpu.dot_dimension_numbers<[1], [0], [0], [1], [0, 0, 1, 1], [], []>} : vector<8x128xf32>, vector<128x512xf32>, vector<8x512xf32> -> vector<8x512xf32>
    %18 = arith.addf %15, %17 : vector<8x512xf32>
    %19 = vector.extract_strided_slice %18 {offsets = [0, 0], sizes = [8, 384], strides = [1, 1]} : vector<8x512xf32> to vector<8x384xf32>
    %20 = arith.negf %19 : vector<8x384xf32>
    %21 = math.exp %20 : vector<8x384xf32>
    %cst_17 = arith.constant 1.000000e+00 : f32
    %22 = vector.broadcast %cst_17 : f32 to vector<8x384xf32>
    %23 = arith.addf %22, %21 : vector<8x384xf32>
    %24 = arith.divf %22, %23 : vector<8x384xf32>
    %25 = vector.extract_strided_slice %24 {offsets = [0, 0], sizes = [8, 128], strides = [1, 1]} : vector<8x384xf32> to vector<8x128xf32>
    %26 = vector.extract_strided_slice %24 {offsets = [0, 128], sizes = [8, 128], strides = [1, 1]} : vector<8x384xf32> to vector<8x128xf32>
    %27 = vector.extract_strided_slice %24 {offsets = [0, 256], sizes = [8, 128], strides = [1, 1]} : vector<8x384xf32> to vector<8x128xf32>
    %28 = vector.extract_strided_slice %18 {offsets = [0, 384], sizes = [8, 128], strides = [1, 1]} : vector<8x512xf32> to vector<8x128xf32>
    %29 = math.tanh %28 : vector<8x128xf32>
    %30 = arith.mulf %26, %11 : vector<8x128xf32>
    %31 = arith.mulf %25, %29 : vector<8x128xf32>
    %32 = arith.addf %30, %31 : vector<8x128xf32>
    %33 = math.tanh %32 : vector<8x128xf32>
    %34 = arith.mulf %27, %33 : vector<8x128xf32>
    %35 = arith.index_cast %13 : i32 to index
    %c0_18 = arith.constant 0 : index
    %36 = vector.load %arg6[%35, %c0_18] : memref<64x128xf32, #tpu.memory_space<vmem>>, vector<8x128xf32>
    tpu.vector_store %arg6[%35, %c0_18], %34 {strides = array<i32>} : memref<64x128xf32, #tpu.memory_space<vmem>>, vector<8x128xf32>,
    %c1_i32 = arith.constant 1 : i32
    %c8_i32_19 = arith.constant 8 : i32
    %37 = arith.muli %c1_i32, %c8_i32_19 : i32
    %38 = tpu.assume_multiple %37, 8 : i32
    %39 = arith.index_cast %38 : i32 to index
    %c0_20 = arith.constant 0 : index
    %40 = vector.load %arg9[%39, %c0_20] : memref<64x512xf32, #tpu.memory_space<vmem>>, vector<8x512xf32>
    %c0_21 = arith.constant 0 : index
    %c0_22 = arith.constant 0 : index
    %41 = vector.load %arg8[%c0_21, %c0_22] : memref<128x512xf32, #tpu.memory_space<vmem>>, vector<128x512xf32>
    %cst_23 = arith.constant dense<0.000000e+00> : vector<8x512xf32>
    %42 = tpu.matmul %34, %41, %cst_23 {dimension_numbers = #tpu.dot_dimension_numbers<[1], [0], [0], [1], [0, 0, 1, 1], [], []>} : vector<8x128xf32>, vector<128x512xf32>, vector<8x512xf32> -> vector<8x512xf32>
    %43 = arith.addf %40, %42 : vector<8x512xf32>
    %44 = vector.extract_strided_slice %43 {offsets = [0, 0], sizes = [8, 384], strides = [1, 1]} : vector<8x512xf32> to vector<8x384xf32>
    %45 = arith.negf %44 : vector<8x384xf32>
    %46 = math.exp %45 : vector<8x384xf32>
    %cst_24 = arith.constant 1.000000e+00 : f32
    %47 = vector.broadcast %cst_24 : f32 to vector<8x384xf32>
    %48 = arith.addf %47, %46 : vector<8x384xf32>
    %49 = arith.divf %47, %48 : vector<8x384xf32>
    %50 = vector.extract_strided_slice %49 {offsets = [0, 0], sizes = [8, 128], strides = [1, 1]} : vector<8x384xf32> to vector<8x128xf32>
    %51 = vector.extract_strided_slice %49 {offsets = [0, 128], sizes = [8, 128], strides = [1, 1]} : vector<8x384xf32> to vector<8x128xf32>
    %52 = vector.extract_strided_slice %49 {offsets = [0, 256], sizes = [8, 128], strides = [1, 1]} : vector<8x384xf32> to vector<8x128xf32>
    %53 = vector.extract_strided_slice %43 {offsets = [0, 384], sizes = [8, 128], strides = [1, 1]} : vector<8x512xf32> to vector<8x128xf32>
    %54 = math.tanh %53 : vector<8x128xf32>
    %55 = arith.mulf %51, %32 : vector<8x128xf32>
    %56 = arith.mulf %50, %54 : vector<8x128xf32>
    %57 = arith.addf %55, %56 : vector<8x128xf32>
    %58 = math.tanh %57 : vector<8x128xf32>
    %59 = arith.mulf %52, %58 : vector<8x128xf32>
    %60 = arith.index_cast %38 : i32 to index
    %c0_25 = arith.constant 0 : index
    %61 = vector.load %arg6[%60, %c0_25] : memref<64x128xf32, #tpu.memory_space<vmem>>, vector<8x128xf32>
    tpu.vector_store %arg6[%60, %c0_25], %59 {strides = array<i32>} : memref<64x128xf32, #tpu.memory_space<vmem>>, vector<8x128xf32>,
    %c2_i32 = arith.constant 2 : i32
    %c8_i32_26 = arith.constant 8 : i32
    %62 = arith.muli %c2_i32, %c8_i32_26 : i32
    %63 = tpu.assume_multiple %62, 8 : i32
    %64 = arith.index_cast %63 : i32 to index
    %c0_27 = arith.constant 0 : index
    %65 = vector.load %arg9[%64, %c0_27] : memref<64x512xf32, #tpu.memory_space<vmem>>, vector<8x512xf32>
    %c0_28 = arith.constant 0 : index
    %c0_29 = arith.constant 0 : index
    %66 = vector.load %arg8[%c0_28, %c0_29] : memref<128x512xf32, #tpu.memory_space<vmem>>, vector<128x512xf32>
    %cst_30 = arith.constant dense<0.000000e+00> : vector<8x512xf32>
    %67 = tpu.matmul %59, %66, %cst_30 {dimension_numbers = #tpu.dot_dimension_numbers<[1], [0], [0], [1], [0, 0, 1, 1], [], []>} : vector<8x128xf32>, vector<128x512xf32>, vector<8x512xf32> -> vector<8x512xf32>
    %68 = arith.addf %65, %67 : vector<8x512xf32>
    %69 = vector.extract_strided_slice %68 {offsets = [0, 0], sizes = [8, 384], strides = [1, 1]} : vector<8x512xf32> to vector<8x384xf32>
    %70 = arith.negf %69 : vector<8x384xf32>
    %71 = math.exp %70 : vector<8x384xf32>
    %cst_31 = arith.constant 1.000000e+00 : f32
    %72 = vector.broadcast %cst_31 : f32 to vector<8x384xf32>
    %73 = arith.addf %72, %71 : vector<8x384xf32>
    %74 = arith.divf %72, %73 : vector<8x384xf32>
    %75 = vector.extract_strided_slice %74 {offsets = [0, 0], sizes = [8, 128], strides = [1, 1]} : vector<8x384xf32> to vector<8x128xf32>
    %76 = vector.extract_strided_slice %74 {offsets = [0, 128], sizes = [8, 128], strides = [1, 1]} : vector<8x384xf32> to vector<8x128xf32>
    %77 = vector.extract_strided_slice %74 {offsets = [0, 256], sizes = [8, 128], strides = [1, 1]} : vector<8x384xf32> to vector<8x128xf32>
    %78 = vector.extract_strided_slice %68 {offsets = [0, 384], sizes = [8, 128], strides = [1, 1]} : vector<8x512xf32> to vector<8x128xf32>
    %79 = math.tanh %78 : vector<8x128xf32>
    %80 = arith.mulf %76, %57 : vector<8x128xf32>
    %81 = arith.mulf %75, %79 : vector<8x128xf32>
    %82 = arith.addf %80, %81 : vector<8x128xf32>
    %83 = math.tanh %82 : vector<8x128xf32>
    %84 = arith.mulf %77, %83 : vector<8x128xf32>
    %85 = arith.index_cast %63 : i32 to index
    %c0_32 = arith.constant 0 : index
    %86 = vector.load %arg6[%85, %c0_32] : memref<64x128xf32, #tpu.memory_space<vmem>>, vector<8x128xf32>
    tpu.vector_store %arg6[%85, %c0_32], %84 {strides = array<i32>} : memref<64x128xf32, #tpu.memory_space<vmem>>, vector<8x128xf32>,
    %c3_i32 = arith.constant 3 : i32
    %c8_i32_33 = arith.constant 8 : i32
    %87 = arith.muli %c3_i32, %c8_i32_33 : i32
    %88 = tpu.assume_multiple %87, 8 : i32
    %89 = arith.index_cast %88 : i32 to index
    %c0_34 = arith.constant 0 : index
    %90 = vector.load %arg9[%89, %c0_34] : memref<64x512xf32, #tpu.memory_space<vmem>>, vector<8x512xf32>
    %c0_35 = arith.constant 0 : index
    %c0_36 = arith.constant 0 : index
    %91 = vector.load %arg8[%c0_35, %c0_36] : memref<128x512xf32, #tpu.memory_space<vmem>>, vector<128x512xf32>
    %cst_37 = arith.constant dense<0.000000e+00> : vector<8x512xf32>
    %92 = tpu.matmul %84, %91, %cst_37 {dimension_numbers = #tpu.dot_dimension_numbers<[1], [0], [0], [1], [0, 0, 1, 1], [], []>} : vector<8x128xf32>, vector<128x512xf32>, vector<8x512xf32> -> vector<8x512xf32>
    %93 = arith.addf %90, %92 : vector<8x512xf32>
    %94 = vector.extract_strided_slice %93 {offsets = [0, 0], sizes = [8, 384], strides = [1, 1]} : vector<8x512xf32> to vector<8x384xf32>
    %95 = arith.negf %94 : vector<8x384xf32>
    %96 = math.exp %95 : vector<8x384xf32>
    %cst_38 = arith.constant 1.000000e+00 : f32
    %97 = vector.broadcast %cst_38 : f32 to vector<8x384xf32>
    %98 = arith.addf %97, %96 : vector<8x384xf32>
    %99 = arith.divf %97, %98 : vector<8x384xf32>
    %100 = vector.extract_strided_slice %99 {offsets = [0, 0], sizes = [8, 128], strides = [1, 1]} : vector<8x384xf32> to vector<8x128xf32>
    %101 = vector.extract_strided_slice %99 {offsets = [0, 128], sizes = [8, 128], strides = [1, 1]} : vector<8x384xf32> to vector<8x128xf32>
    %102 = vector.extract_strided_slice %99 {offsets = [0, 256], sizes = [8, 128], strides = [1, 1]} : vector<8x384xf32> to vector<8x128xf32>
    %103 = vector.extract_strided_slice %93 {offsets = [0, 384], sizes = [8, 128], strides = [1, 1]} : vector<8x512xf32> to vector<8x128xf32>
    %104 = math.tanh %103 : vector<8x128xf32>
    %105 = arith.mulf %101, %82 : vector<8x128xf32>
    %106 = arith.mulf %100, %104 : vector<8x128xf32>
    %107 = arith.addf %105, %106 : vector<8x128xf32>
    %108 = math.tanh %107 : vector<8x128xf32>
    %109 = arith.mulf %102, %108 : vector<8x128xf32>
    %110 = arith.index_cast %88 : i32 to index
    %c0_39 = arith.constant 0 : index
    %111 = vector.load %arg6[%110, %c0_39] : memref<64x128xf32, #tpu.memory_space<vmem>>, vector<8x128xf32>
    tpu.vector_store %arg6[%110, %c0_39], %109 {strides = array<i32>} : memref<64x128xf32, #tpu.memory_space<vmem>>, vector<8x128xf32>,
    %c4_i32 = arith.constant 4 : i32
    %c8_i32_40 = arith.constant 8 : i32
    %112 = arith.muli %c4_i32, %c8_i32_40 : i32
    %113 = tpu.assume_multiple %112, 8 : i32
    %114 = arith.index_cast %113 : i32 to index
    %c0_41 = arith.constant 0 : index
    %115 = vector.load %arg9[%114, %c0_41] : memref<64x512xf32, #tpu.memory_space<vmem>>, vector<8x512xf32>
    %c0_42 = arith.constant 0 : index
    %c0_43 = arith.constant 0 : index
    %116 = vector.load %arg8[%c0_42, %c0_43] : memref<128x512xf32, #tpu.memory_space<vmem>>, vector<128x512xf32>
    %cst_44 = arith.constant dense<0.000000e+00> : vector<8x512xf32>
    %117 = tpu.matmul %109, %116, %cst_44 {dimension_numbers = #tpu.dot_dimension_numbers<[1], [0], [0], [1], [0, 0, 1, 1], [], []>} : vector<8x128xf32>, vector<128x512xf32>, vector<8x512xf32> -> vector<8x512xf32>
    %118 = arith.addf %115, %117 : vector<8x512xf32>
    %119 = vector.extract_strided_slice %118 {offsets = [0, 0], sizes = [8, 384], strides = [1, 1]} : vector<8x512xf32> to vector<8x384xf32>
    %120 = arith.negf %119 : vector<8x384xf32>
    %121 = math.exp %120 : vector<8x384xf32>
    %cst_45 = arith.constant 1.000000e+00 : f32
    %122 = vector.broadcast %cst_45 : f32 to vector<8x384xf32>
    %123 = arith.addf %122, %121 : vector<8x384xf32>
    %124 = arith.divf %122, %123 : vector<8x384xf32>
    %125 = vector.extract_strided_slice %124 {offsets = [0, 0], sizes = [8, 128], strides = [1, 1]} : vector<8x384xf32> to vector<8x128xf32>
    %126 = vector.extract_strided_slice %124 {offsets = [0, 128], sizes = [8, 128], strides = [1, 1]} : vector<8x384xf32> to vector<8x128xf32>
    %127 = vector.extract_strided_slice %124 {offsets = [0, 256], sizes = [8, 128], strides = [1, 1]} : vector<8x384xf32> to vector<8x128xf32>
    %128 = vector.extract_strided_slice %118 {offsets = [0, 384], sizes = [8, 128], strides = [1, 1]} : vector<8x512xf32> to vector<8x128xf32>
    %129 = math.tanh %128 : vector<8x128xf32>
    %130 = arith.mulf %126, %107 : vector<8x128xf32>
    %131 = arith.mulf %125, %129 : vector<8x128xf32>
    %132 = arith.addf %130, %131 : vector<8x128xf32>
    %133 = math.tanh %132 : vector<8x128xf32>
    %134 = arith.mulf %127, %133 : vector<8x128xf32>
    %135 = arith.index_cast %113 : i32 to index
    %c0_46 = arith.constant 0 : index
    %136 = vector.load %arg6[%135, %c0_46] : memref<64x128xf32, #tpu.memory_space<vmem>>, vector<8x128xf32>
    tpu.vector_store %arg6[%135, %c0_46], %134 {strides = array<i32>} : memref<64x128xf32, #tpu.memory_space<vmem>>, vector<8x128xf32>,
    %c5_i32 = arith.constant 5 : i32
    %c8_i32_47 = arith.constant 8 : i32
    %137 = arith.muli %c5_i32, %c8_i32_47 : i32
    %138 = tpu.assume_multiple %137, 8 : i32
    %139 = arith.index_cast %138 : i32 to index
    %c0_48 = arith.constant 0 : index
    %140 = vector.load %arg9[%139, %c0_48] : memref<64x512xf32, #tpu.memory_space<vmem>>, vector<8x512xf32>
    %c0_49 = arith.constant 0 : index
    %c0_50 = arith.constant 0 : index
    %141 = vector.load %arg8[%c0_49, %c0_50] : memref<128x512xf32, #tpu.memory_space<vmem>>, vector<128x512xf32>
    %cst_51 = arith.constant dense<0.000000e+00> : vector<8x512xf32>
    %142 = tpu.matmul %134, %141, %cst_51 {dimension_numbers = #tpu.dot_dimension_numbers<[1], [0], [0], [1], [0, 0, 1, 1], [], []>} : vector<8x128xf32>, vector<128x512xf32>, vector<8x512xf32> -> vector<8x512xf32>
    %143 = arith.addf %140, %142 : vector<8x512xf32>
    %144 = vector.extract_strided_slice %143 {offsets = [0, 0], sizes = [8, 384], strides = [1, 1]} : vector<8x512xf32> to vector<8x384xf32>
    %145 = arith.negf %144 : vector<8x384xf32>
    %146 = math.exp %145 : vector<8x384xf32>
    %cst_52 = arith.constant 1.000000e+00 : f32
    %147 = vector.broadcast %cst_52 : f32 to vector<8x384xf32>
    %148 = arith.addf %147, %146 : vector<8x384xf32>
    %149 = arith.divf %147, %148 : vector<8x384xf32>
    %150 = vector.extract_strided_slice %149 {offsets = [0, 0], sizes = [8, 128], strides = [1, 1]} : vector<8x384xf32> to vector<8x128xf32>
    %151 = vector.extract_strided_slice %149 {offsets = [0, 128], sizes = [8, 128], strides = [1, 1]} : vector<8x384xf32> to vector<8x128xf32>
    %152 = vector.extract_strided_slice %149 {offsets = [0, 256], sizes = [8, 128], strides = [1, 1]} : vector<8x384xf32> to vector<8x128xf32>
    %153 = vector.extract_strided_slice %143 {offsets = [0, 384], sizes = [8, 128], strides = [1, 1]} : vector<8x512xf32> to vector<8x128xf32>
    %154 = math.tanh %153 : vector<8x128xf32>
    %155 = arith.mulf %151, %132 : vector<8x128xf32>
    %156 = arith.mulf %150, %154 : vector<8x128xf32>
    %157 = arith.addf %155, %156 : vector<8x128xf32>
    %158 = math.tanh %157 : vector<8x128xf32>
    %159 = arith.mulf %152, %158 : vector<8x128xf32>
    %160 = arith.index_cast %138 : i32 to index
    %c0_53 = arith.constant 0 : index
    %161 = vector.load %arg6[%160, %c0_53] : memref<64x128xf32, #tpu.memory_space<vmem>>, vector<8x128xf32>
    tpu.vector_store %arg6[%160, %c0_53], %159 {strides = array<i32>} : memref<64x128xf32, #tpu.memory_space<vmem>>, vector<8x128xf32>,
    %c6_i32 = arith.constant 6 : i32
    %c8_i32_54 = arith.constant 8 : i32
    %162 = arith.muli %c6_i32, %c8_i32_54 : i32
    %163 = tpu.assume_multiple %162, 8 : i32
    %164 = arith.index_cast %163 : i32 to index
    %c0_55 = arith.constant 0 : index
    %165 = vector.load %arg9[%164, %c0_55] : memref<64x512xf32, #tpu.memory_space<vmem>>, vector<8x512xf32>
    %c0_56 = arith.constant 0 : index
    %c0_57 = arith.constant 0 : index
    %166 = vector.load %arg8[%c0_56, %c0_57] : memref<128x512xf32, #tpu.memory_space<vmem>>, vector<128x512xf32>
    %cst_58 = arith.constant dense<0.000000e+00> : vector<8x512xf32>
    %167 = tpu.matmul %159, %166, %cst_58 {dimension_numbers = #tpu.dot_dimension_numbers<[1], [0], [0], [1], [0, 0, 1, 1], [], []>} : vector<8x128xf32>, vector<128x512xf32>, vector<8x512xf32> -> vector<8x512xf32>
    %168 = arith.addf %165, %167 : vector<8x512xf32>
    %169 = vector.extract_strided_slice %168 {offsets = [0, 0], sizes = [8, 384], strides = [1, 1]} : vector<8x512xf32> to vector<8x384xf32>
    %170 = arith.negf %169 : vector<8x384xf32>
    %171 = math.exp %170 : vector<8x384xf32>
    %cst_59 = arith.constant 1.000000e+00 : f32
    %172 = vector.broadcast %cst_59 : f32 to vector<8x384xf32>
    %173 = arith.addf %172, %171 : vector<8x384xf32>
    %174 = arith.divf %172, %173 : vector<8x384xf32>
    %175 = vector.extract_strided_slice %174 {offsets = [0, 0], sizes = [8, 128], strides = [1, 1]} : vector<8x384xf32> to vector<8x128xf32>
    %176 = vector.extract_strided_slice %174 {offsets = [0, 128], sizes = [8, 128], strides = [1, 1]} : vector<8x384xf32> to vector<8x128xf32>
    %177 = vector.extract_strided_slice %174 {offsets = [0, 256], sizes = [8, 128], strides = [1, 1]} : vector<8x384xf32> to vector<8x128xf32>
    %178 = vector.extract_strided_slice %168 {offsets = [0, 384], sizes = [8, 128], strides = [1, 1]} : vector<8x512xf32> to vector<8x128xf32>
    %179 = math.tanh %178 : vector<8x128xf32>
    %180 = arith.mulf %176, %157 : vector<8x128xf32>
    %181 = arith.mulf %175, %179 : vector<8x128xf32>
    %182 = arith.addf %180, %181 : vector<8x128xf32>
    %183 = math.tanh %182 : vector<8x128xf32>
    %184 = arith.mulf %177, %183 : vector<8x128xf32>
    %185 = arith.index_cast %163 : i32 to index
    %c0_60 = arith.constant 0 : index
    %186 = vector.load %arg6[%185, %c0_60] : memref<64x128xf32, #tpu.memory_space<vmem>>, vector<8x128xf32>
    tpu.vector_store %arg6[%185, %c0_60], %184 {strides = array<i32>} : memref<64x128xf32, #tpu.memory_space<vmem>>, vector<8x128xf32>,
    %c7_i32 = arith.constant 7 : i32
    %c8_i32_61 = arith.constant 8 : i32
    %187 = arith.muli %c7_i32, %c8_i32_61 : i32
    %188 = tpu.assume_multiple %187, 8 : i32
    %189 = arith.index_cast %188 : i32 to index
    %c0_62 = arith.constant 0 : index
    %190 = vector.load %arg9[%189, %c0_62] : memref<64x512xf32, #tpu.memory_space<vmem>>, vector<8x512xf32>
    %c0_63 = arith.constant 0 : index
    %c0_64 = arith.constant 0 : index
    %191 = vector.load %arg8[%c0_63, %c0_64] : memref<128x512xf32, #tpu.memory_space<vmem>>, vector<128x512xf32>
    %cst_65 = arith.constant dense<0.000000e+00> : vector<8x512xf32>
    %192 = tpu.matmul %184, %191, %cst_65 {dimension_numbers = #tpu.dot_dimension_numbers<[1], [0], [0], [1], [0, 0, 1, 1], [], []>} : vector<8x128xf32>, vector<128x512xf32>, vector<8x512xf32> -> vector<8x512xf32>
    %193 = arith.addf %190, %192 : vector<8x512xf32>
    %194 = vector.extract_strided_slice %193 {offsets = [0, 0], sizes = [8, 384], strides = [1, 1]} : vector<8x512xf32> to vector<8x384xf32>
    %195 = arith.negf %194 : vector<8x384xf32>
    %196 = math.exp %195 : vector<8x384xf32>
    %cst_66 = arith.constant 1.000000e+00 : f32
    %197 = vector.broadcast %cst_66 : f32 to vector<8x384xf32>
    %198 = arith.addf %197, %196 : vector<8x384xf32>
    %199 = arith.divf %197, %198 : vector<8x384xf32>
    %200 = vector.extract_strided_slice %199 {offsets = [0, 0], sizes = [8, 128], strides = [1, 1]} : vector<8x384xf32> to vector<8x128xf32>
    %201 = vector.extract_strided_slice %199 {offsets = [0, 128], sizes = [8, 128], strides = [1, 1]} : vector<8x384xf32> to vector<8x128xf32>
    %202 = vector.extract_strided_slice %199 {offsets = [0, 256], sizes = [8, 128], strides = [1, 1]} : vector<8x384xf32> to vector<8x128xf32>
    %203 = vector.extract_strided_slice %193 {offsets = [0, 384], sizes = [8, 128], strides = [1, 1]} : vector<8x512xf32> to vector<8x128xf32>
    %204 = math.tanh %203 : vector<8x128xf32>
    %205 = arith.mulf %201, %182 : vector<8x128xf32>
    %206 = arith.mulf %200, %204 : vector<8x128xf32>
    %207 = arith.addf %205, %206 : vector<8x128xf32>
    %208 = math.tanh %207 : vector<8x128xf32>
    %209 = arith.mulf %202, %208 : vector<8x128xf32>
    %210 = arith.index_cast %188 : i32 to index
    %c0_67 = arith.constant 0 : index
    %211 = vector.load %arg6[%210, %c0_67] : memref<64x128xf32, #tpu.memory_space<vmem>>, vector<8x128xf32>
    tpu.vector_store %arg6[%210, %c0_67], %209 {strides = array<i32>} : memref<64x128xf32, #tpu.memory_space<vmem>>, vector<8x128xf32>,
    %c8_i32_68 = arith.constant 8 : i32
    %c0_69 = arith.constant 0 : index
    %c0_70 = arith.constant 0 : index
    %212 = vector.load %arg10[%c0_69, %c0_70] : memref<8x128xf32, #tpu.memory_space<vmem>>, vector<8x128xf32>
    tpu.vector_store %arg10[%c0_69, %c0_70], %209 {strides = array<i32>} : memref<8x128xf32, #tpu.memory_space<vmem>>, vector<8x128xf32>,
    %c0_71 = arith.constant 0 : index
    %c0_72 = arith.constant 0 : index
    %213 = vector.load %arg11[%c0_71, %c0_72] : memref<8x128xf32, #tpu.memory_space<vmem>>, vector<8x128xf32>
    tpu.vector_store %arg11[%c0_71, %c0_72], %207 {strides = array<i32>} : memref<8x128xf32, #tpu.memory_space<vmem>>, vector<8x128xf32>,
    return
  }
  func.func @transform_0(%arg0: i32, %arg1: i32) -> (i32, i32) {
    %c1_i32 = arith.constant 1 : i32
    %0 = arith.muli %arg0, %c1_i32 : i32
    %1 = arith.addi %0, %arg1 : i32
    %c0_i32 = arith.constant 0 : i32
    %c0_i32_0 = arith.constant 0 : i32
    return %1, %c0_i32 : i32, i32
  }
  func.func @transform_3(%arg0: i32, %arg1: i32) -> (i32, i32) {
    %c0_i32 = arith.constant 0 : i32
    %c0_i32_0 = arith.constant 0 : i32
    %c0_i32_1 = arith.constant 0 : i32
    return %c0_i32, %c0_i32_0 : i32, i32
  }
  func.func @transform_4(%arg0: i32, %arg1: i32) -> (i32, i32) {
    %c1_i32 = arith.constant 1 : i32
    %0 = arith.muli %arg0, %c1_i32 : i32
    %1 = arith.addi %0, %arg1 : i32
    %c0_i32 = arith.constant 0 : i32
    %c0_i32_0 = arith.constant 0 : i32
    return %1, %c0_i32 : i32, i32
  }
}

</mosaic_0001>

<bundles_post_ra>
// kernel: _lstm_forward_impl.3
= control target key start
LH: loop header
LB: loop body
LE: loop exit
PB: predicated region body
PF: predicated region fallthrough
CT: control target
= control target key end

     0   :  { %s4034_s0 = inlined_call_operand.vmem [shape: f32[64,128], index: 0, kind: input, shape index: {}]   ;;  %s4035_s1 = inlined_call_operand.vmem [shape: f32[128,512], index: 1, kind: input, shape index: {}]   ;;  %s4036_s2 = inlined_call_operand.vmem [shape: f32[128,512], index: 2, kind: input, shape index: {}]   ;;  %s4037_s3 = inlined_call_operand.vmem [shape: f32[1,512], index: 3, kind: input, shape index: {}]   ;;  %s4038_s4 = inlined_call_operand.vmem [shape: f32[64,128], index: 4, kind: output, shape index: {}]  }
   0x1   :  { %v2632_v0 = vld [vmem:[%s4035_s1] sm:$0xff]  ;;  %v2637_v1 = vld [vmem:[%s4035_s1 + $0x8] sm:$0xff]  ;;  %v2642_v2 = vld [vmem:[%s4035_s1 + $0x10] sm:$0xff] }
   0x2   :  { %4124 = vst [vmem:[#allocation13_spill] sm:$0xff] %v2632_v0  ;;  %v2647_v3 = vld [vmem:[%s4035_s1 + $0x18] sm:$0xff]  ;;  %v2652_v4 = vld [vmem:[%s4035_s1 + $0x20] sm:$0xff]  ;;  %v2657_v5 = vld [vmem:[%s4035_s1 + $0x28] sm:$0xff] }
   0x3   :  { %4125 = vst [vmem:[#allocation14_spill] sm:$0xff] %v2637_v1  ;;  %v2662_v6 = vld [vmem:[%s4035_s1 + $0x30] sm:$0xff]  ;;  %v2667_v7 = vld [vmem:[%s4035_s1 + $0x38] sm:$0xff]  ;;  %v2672_v8 = vld [vmem:[%s4035_s1 + $0x40] sm:$0xff] }
   0x4   :  { %4126 = vst [vmem:[#allocation15_spill] sm:$0xff] %v2642_v2  ;;  %v2677_v9 = vld [vmem:[%s4035_s1 + $0x48] sm:$0xff]  ;;  %v2682_v10 = vld [vmem:[%s4035_s1 + $0x50] sm:$0xff]  ;;  %v2687_v11 = vld [vmem:[%s4035_s1 + $0x58] sm:$0xff] }
   0x5   :  { %4127 = vst [vmem:[#allocation16_spill] sm:$0xff] %v2647_v3  ;;  %v2692_v12 = vld [vmem:[%s4035_s1 + $0x60] sm:$0xff]  ;;  %v2697_v13 = vld [vmem:[%s4035_s1 + $0x68] sm:$0xff]  ;;  %v2702_v14 = vld [vmem:[%s4035_s1 + $0x70] sm:$0xff] }
   0x6   :  { %4128 = vst [vmem:[#allocation17_spill] sm:$0xff] %v2667_v7  ;;  %v2707_v15 = vld [vmem:[%s4035_s1 + $0x78] sm:$0xff]  ;;  %v2712_v16 = vld [vmem:[%s4035_s1 + $0x80] sm:$0xff]  ;;  %v2717_v17 = vld [vmem:[%s4035_s1 + $0x88] sm:$0xff] }
   0x7   :  { %v2722_v18 = vld [vmem:[%s4035_s1 + $0x90] sm:$0xff]  ;;  %v2727_v19 = vld [vmem:[%s4035_s1 + $0x98] sm:$0xff]  ;;  %v2732_v20 = vld [vmem:[%s4035_s1 + $0xa0] sm:$0xff] }
   0x8   :  { %v2737_v21 = vld [vmem:[%s4035_s1 + $0xa8] sm:$0xff]  ;;  %v2742_v22 = vld [vmem:[%s4035_s1 + $0xb0] sm:$0xff]  ;;  %v2747_v23 = vld [vmem:[%s4035_s1 + $0xb8] sm:$0xff] }
   0x9   :  { %v2752_v24 = vld [vmem:[%s4035_s1 + $0xc0] sm:$0xff]  ;;  %v2757_v25 = vld [vmem:[%s4035_s1 + $0xc8] sm:$0xff]  ;;  %v2762_v26 = vld [vmem:[%s4035_s1 + $0xd0] sm:$0xff] }
   0xa   :  { %v2767_v27 = vld [vmem:[%s4035_s1 + $0xd8] sm:$0xff]  ;;  %v2772_v28 = vld [vmem:[%s4035_s1 + $0xe0] sm:$0xff]  ;;  %v2777_v29 = vld [vmem:[%s4035_s1 + $0xe8] sm:$0xff] }
   0xb   :  { %v2782_v30 = vld [vmem:[%s4035_s1 + $0xf0] sm:$0xff]  ;;  %v2787_v31 = vld [vmem:[%s4035_s1 + $0xf8] sm:$0xff]  ;;  %v2792_v32 = vld [vmem:[%s4035_s1 + $0x100] sm:$0xff] }
   0xc   :  { %v2797_v33 = vld [vmem:[%s4035_s1 + $0x108] sm:$0xff]  ;;  %v2802_v34 = vld [vmem:[%s4035_s1 + $0x110] sm:$0xff]  ;;  %v2807_v35 = vld [vmem:[%s4035_s1 + $0x118] sm:$0xff] }
   0xd   :  { %v2812_v36 = vld [vmem:[%s4035_s1 + $0x120] sm:$0xff]  ;;  %v2817_v37 = vld [vmem:[%s4035_s1 + $0x128] sm:$0xff]  ;;  %v2822_v38 = vld [vmem:[%s4035_s1 + $0x130] sm:$0xff] }
   0xe   :  { %v2827_v39 = vld [vmem:[%s4035_s1 + $0x138] sm:$0xff]  ;;  %v2832_v40 = vld [vmem:[%s4035_s1 + $0x140] sm:$0xff]  ;;  %v2837_v41 = vld [vmem:[%s4035_s1 + $0x148] sm:$0xff] }
   0xf   :  { %v2842_v42 = vld [vmem:[%s4035_s1 + $0x150] sm:$0xff]  ;;  %v2847_v43 = vld [vmem:[%s4035_s1 + $0x158] sm:$0xff]  ;;  %v2852_v44 = vld [vmem:[%s4035_s1 + $0x160] sm:$0xff] }
  0x10   :  { %v2857_v45 = vld [vmem:[%s4035_s1 + $0x168] sm:$0xff]  ;;  %v2862_v46 = vld [vmem:[%s4035_s1 + $0x170] sm:$0xff]  ;;  %v2867_v47 = vld [vmem:[%s4035_s1 + $0x178] sm:$0xff] }
  0x11   :  { %v2872_v48 = vld [vmem:[%s4035_s1 + $0x180] sm:$0xff]  ;;  %v2877_v49 = vld [vmem:[%s4035_s1 + $0x188] sm:$0xff]  ;;  %v2882_v50 = vld [vmem:[%s4035_s1 + $0x190] sm:$0xff] }
  0x12   :  { %v2887_v51 = vld [vmem:[%s4035_s1 + $0x198] sm:$0xff]  ;;  %v2892_v52 = vld [vmem:[%s4035_s1 + $0x1a0] sm:$0xff]  ;;  %v2897_v53 = vld [vmem:[%s4035_s1 + $0x1a8] sm:$0xff] }
  0x13   :  { %v2902_v54 = vld [vmem:[%s4035_s1 + $0x1b0] sm:$0xff]  ;;  %v2907_v55 = vld [vmem:[%s4035_s1 + $0x1b8] sm:$0xff]  ;;  %v2912_v56 = vld [vmem:[%s4035_s1 + $0x1c0] sm:$0xff] }
  0x14   :  { %v2917_v57 = vld [vmem:[%s4035_s1 + $0x1c8] sm:$0xff]  ;;  %v2922_v58 = vld [vmem:[%s4035_s1 + $0x1d0] sm:$0xff]  ;;  %v2927_v59 = vld [vmem:[%s4035_s1 + $0x1d8] sm:$0xff] }
  0x15   :  { %v2932_v60 = vld [vmem:[%s4035_s1 + $0x1e0] sm:$0xff]  ;;  %v2937_v61 = vld [vmem:[%s4035_s1 + $0x1e8] sm:$0xff]  ;;  %v2942_v62 = vld [vmem:[%s4035_s1 + $0x1f0] sm:$0xff] }
  0x16   :  { %v2947_v63 = vld [vmem:[%s4035_s1 + $0x1f8] sm:$0xff] }
  0x17   :  { %196 = vsyncadd [#allocation7], 8192 }
  0x18   :  { %2599 = dma.done.wait [#allocation7], 8192 }
  0x19   :  { %2600 = vsyncadd [#allocation7], 4294959104 }
  0x1a   :  { %v2952_v3 = vld [vmem:[%s4036_s2] sm:$0xff]  ;;  %v2957_v2 = vld [vmem:[%s4036_s2 + $0x8] sm:$0xff]  ;;  %v2962_v1 = vld [vmem:[%s4036_s2 + $0x10] sm:$0xff] }
  0x1b   :  { %4129 = vst [vmem:[#allocation18_spill] sm:$0xff] %v2952_v3  ;;  %v2967_v0 = vld [vmem:[%s4036_s2 + $0x18] sm:$0xff]  ;;  %v2972_v7 = vld [vmem:[%s4036_s2 + $0x20] sm:$0xff]  ;;  %v2977_v3 = vld [vmem:[%s4036_s2 + $0x28] sm:$0xff] }
  0x1c   :  { %4130 = vst [vmem:[#allocation19_spill] sm:$0xff] %v2957_v2  ;;  %v2982_v2 = vld [vmem:[%s4036_s2 + $0x30] sm:$0xff] }
  0x1d   :  { %4131 = vst [vmem:[#allocation20_spill] sm:$0xff] %v2962_v1  ;;  %v2987_v1 = vld [vmem:[%s4036_s2 + $0x38] sm:$0xff] }
  0x1e   :  { %4132 = vst [vmem:[#allocation21_spill] sm:$0xff] %v2967_v0  ;;  %v2992_v0 = vld [vmem:[%s4036_s2 + $0x40] sm:$0xff] }
  0x1f   :  { %4133 = vst [vmem:[#allocation22_spill] sm:$0xff] %v2972_v7  ;;  %v2997_v7 = vld [vmem:[%s4036_s2 + $0x48] sm:$0xff] }
  0x20   :  { %4134 = vst [vmem:[#allocation23_spill] sm:$0xff] %v2977_v3  ;;  %v3002_v3 = vld [vmem:[%s4036_s2 + $0x50] sm:$0xff] }
  0x21   :  { %4135 = vst [vmem:[#allocation24_spill] sm:$0xff] %v2982_v2  ;;  %v3007_v2 = vld [vmem:[%s4036_s2 + $0x58] sm:$0xff] }
  0x22   :  { %4136 = vst [vmem:[#allocation25_spill] sm:$0xff] %v2987_v1  ;;  %v3012_v1 = vld [vmem:[%s4036_s2 + $0x60] sm:$0xff] }
  0x23   :  { %4137 = vst [vmem:[#allocation26_spill] sm:$0xff] %v2992_v0  ;;  %v3017_v0 = vld [vmem:[%s4036_s2 + $0x68] sm:$0xff] }
  0x24   :  { %4138 = vst [vmem:[#allocation27_spill] sm:$0xff] %v2997_v7  ;;  %v3022_v7 = vld [vmem:[%s4036_s2 + $0x70] sm:$0xff] }
  0x25   :  { %4139 = vst [vmem:[#allocation28_spill] sm:$0xff] %v3002_v3  ;;  %v3027_v3 = vld [vmem:[%s4036_s2 + $0x78] sm:$0xff] }
  0x26   :  { %4140 = vst [vmem:[#allocation29_spill] sm:$0xff] %v3007_v2  ;;  %v3032_v2 = vld [vmem:[%s4036_s2 + $0x80] sm:$0xff] }
  0x27   :  { %4141 = vst [vmem:[#allocation30_spill] sm:$0xff] %v3012_v1  ;;  %v3037_v1 = vld [vmem:[%s4036_s2 + $0x88] sm:$0xff] }
  0x28   :  { %4142 = vst [vmem:[#allocation31_spill] sm:$0xff] %v3017_v0  ;;  %v3042_v0 = vld [vmem:[%s4036_s2 + $0x90] sm:$0xff] }
  0x29   :  { %4143 = vst [vmem:[#allocation32_spill] sm:$0xff] %v3022_v7  ;;  %v3047_v7 = vld [vmem:[%s4036_s2 + $0x98] sm:$0xff] }
  0x2a   :  { %4144 = vst [vmem:[#allocation33_spill] sm:$0xff] %v3027_v3  ;;  %v3052_v3 = vld [vmem:[%s4036_s2 + $0xa0] sm:$0xff] }
  0x2b   :  { %4145 = vst [vmem:[#allocation34_spill] sm:$0xff] %v3032_v2  ;;  %v3057_v2 = vld [vmem:[%s4036_s2 + $0xa8] sm:$0xff] }
  0x2c   :  { %4146 = vst [vmem:[#allocation35_spill] sm:$0xff] %v3037_v1  ;;  %v3062_v1 = vld [vmem:[%s4036_s2 + $0xb0] sm:$0xff] }
  0x2d   :  { %4147 = vst [vmem:[#allocation36_spill] sm:$0xff] %v3042_v0  ;;  %v3067_v0 = vld [vmem:[%s4036_s2 + $0xb8] sm:$0xff] }
  0x2e   :  { %4148 = vst [vmem:[#allocation37_spill] sm:$0xff] %v3047_v7  ;;  %v3072_v7 = vld [vmem:[%s4036_s2 + $0xc0] sm:$0xff] }
  0x2f   :  { %4149 = vst [vmem:[#allocation38_spill] sm:$0xff] %v3052_v3  ;;  %v3077_v3 = vld [vmem:[%s4036_s2 + $0xc8] sm:$0xff] }
  0x30   :  { %4150 = vst [vmem:[#allocation39_spill] sm:$0xff] %v3057_v2  ;;  %v3082_v2 = vld [vmem:[%s4036_s2 + $0xd0] sm:$0xff] }
  0x31   :  { %4151 = vst [vmem:[#allocation40_spill] sm:$0xff] %v3062_v1  ;;  %v3087_v1 = vld [vmem:[%s4036_s2 + $0xd8] sm:$0xff] }
  0x32   :  { %4152 = vst [vmem:[#allocation41_spill] sm:$0xff] %v3067_v0  ;;  %v3092_v0 = vld [vmem:[%s4036_s2 + $0xe0] sm:$0xff] }
  0x33   :  { %4153 = vst [vmem:[#allocation42_spill] sm:$0xff] %v3072_v7  ;;  %v3097_v7 = vld [vmem:[%s4036_s2 + $0xe8] sm:$0xff] }
  0x34   :  { %4154 = vst [vmem:[#allocation43_spill] sm:$0xff] %v3077_v3  ;;  %v3102_v3 = vld [vmem:[%s4036_s2 + $0xf0] sm:$0xff] }
  0x35   :  { %4155 = vst [vmem:[#allocation44_spill] sm:$0xff] %v3082_v2  ;;  %v3107_v2 = vld [vmem:[%s4036_s2 + $0xf8] sm:$0xff] }
  0x36   :  { %4156 = vst [vmem:[#allocation45_spill] sm:$0xff] %v3087_v1  ;;  %v3112_v1 = vld [vmem:[%s4036_s2 + $0x100] sm:$0xff] }
  0x37   :  { %4157 = vst [vmem:[#allocation46_spill] sm:$0xff] %v3092_v0  ;;  %v3117_v0 = vld [vmem:[%s4036_s2 + $0x108] sm:$0xff] }
  0x38   :  { %4158 = vst [vmem:[#allocation47_spill] sm:$0xff] %v3097_v7  ;;  %v3122_v7 = vld [vmem:[%s4036_s2 + $0x110] sm:$0xff] }
  0x39   :  { %4159 = vst [vmem:[#allocation48_spill] sm:$0xff] %v3102_v3  ;;  %v3127_v3 = vld [vmem:[%s4036_s2 + $0x118] sm:$0xff] }
  0x3a   :  { %4160 = vst [vmem:[#allocation49_spill] sm:$0xff] %v3107_v2  ;;  %v3132_v2 = vld [vmem:[%s4036_s2 + $0x120] sm:$0xff] }
  0x3b   :  { %4161 = vst [vmem:[#allocation50_spill] sm:$0xff] %v3112_v1  ;;  %v3137_v1 = vld [vmem:[%s4036_s2 + $0x128] sm:$0xff] }
  0x3c   :  { %4162 = vst [vmem:[#allocation51_spill] sm:$0xff] %v3117_v0  ;;  %v3142_v0 = vld [vmem:[%s4036_s2 + $0x130] sm:$0xff] }
  0x3d   :  { %4163 = vst [vmem:[#allocation52_spill] sm:$0xff] %v3122_v7  ;;  %v3147_v7 = vld [vmem:[%s4036_s2 + $0x138] sm:$0xff] }
  0x3e   :  { %4164 = vst [vmem:[#allocation53_spill] sm:$0xff] %v3127_v3  ;;  %v3152_v3 = vld [vmem:[%s4036_s2 + $0x140] sm:$0xff] }
  0x3f   :  { %4165 = vst [vmem:[#allocation54_spill] sm:$0xff] %v3132_v2  ;;  %v3157_v2 = vld [vmem:[%s4036_s2 + $0x148] sm:$0xff] }
  0x40   :  { %4166 = vst [vmem:[#allocation55_spill] sm:$0xff] %v3137_v1  ;;  %v3162_v1 = vld [vmem:[%s4036_s2 + $0x150] sm:$0xff] }
  0x41   :  { %4167 = vst [vmem:[#allocation56_spill] sm:$0xff] %v3142_v0  ;;  %v3167_v0 = vld [vmem:[%s4036_s2 + $0x158] sm:$0xff] }
  0x42   :  { %4168 = vst [vmem:[#allocation57_spill] sm:$0xff] %v3147_v7  ;;  %v3172_v7 = vld [vmem:[%s4036_s2 + $0x160] sm:$0xff] }
  0x43   :  { %4169 = vst [vmem:[#allocation58_spill] sm:$0xff] %v3152_v3  ;;  %v3177_v3 = vld [vmem:[%s4036_s2 + $0x168] sm:$0xff] }
  0x44   :  { %4170 = vst [vmem:[#allocation59_spill] sm:$0xff] %v3157_v2  ;;  %v3182_v2 = vld [vmem:[%s4036_s2 + $0x170] sm:$0xff] }
  0x45   :  { %4171 = vst [vmem:[#allocation60_spill] sm:$0xff] %v3162_v1  ;;  %v3187_v1 = vld [vmem:[%s4036_s2 + $0x178] sm:$0xff] }
  0x46   :  { %4172 = vst [vmem:[#allocation61_spill] sm:$0xff] %v3167_v0  ;;  %v3192_v0 = vld [vmem:[%s4036_s2 + $0x180] sm:$0xff] }
  0x47   :  { %4173 = vst [vmem:[#allocation62_spill] sm:$0xff] %v3172_v7  ;;  %v3197_v7 = vld [vmem:[%s4036_s2 + $0x188] sm:$0xff] }
  0x48   :  { %4174 = vst [vmem:[#allocation63_spill] sm:$0xff] %v3177_v3  ;;  %v3202_v3 = vld [vmem:[%s4036_s2 + $0x190] sm:$0xff] }
  0x49   :  { %4175 = vst [vmem:[#allocation64_spill] sm:$0xff] %v3182_v2  ;;  %v3207_v2 = vld [vmem:[%s4036_s2 + $0x198] sm:$0xff] }
  0x4a   :  { %4176 = vst [vmem:[#allocation65_spill] sm:$0xff] %v3187_v1  ;;  %v3212_v1 = vld [vmem:[%s4036_s2 + $0x1a0] sm:$0xff] }
  0x4b   :  { %4177 = vst [vmem:[#allocation66_spill] sm:$0xff] %v3192_v0  ;;  %v3217_v0 = vld [vmem:[%s4036_s2 + $0x1a8] sm:$0xff] }
  0x4c   :  { %4178 = vst [vmem:[#allocation67_spill] sm:$0xff] %v3197_v7  ;;  %v3222_v7 = vld [vmem:[%s4036_s2 + $0x1b0] sm:$0xff] }
  0x4d   :  { %4179 = vst [vmem:[#allocation68_spill] sm:$0xff] %v3202_v3  ;;  %v3227_v3 = vld [vmem:[%s4036_s2 + $0x1b8] sm:$0xff] }
  0x4e   :  { %4180 = vst [vmem:[#allocation69_spill] sm:$0xff] %v3207_v2  ;;  %v3232_v2 = vld [vmem:[%s4036_s2 + $0x1c0] sm:$0xff] }
  0x4f   :  { %4181 = vst [vmem:[#allocation70_spill] sm:$0xff] %v3212_v1  ;;  %v3237_v1 = vld [vmem:[%s4036_s2 + $0x1c8] sm:$0xff] }
  0x50   :  { %4182 = vst [vmem:[#allocation71_spill] sm:$0xff] %v3217_v0  ;;  %v3242_v0 = vld [vmem:[%s4036_s2 + $0x1d0] sm:$0xff] }
  0x51   :  { %4183 = vst [vmem:[#allocation72_spill] sm:$0xff] %v3222_v7  ;;  %v3247_v7 = vld [vmem:[%s4036_s2 + $0x1d8] sm:$0xff] }
  0x52   :  { %4184 = vst [vmem:[#allocation73_spill] sm:$0xff] %v3227_v3  ;;  %v3252_v3 = vld [vmem:[%s4036_s2 + $0x1e0] sm:$0xff] }
  0x53   :  { %4185 = vst [vmem:[#allocation74_spill] sm:$0xff] %v3232_v2  ;;  %v3257_v2 = vld [vmem:[%s4036_s2 + $0x1e8] sm:$0xff] }
  0x54   :  { %4186 = vst [vmem:[#allocation75_spill] sm:$0xff] %v3237_v1  ;;  %v3262_v1 = vld [vmem:[%s4036_s2 + $0x1f0] sm:$0xff] }
  0x55   :  { %4187 = vst [vmem:[#allocation76_spill] sm:$0xff] %v3242_v0  ;;  %v3267_v0 = vld [vmem:[%s4036_s2 + $0x1f8] sm:$0xff] }
  0x56   :  { %344 = vsyncadd [#allocation9], 8192 }
  0x57   :  { %2601 = dma.done.wait [#allocation9], 8192 }
  0x58   :  { %2602 = vsyncadd [#allocation9], 4294959104  ;;  %433 = vmatpush.msra.mxu0 %v2932_v60  ;;  %474 = vmatpush.msra.mxu1 %v2937_v61  ;;  %v4238_v60 = vld [vmem:[#allocation32_spill] sm:$0xff]  ;;  %v4239_v61 = vld [vmem:[#allocation33_spill] sm:$0xff] }
  0x59   :  { %515 = vmatpush.msra.mxu2 %v2942_v62  ;;  %556 = vmatpush.msra.mxu3 %v2947_v63  ;;  %v4240_v62 = vld [vmem:[#allocation26_spill] sm:$0xff]  ;;  %v4241_v63 = vld [vmem:[#allocation27_spill] sm:$0xff] }
  0x5a   :  { %434 = vmatpush.msra.mxu0 %v2912_v56  ;;  %475 = vmatpush.msra.mxu1 %v2917_v57  ;;  %v4234_v56 = vld [vmem:[#allocation36_spill] sm:$0xff]  ;;  %v4235_v57 = vld [vmem:[#allocation37_spill] sm:$0xff] }
  0x5b   :  { %516 = vmatpush.msra.mxu2 %v2922_v58  ;;  %557 = vmatpush.msra.mxu3 %v2927_v59  ;;  %v4236_v58 = vld [vmem:[#allocation30_spill] sm:$0xff]  ;;  %v4237_v59 = vld [vmem:[#allocation31_spill] sm:$0xff] }
  0x5c   :  { %435 = vmatpush.msra.mxu0 %v2892_v52  ;;  %476 = vmatpush.msra.mxu1 %v2897_v53  ;;  %v4230_v52 = vld [vmem:[#allocation40_spill] sm:$0xff]  ;;  %v4231_v53 = vld [vmem:[#allocation41_spill] sm:$0xff] }
  0x5d   :  { %517 = vmatpush.msra.mxu2 %v2902_v54  ;;  %558 = vmatpush.msra.mxu3 %v2907_v55  ;;  %v4232_v54 = vld [vmem:[#allocation34_spill] sm:$0xff]  ;;  %v4233_v55 = vld [vmem:[#allocation35_spill] sm:$0xff] }
  0x5e   :  { %436 = vmatpush.msra.mxu0 %v2872_v48  ;;  %477 = vmatpush.msra.mxu1 %v2877_v49  ;;  %v4227_v48 = vld [vmem:[#allocation45_spill] sm:$0xff]  ;;  %v4228_v49 = vld [vmem:[#allocation38_spill] sm:$0xff] }
  0x5f   :  { %518 = vmatpush.msra.mxu2 %v2882_v50  ;;  %559 = vmatpush.msra.mxu3 %v2887_v51  ;;  %v4229_v50 = vld [vmem:[#allocation39_spill] sm:$0xff]  ;;  %v355_v51 = vld [vmem:[%s4034_s0 + $0x20] sm:$0xff] }
  0x60   :  { %437 = vmatpush.msra.mxu0 %v2852_v44  ;;  %478 = vmatpush.msra.mxu1 %v2857_v45  ;;  %v4223_v44 = vld [vmem:[#allocation49_spill] sm:$0xff]  ;;  %v4224_v45 = vld [vmem:[#allocation42_spill] sm:$0xff] }
  0x61   :  { %519 = vmatpush.msra.mxu2 %v2862_v46  ;;  %560 = vmatpush.msra.mxu3 %v2867_v47  ;;  %v4225_v46 = vld [vmem:[#allocation43_spill] sm:$0xff]  ;;  %v4226_v47 = vld [vmem:[#allocation44_spill] sm:$0xff] }
  0x62   :  { %438 = vmatpush.msra.mxu0 %v2832_v40  ;;  %479 = vmatpush.msra.mxu1 %v2837_v41  ;;  %v4219_v40 = vld [vmem:[#allocation53_spill] sm:$0xff]  ;;  %v4220_v41 = vld [vmem:[#allocation46_spill] sm:$0xff] }
  0x63   :  { %520 = vmatpush.msra.mxu2 %v2842_v42  ;;  %561 = vmatpush.msra.mxu3 %v2847_v43  ;;  %v4221_v42 = vld [vmem:[#allocation47_spill] sm:$0xff]  ;;  %v4222_v43 = vld [vmem:[#allocation48_spill] sm:$0xff] }
  0x64   :  { %439 = vmatpush.msra.mxu0 %v2812_v36  ;;  %480 = vmatpush.msra.mxu1 %v2817_v37  ;;  %v4216_v36 = vld [vmem:[#allocation50_spill] sm:$0xff]  ;;  %v4217_v37 = vld [vmem:[#allocation51_spill] sm:$0xff] }
  0x65   :  { %521 = vmatpush.msra.mxu2 %v2822_v38  ;;  %562 = vmatpush.msra.mxu3 %v2827_v39  ;;  %v354_v38 = vld [vmem:[%s4034_s0 + $0x18] sm:$0xff] }
  0x66   :  { %440 = vmatpush.msra.mxu0 %v2792_v32  ;;  %481 = vmatpush.msra.mxu1 %v2797_v33  ;;  %v4212_v32 = vld [vmem:[#allocation54_spill] sm:$0xff]  ;;  %v4213_v33 = vld [vmem:[#allocation55_spill] sm:$0xff]  ;;  %v4218_v39 = vld [vmem:[#allocation52_spill] sm:$0xff] }
  0x67   :  { %522 = vmatpush.msra.mxu2 %v2802_v34  ;;  %563 = vmatpush.msra.mxu3 %v2807_v35  ;;  %v4214_v34 = vld [vmem:[#allocation56_spill] sm:$0xff]  ;;  %v4215_v35 = vld [vmem:[#allocation57_spill] sm:$0xff] }
  0x68   :  { %441 = vmatpush.msra.mxu0 %v2772_v28  ;;  %482 = vmatpush.msra.mxu1 %v2777_v29  ;;  %v4208_v28 = vld [vmem:[#allocation58_spill] sm:$0xff]  ;;  %v4209_v29 = vld [vmem:[#allocation59_spill] sm:$0xff] }
  0x69   :  { %523 = vmatpush.msra.mxu2 %v2782_v30  ;;  %564 = vmatpush.msra.mxu3 %v2787_v31  ;;  %v4210_v30 = vld [vmem:[#allocation60_spill] sm:$0xff]  ;;  %v4211_v31 = vld [vmem:[#allocation61_spill] sm:$0xff] }
  0x6a   :  { %442 = vmatpush.msra.mxu0 %v2752_v24  ;;  %483 = vmatpush.msra.mxu1 %v2757_v25  ;;  %v4205_v24 = vld [vmem:[#allocation63_spill] sm:$0xff] }
  0x6b   :  { %524 = vmatpush.msra.mxu2 %v2762_v26  ;;  %565 = vmatpush.msra.mxu3 %v2767_v27  ;;  %v353_v25 = vld [vmem:[%s4034_s0 + $0x10] sm:$0xff]  ;;  %v4206_v26 = vld [vmem:[#allocation64_spill] sm:$0xff]  ;;  %v4207_v27 = vld [vmem:[#allocation65_spill] sm:$0xff] }
  0x6c   :  { %443 = vmatpush.msra.mxu0 %v2732_v20  ;;  %484 = vmatpush.msra.mxu1 %v2737_v21  ;;  %v4201_v20 = vld [vmem:[#allocation67_spill] sm:$0xff]  ;;  %v4202_v21 = vld [vmem:[#allocation68_spill] sm:$0xff] }
  0x6d   :  { %525 = vmatpush.msra.mxu2 %v2742_v22  ;;  %566 = vmatpush.msra.mxu3 %v2747_v23  ;;  %v4203_v22 = vld [vmem:[#allocation69_spill] sm:$0xff]  ;;  %v4204_v23 = vld [vmem:[#allocation62_spill] sm:$0xff] }
  0x6e   :  { %444 = vmatpush.msra.mxu0 %v2712_v16  ;;  %485 = vmatpush.msra.mxu1 %v2717_v17  ;;  %v4197_v16 = vld [vmem:[#allocation71_spill] sm:$0xff]  ;;  %v4198_v17 = vld [vmem:[#allocation72_spill] sm:$0xff] }
  0x6f   :  { %526 = vmatpush.msra.mxu2 %v2722_v18  ;;  %567 = vmatpush.msra.mxu3 %v2727_v19  ;;  %v4199_v18 = vld [vmem:[#allocation73_spill] sm:$0xff]  ;;  %v4200_v19 = vld [vmem:[#allocation66_spill] sm:$0xff] }
  0x70   :  { %445 = vmatpush.msra.mxu0 %v2692_v12  ;;  %486 = vmatpush.msra.mxu1 %v2697_v13  ;;  %v4188_v12 = vld [vmem:[#allocation17_spill] sm:$0xff] }
  0x71   :  { %527 = vmatpush.msra.mxu2 %v2702_v14  ;;  %568 = vmatpush.msra.mxu3 %v2707_v15  ;;  %v351_v13 = vld [vmem:[%s4034_s0] sm:$0xff]  ;;  %v4196_v15 = vld [vmem:[#allocation70_spill] sm:$0xff] }
  0x72   :  { %446 = vmatpush.msra.mxu0 %v2672_v8  ;;  %487 = vmatpush.msra.mxu1 %v2677_v9  ;;  %v4189_v14 = vld [vmem:[#allocation13_spill] sm:$0xff]  ;;  %v4190_v8 = vld [vmem:[#allocation14_spill] sm:$0xff]  ;;  %v4191_v9 = vld [vmem:[#allocation15_spill] sm:$0xff] }
  0x73   :  { %528 = vmatpush.msra.mxu2 %v2682_v10  ;;  %569 = vmatpush.msra.mxu3 %v2687_v11  ;;  %v4192_v10 = vld [vmem:[#allocation16_spill] sm:$0xff] }
  0x74   :  { %447 = vmatpush.msra.mxu0 %v2652_v4  ;;  %488 = vmatpush.msra.mxu1 %v2657_v5  ;;  %v4193_v4 = vld [vmem:[#allocation74_spill] sm:$0xff]  ;;  %v4194_v5 = vld [vmem:[#allocation75_spill] sm:$0xff]  ;;  %v4195_v11 = vld [vmem:[#allocation76_spill] sm:$0xff] }
  0x75   :  { %529 = vmatpush.msra.mxu2 %v2662_v6  ;;  %570 = vmatpush.msra.mxu3 %v4188_v12  ;;  %v352_v6 = vld [vmem:[%s4034_s0 + $0x8] sm:$0xff] }
  0x76   :  { %448 = vmatpush.msra.mxu0 %v4189_v14  ;;  %489 = vmatpush.msra.mxu1 %v4190_v8  ;;  %v356_v12 = vld [vmem:[%s4034_s0 + $0x28] sm:$0xff]  ;;  %v4243_v14 = vld [vmem:[#allocation29_spill] sm:$0xff] }
  0x77   :  { %530 = vmatpush.msra.mxu2 %v4191_v9  ;;  %571 = vmatpush.msra.mxu3 %v4192_v10  ;;  %v4244_v8 = vld [vmem:[#allocation22_spill] sm:$0xff]  ;;  %v4245_v9 = vld [vmem:[#allocation23_spill] sm:$0xff]  ;;  %v4246_v10 = vld [vmem:[#allocation24_spill] sm:$0xff] }
  0x78   :  { %449 = vmatmul.f32.vlgmr.msra.gmra.mxu0 %v351_v13  ;;  %490 = vmatmul.f32.vlgmr.msra.gmra.mxu1 %v351_v13 }
  0x79   :  { %531 = vmatmul.f32.vlgmr.msra.gmra.mxu2 %v351_v13  ;;  %572 = vmatmul.f32.vlgmr.msra.gmra.mxu3 %v351_v13  ;;  %v4242_v13 = vld [vmem:[#allocation28_spill] sm:$0xff] }
  0x7a   :  { %702 = vmatpush.msrb.mxu0 %v3252_v3  ;;  %722 = vmatpush.msrb.mxu1 %v3257_v2 }
  0x7b   :  { %742 = vmatpush.msrb.mxu2 %v3262_v1  ;;  %762 = vmatpush.msrb.mxu3 %v3267_v0 }
  0x7c   :  { %703 = vmatpush.msrb.mxu0 %v4193_v4  ;;  %723 = vmatpush.msrb.mxu1 %v4194_v5 }
  0x7d   :  { %743 = vmatpush.msrb.mxu2 %v4195_v11  ;;  %763 = vmatpush.msrb.mxu3 %v3247_v7 }
  0x7e   :  { %704 = vmatpush.msrb.mxu0 %v4196_v15  ;;  %724 = vmatpush.msrb.mxu1 %v4197_v16 }
  0x7f   :  { %744 = vmatpush.msrb.mxu2 %v4198_v17  ;;  %764 = vmatpush.msrb.mxu3 %v4199_v18 }
  0x80   :  { %452 = vmatmul.f32.gmra.mxu0 %v352_v6  ;;  %493 = vmatmul.f32.gmra.mxu1 %v352_v6 }
  0x81   :  { %534 = vmatmul.f32.gmra.mxu2 %v352_v6  ;;  %575 = vmatmul.f32.gmra.mxu3 %v352_v6  ;;  %v4247_v6 = vld [vmem:[#allocation25_spill] sm:$0xff] }
  0x82   :  { %705 = vmatpush.msrb.mxu0 %v4200_v19  ;;  %725 = vmatpush.msrb.mxu1 %v4201_v20 }
  0x83   :  { %745 = vmatpush.msrb.mxu2 %v4202_v21  ;;  %765 = vmatpush.msrb.mxu3 %v4203_v22 }
  0x84   :  { %706 = vmatpush.msrb.mxu0 %v4204_v23  ;;  %726 = vmatpush.msrb.mxu1 %v4205_v24 }
  0x85   :  { %746 = vmatpush.msrb.mxu2 %v4206_v26  ;;  %766 = vmatpush.msrb.mxu3 %v4207_v27 }
  0x86   :  { %707 = vmatpush.msrb.mxu0 %v4208_v28  ;;  %727 = vmatpush.msrb.mxu1 %v4209_v29 }
  0x87   :  { %747 = vmatpush.msrb.mxu2 %v4210_v30  ;;  %767 = vmatpush.msrb.mxu3 %v4211_v31 }
  0x88   :  { %455 = vmatmul.f32.gmra.mxu0 %v353_v25  ;;  %496 = vmatmul.f32.gmra.mxu1 %v353_v25 }
  0x89   :  { %537 = vmatmul.f32.gmra.mxu2 %v353_v25  ;;  %578 = vmatmul.f32.gmra.mxu3 %v353_v25  ;;  %v4248_v25 = vld [vmem:[#allocation18_spill] sm:$0xff] }
  0x8a   :  { %708 = vmatpush.msrb.mxu0 %v4212_v32  ;;  %728 = vmatpush.msrb.mxu1 %v4213_v33 }
  0x8b   :  { %748 = vmatpush.msrb.mxu2 %v4214_v34  ;;  %768 = vmatpush.msrb.mxu3 %v4215_v35 }
  0x8c   :  { %709 = vmatpush.msrb.mxu0 %v4216_v36  ;;  %729 = vmatpush.msrb.mxu1 %v4217_v37 }
  0x8d   :  { %749 = vmatpush.msrb.mxu2 %v4218_v39  ;;  %769 = vmatpush.msrb.mxu3 %v4219_v40 }
  0x8e   :  { %710 = vmatpush.msrb.mxu0 %v4220_v41  ;;  %730 = vmatpush.msrb.mxu1 %v4221_v42 }
  0x8f   :  { %750 = vmatpush.msrb.mxu2 %v4222_v43  ;;  %770 = vmatpush.msrb.mxu3 %v4223_v44 }
  0x90   :  { %458 = vmatmul.f32.gmra.mxu0 %v354_v38  ;;  %499 = vmatmul.f32.gmra.mxu1 %v354_v38 }
  0x91   :  { %540 = vmatmul.f32.gmra.mxu2 %v354_v38  ;;  %581 = vmatmul.f32.gmra.mxu3 %v354_v38  ;;  %v4249_v38 = vld [vmem:[#allocation19_spill] sm:$0xff] }
  0x92   :  { %711 = vmatpush.msrb.mxu0 %v4224_v45  ;;  %731 = vmatpush.msrb.mxu1 %v4225_v46 }
  0x93   :  { %751 = vmatpush.msrb.mxu2 %v4226_v47  ;;  %771 = vmatpush.msrb.mxu3 %v4227_v48 }
  0x94   :  { %712 = vmatpush.msrb.mxu0 %v4228_v49  ;;  %732 = vmatpush.msrb.mxu1 %v4229_v50 }
  0x95   :  { %752 = vmatpush.msrb.mxu2 %v4230_v52  ;;  %772 = vmatpush.msrb.mxu3 %v4231_v53 }
  0x96   :  { %713 = vmatpush.msrb.mxu0 %v4232_v54  ;;  %733 = vmatpush.msrb.mxu1 %v4233_v55 }
  0x97   :  { %753 = vmatpush.msrb.mxu2 %v4234_v56  ;;  %773 = vmatpush.msrb.mxu3 %v4235_v57 }
  0x98   :  { %461 = vmatmul.f32.gmra.mxu0 %v355_v51  ;;  %502 = vmatmul.f32.gmra.mxu1 %v355_v51 }
  0x99   :  { %543 = vmatmul.f32.gmra.mxu2 %v355_v51  ;;  %584 = vmatmul.f32.gmra.mxu3 %v355_v51  ;;  %v4250_v51 = vld [vmem:[#allocation20_spill] sm:$0xff] }
  0x9a   :  { %714 = vmatpush.msrb.mxu0 %v4236_v58  ;;  %734 = vmatpush.msrb.mxu1 %v4237_v59 }
  0x9b   :  { %754 = vmatpush.msrb.mxu2 %v4238_v60  ;;  %774 = vmatpush.msrb.mxu3 %v4239_v61 }
  0x9c   :  { %715 = vmatpush.msrb.mxu0 %v4240_v62  ;;  %735 = vmatpush.msrb.mxu1 %v4241_v63 }
  0x9d   :  { %755 = vmatpush.msrb.mxu2 %v4242_v13  ;;  %775 = vmatpush.msrb.mxu3 %v4243_v14  ;;  %v4251_v13 = vld [vmem:[#allocation21_spill] sm:$0xff] }
  0x9e   :  { %716 = vmatpush.msrb.mxu0 %v4244_v8  ;;  %736 = vmatpush.msrb.mxu1 %v4245_v9 }
  0x9f   :  { %756 = vmatpush.msrb.mxu2 %v4246_v10  ;;  %776 = vmatpush.msrb.mxu3 %v4247_v6  ;;  %v357_v6 = vld [vmem:[%s4034_s0 + $0x30] sm:$0xff] }
  0xa0   :  { %464 = vmatmul.f32.gmra.mxu0 %v356_v12  ;;  %505 = vmatmul.f32.gmra.mxu1 %v356_v12 }
  0xa1   :  { %546 = vmatmul.f32.gmra.mxu2 %v356_v12  ;;  %587 = vmatmul.f32.gmra.mxu3 %v356_v12  ;;  %v358_v12 = vld [vmem:[%s4034_s0 + $0x38] sm:$0xff] }
  0xa2   :  { %717 = vmatpush.msrb.mxu0 %v4248_v25  ;;  %737 = vmatpush.msrb.mxu1 %v4249_v38 }
  0xa3   :  { %757 = vmatpush.msrb.mxu2 %v4250_v51  ;;  %777 = vmatpush.msrb.mxu3 %v4251_v13 }
  0xa4   :  { %921 = vmatpush.msra.mxu0 %v3252_v3  ;;  %941 = vmatpush.msra.mxu1 %v3257_v2 }
  0xa5   :  { %961 = vmatpush.msra.mxu2 %v3262_v1  ;;  %981 = vmatpush.msra.mxu3 %v3267_v0 }
  0xa6   :  { %922 = vmatpush.msra.mxu0 %v4193_v4  ;;  %942 = vmatpush.msra.mxu1 %v4194_v5 }
  0xa7   :  { %962 = vmatpush.msra.mxu2 %v4195_v11  ;;  %982 = vmatpush.msra.mxu3 %v3247_v7 }
  0xa8   :  { %467 = vmatmul.f32.gmra.mxu0 %v357_v6  ;;  %508 = vmatmul.f32.gmra.mxu1 %v357_v6 }
  0xa9   :  { %549 = vmatmul.f32.gmra.mxu2 %v357_v6  ;;  %590 = vmatmul.f32.gmra.mxu3 %v357_v6  ;;  %v2603_v6 = vmov 0.0  }
  0xaa   :  { %923 = vmatpush.msra.mxu0 %v4196_v15  ;;  %943 = vmatpush.msra.mxu1 %v4197_v16 }
  0xab   :  { %963 = vmatpush.msra.mxu2 %v4198_v17  ;;  %983 = vmatpush.msra.mxu3 %v4199_v18 }
  0xac   :  { %924 = vmatpush.msra.mxu0 %v4200_v19  ;;  %944 = vmatpush.msra.mxu1 %v4201_v20 }
  0xad   :  { %964 = vmatpush.msra.mxu2 %v4202_v21  ;;  %984 = vmatpush.msra.mxu3 %v4203_v22 }
  0xae   :  { %925 = vmatpush.msra.mxu0 %v4204_v23  ;;  %945 = vmatpush.msra.mxu1 %v4205_v24 }
  0xaf   :  { %965 = vmatpush.msra.mxu2 %v4206_v26  ;;  %985 = vmatpush.msra.mxu3 %v4207_v27 }
  0xb0   :  { %470 = vmatmul.f32.gmra.mxu0 %v358_v12  ;;  %511 = vmatmul.f32.gmra.mxu1 %v358_v12 }
  0xb1   :  { %552 = vmatmul.f32.gmra.mxu2 %v358_v12  ;;  %593 = vmatmul.f32.gmra.mxu3 %v358_v12  ;;  %v4252_v12 = vld [vmem:[#allocation28_spill] sm:$0xff] }
  0xb2   :  { %926 = vmatpush.msra.mxu0 %v4208_v28  ;;  %946 = vmatpush.msra.mxu1 %v4209_v29 }
  0xb3   :  { %966 = vmatpush.msra.mxu2 %v4210_v30  ;;  %986 = vmatpush.msra.mxu3 %v4211_v31 }
  0xb4   :  { %927 = vmatpush.msra.mxu0 %v4212_v32  ;;  %947 = vmatpush.msra.mxu1 %v4213_v33 }
  0xb5   :  { %967 = vmatpush.msra.mxu2 %v4214_v34  ;;  %987 = vmatpush.msra.mxu3 %v4215_v35 }
  0xb6   :  { %928 = vmatpush.msra.mxu0 %v4216_v36  ;;  %948 = vmatpush.msra.mxu1 %v4217_v37 }
  0xb7   :  { %968 = vmatpush.msra.mxu2 %v4218_v39  ;;  %988 = vmatpush.msra.mxu3 %v4219_v40 }
  0xb8   :  { %718 = vmatmul.f32.vlgmr.msrb.gmra.mxu0 %v2603_v6  ;;  %738 = vmatmul.f32.vlgmr.msrb.gmra.mxu1 %v2603_v6 }
  0xb9   :  { %758 = vmatmul.f32.vlgmr.msrb.gmra.mxu2 %v2603_v6  ;;  %778 = vmatmul.f32.vlgmr.msrb.gmra.mxu3 %v2603_v6  ;;  %v4253_v6 = vld [vmem:[#allocation25_spill] sm:$0xff] }
  0xba   :  { %929 = vmatpush.msra.mxu0 %v4220_v41  ;;  %949 = vmatpush.msra.mxu1 %v4221_v42 }
  0xbb   :  { %969 = vmatpush.msra.mxu2 %v4222_v43  ;;  %989 = vmatpush.msra.mxu3 %v4223_v44 }
  0xbc   :  { %930 = vmatpush.msra.mxu0 %v4224_v45  ;;  %950 = vmatpush.msra.mxu1 %v4225_v46 }
  0xbd   :  { %970 = vmatpush.msra.mxu2 %v4226_v47  ;;  %990 = vmatpush.msra.mxu3 %v4227_v48 }
  0xbe   :  { %931 = vmatpush.msra.mxu0 %v4228_v49  ;;  %951 = vmatpush.msra.mxu1 %v4229_v50 }
  0xbf   :  { %971 = vmatpush.msra.mxu2 %v4230_v52  ;;  %991 = vmatpush.msra.mxu3 %v4231_v53 }
  0xc0   :  { %932 = vmatpush.msra.mxu0 %v4232_v54  ;;  %952 = vmatpush.msra.mxu1 %v4233_v55 }
  0xc1   :  { %972 = vmatpush.msra.mxu2 %v4234_v56  ;;  %992 = vmatpush.msra.mxu3 %v4235_v57 }
  0xc2   :  { %933 = vmatpush.msra.mxu0 %v4236_v58  ;;  %953 = vmatpush.msra.mxu1 %v4237_v59 }
  0xc3   :  { %973 = vmatpush.msra.mxu2 %v4238_v60  ;;  %993 = vmatpush.msra.mxu3 %v4239_v61 }
  0xc4   :  { %934 = vmatpush.msra.mxu0 %v4240_v62  ;;  %954 = vmatpush.msra.mxu1 %v4241_v63 }
  0xc5   :  { %974 = vmatpush.msra.mxu2 %v4252_v12  ;;  %994 = vmatpush.msra.mxu3 %v4243_v14 }
  0xc6   :  { %935 = vmatpush.msra.mxu0 %v4244_v8  ;;  %955 = vmatpush.msra.mxu1 %v4245_v9 }
  0xc7   :  { %975 = vmatpush.msra.mxu2 %v4246_v10  ;;  %995 = vmatpush.msra.mxu3 %v4253_v6 }
  0xc8   :  { %936 = vmatpush.msra.mxu0 %v4248_v25  ;;  %956 = vmatpush.msra.mxu1 %v4249_v38 }
  0xc9   :  { %976 = vmatpush.msra.mxu2 %v4250_v51  ;;  %996 = vmatpush.msra.mxu3 %v4251_v13 }
  0xca   :  { %1141 = vmatpush.msrb.mxu0 %v3252_v3  ;;  %1161 = vmatpush.msrb.mxu1 %v3257_v2 }
  0xcb   :  { %1181 = vmatpush.msrb.mxu2 %v3262_v1  ;;  %1201 = vmatpush.msrb.mxu3 %v3267_v0 }
  0xcc   :  { %1142 = vmatpush.msrb.mxu0 %v4193_v4  ;;  %1162 = vmatpush.msrb.mxu1 %v4194_v5 }
  0xcd   :  { %1182 = vmatpush.msrb.mxu2 %v4195_v11  ;;  %1202 = vmatpush.msrb.mxu3 %v3247_v7 }
  0xce   :  { %1143 = vmatpush.msrb.mxu0 %v4196_v15  ;;  %1163 = vmatpush.msrb.mxu1 %v4197_v16 }
  0xcf   :  { %1183 = vmatpush.msrb.mxu2 %v4198_v17  ;;  %1203 = vmatpush.msrb.mxu3 %v4199_v18 }
  0xd0   :  { %1144 = vmatpush.msrb.mxu0 %v4200_v19  ;;  %1164 = vmatpush.msrb.mxu1 %v4201_v20 }
  0xd1   :  { %1184 = vmatpush.msrb.mxu2 %v4202_v21  ;;  %1204 = vmatpush.msrb.mxu3 %v4203_v22 }
  0xd2   :  { %1145 = vmatpush.msrb.mxu0 %v4204_v23  ;;  %1165 = vmatpush.msrb.mxu1 %v4205_v24 }
  0xd3   :  { %1185 = vmatpush.msrb.mxu2 %v4206_v26  ;;  %1205 = vmatpush.msrb.mxu3 %v4207_v27 }
  0xd4   :  { %1146 = vmatpush.msrb.mxu0 %v4208_v28  ;;  %1166 = vmatpush.msrb.mxu1 %v4209_v29 }
  0xd5   :  { %1186 = vmatpush.msrb.mxu2 %v4210_v30  ;;  %1206 = vmatpush.msrb.mxu3 %v4211_v31 }
  0xd6   :  { %1147 = vmatpush.msrb.mxu0 %v4212_v32  ;;  %1167 = vmatpush.msrb.mxu1 %v4213_v33 }
  0xd7   :  { %1187 = vmatpush.msrb.mxu2 %v4214_v34  ;;  %1207 = vmatpush.msrb.mxu3 %v4215_v35 }
  0xd8   :  { %1148 = vmatpush.msrb.mxu0 %v4216_v36  ;;  %1168 = vmatpush.msrb.mxu1 %v4217_v37 }
  0xd9   :  { %1188 = vmatpush.msrb.mxu2 %v4218_v39  ;;  %1208 = vmatpush.msrb.mxu3 %v4219_v40 }
  0xda   :  { %1149 = vmatpush.msrb.mxu0 %v4220_v41  ;;  %1169 = vmatpush.msrb.mxu1 %v4221_v42 }
  0xdb   :  { %1189 = vmatpush.msrb.mxu2 %v4222_v43  ;;  %1209 = vmatpush.msrb.mxu3 %v4223_v44 }
  0xdc   :  { %1150 = vmatpush.msrb.mxu0 %v4224_v45  ;;  %1170 = vmatpush.msrb.mxu1 %v4225_v46 }
  0xdd   :  { %1190 = vmatpush.msrb.mxu2 %v4226_v47  ;;  %1210 = vmatpush.msrb.mxu3 %v4227_v48 }
  0xde   :  { %1151 = vmatpush.msrb.mxu0 %v4228_v49  ;;  %1171 = vmatpush.msrb.mxu1 %v4229_v50 }
  0xdf   :  { %1191 = vmatpush.msrb.mxu2 %v4230_v52  ;;  %1211 = vmatpush.msrb.mxu3 %v4231_v53 }
  0xe0   :  { %1152 = vmatpush.msrb.mxu0 %v4232_v54  ;;  %1172 = vmatpush.msrb.mxu1 %v4233_v55 }
  0xe1   :  { %1192 = vmatpush.msrb.mxu2 %v4234_v56  ;;  %1212 = vmatpush.msrb.mxu3 %v4235_v57 }
  0xe2   :  { %1153 = vmatpush.msrb.mxu0 %v4236_v58  ;;  %1173 = vmatpush.msrb.mxu1 %v4237_v59 }
  0xe3   :  { %1193 = vmatpush.msrb.mxu2 %v4238_v60  ;;  %1213 = vmatpush.msrb.mxu3 %v4239_v61 }
  0xe4   :  { %1154 = vmatpush.msrb.mxu0 %v4240_v62  ;;  %1174 = vmatpush.msrb.mxu1 %v4241_v63 }
  0xe5   :  { %1194 = vmatpush.msrb.mxu2 %v4252_v12  ;;  %1214 = vmatpush.msrb.mxu3 %v4243_v14 }
  0xe6   :  { %1155 = vmatpush.msrb.mxu0 %v4244_v8  ;;  %1175 = vmatpush.msrb.mxu1 %v4245_v9  ;;  %v423_v8 = vld [vmem:[%s4037_s3] sm:$0xf] }
  0xe7   :  { %1195 = vmatpush.msrb.mxu2 %v4246_v10  ;;  %1215 = vmatpush.msrb.mxu3 %v4253_v6  ;;  %v425_v14 = vperm.slane %v423_v8, 0  ;;  %v426_v9 = vperm.slane %v423_v8, 1 }
  0xe8   :  { %1156 = vmatpush.msrb.mxu0 %v4248_v25  ;;  %1176 = vmatpush.msrb.mxu1 %v4249_v38 }
  0xe9   :  { %1196 = vmatpush.msrb.mxu2 %v4250_v51  ;;  %1216 = vmatpush.msrb.mxu3 %v4251_v13  ;;  %v3560_v51 = vperm.slane %v423_v8, 2  ;;  %v3562_v13 = vperm.slane %v423_v8, 3 }
  0xf5   :  { %v450_v63 = vpop.f32.mrf.mxu0  ;;  %v491_v12 = vpop.f32.mrf.mxu1 }
  0xfc   :  { %v3552_v62 = vpop.f32.mrf.mxu2  ;;  %v3554_v10 = vpop.f32.mrf.mxu3 }
  0xfd   :  { %v453_v6 = vpop.f32.mrf.mxu0  ;;  %v494_v25 = vpop.f32.mrf.mxu1 }
  0xfe   :  { %v3556_v61 = vadd.f32 %v453_v6, %v425_v14  ;;  %v3558_v38 = vadd.f32 %v494_v25, %v426_v9 }
 0x100   :  { %4254 = vst [vmem:[#allocation17_spill] sm:$0xff] %v3556_v61 }
 0x101   :  { %4255 = vst [vmem:[#allocation13_spill] sm:$0xff] %v3558_v38 }
 0x104   :  { %v535_v60 = vpop.f32.mrf.mxu2  ;;  %v576_v59 = vpop.f32.mrf.mxu3 }
 0x105   :  { %v3565_v58 = vadd.f32 %v535_v60, %v3560_v51  ;;  %v3568_v57 = vadd.f32 %v576_v59, %v3562_v13  ;;  %v456_v56 = vpop.f32.mrf.mxu0  ;;  %v497_v55 = vpop.f32.mrf.mxu1 }
 0x106   :  { %v3570_v54 = vadd.f32 %v456_v56, %v425_v14  ;;  %v3572_v6 = vadd.f32 %v497_v55, %v426_v9 }
 0x107   :  { %4256 = vst [vmem:[#allocation14_spill] sm:$0xff] %v3565_v58 }
 0x108   :  { %4257 = vst [vmem:[#allocation15_spill] sm:$0xff] %v3568_v57 }
 0x109   :  { %4258 = vst [vmem:[#allocation16_spill] sm:$0xff] %v3570_v54 }
 0x10a   :  { %4259 = vst [vmem:[#allocation74_spill] sm:$0xff] %v3572_v6 }
 0x10c   :  { %v538_v25 = vpop.f32.mrf.mxu2  ;;  %v579_v38 = vpop.f32.mrf.mxu3 }
 0x10d   :  { %v3575_v61 = vadd.f32 %v538_v25, %v3560_v51  ;;  %v3578_v8 = vadd.f32 %v579_v38, %v3562_v13  ;;  %v459_v53 = vpop.f32.mrf.mxu0  ;;  %v500_v60 = vpop.f32.mrf.mxu1 }
 0x10e   :  { %v3580_v58 = vadd.f32 %v459_v53, %v425_v14  ;;  %v3582_v59 = vadd.f32 %v500_v60, %v426_v9 }
 0x10f   :  { %4260 = vst [vmem:[#allocation75_spill] sm:$0xff] %v3575_v61 }
 0x110   :  { %4261 = vst [vmem:[#allocation76_spill] sm:$0xff] %v3578_v8 }
 0x111   :  { %4262 = vst [vmem:[#allocation70_spill] sm:$0xff] %v3580_v58 }
 0x112   :  { %4263 = vst [vmem:[#allocation71_spill] sm:$0xff] %v3582_v59 }
 0x114   :  { %v541_v57 = vpop.f32.mrf.mxu2  ;;  %v582_v52 = vpop.f32.mrf.mxu3 }
 0x115   :  { %v3585_v56 = vadd.f32 %v541_v57, %v3560_v51  ;;  %v3588_v55 = vadd.f32 %v582_v52, %v3562_v13  ;;  %v462_v6 = vpop.f32.mrf.mxu0  ;;  %v503_v25 = vpop.f32.mrf.mxu1 }
 0x116   :  { %v3590_v61 = vadd.f32 %v462_v6, %v425_v14  ;;  %v3592_v38 = vadd.f32 %v503_v25, %v426_v9 }
 0x117   :  { %4264 = vst [vmem:[#allocation72_spill] sm:$0xff] %v3585_v56 }
 0x118   :  { %4265 = vst [vmem:[#allocation73_spill] sm:$0xff] %v3588_v55 }
 0x119   :  { %4266 = vst [vmem:[#allocation66_spill] sm:$0xff] %v3590_v61 }
 0x11a   :  { %4267 = vst [vmem:[#allocation67_spill] sm:$0xff] %v3592_v38 }
 0x11c   :  { %v544_v8 = vpop.f32.mrf.mxu2  ;;  %v585_v54 = vpop.f32.mrf.mxu3 }
 0x11d   :  { %v3595_v53 = vadd.f32 %v544_v8, %v3560_v51  ;;  %v3598_v60 = vadd.f32 %v585_v54, %v3562_v13  ;;  %v465_v59 = vpop.f32.mrf.mxu0  ;;  %v506_v57 = vpop.f32.mrf.mxu1 }
 0x11e   :  { %v3600_v56 = vadd.f32 %v465_v59, %v425_v14  ;;  %v3602_v52 = vadd.f32 %v506_v57, %v426_v9 }
 0x11f   :  { %4268 = vst [vmem:[#allocation68_spill] sm:$0xff] %v3595_v53 }
 0x120   :  { %4269 = vst [vmem:[#allocation69_spill] sm:$0xff] %v3598_v60 }
 0x121   :  { %4270 = vst [vmem:[#allocation62_spill] sm:$0xff] %v3600_v56  ;;  %v492_v56 = vadd.f32 %v491_v12, %v426_v9 }
 0x122   :  { %4271 = vst [vmem:[#allocation63_spill] sm:$0xff] %v3602_v52 }
 0x124   :  { %v547_v55 = vpop.f32.mrf.mxu2  ;;  %v588_v58 = vpop.f32.mrf.mxu3 }
 0x125   :  { %v3605_v6 = vadd.f32 %v547_v55, %v3560_v51  ;;  %v3608_v25 = vadd.f32 %v588_v58, %v3562_v13  ;;  %v468_v38 = vpop.f32.mrf.mxu0  ;;  %v509_v8 = vpop.f32.mrf.mxu1 }
 0x126   :  { %v3610_v53 = vadd.f32 %v468_v38, %v425_v14  ;;  %v3612_v54 = vadd.f32 %v509_v8, %v426_v9 }
 0x127   :  { %4272 = vst [vmem:[#allocation64_spill] sm:$0xff] %v3605_v6 }
 0x128   :  { %4273 = vst [vmem:[#allocation65_spill] sm:$0xff] %v3608_v25  ;;  %v451_v25 = vadd.f32 %v450_v63, %v425_v14 }
 0x129   :  { %4274 = vst [vmem:[#allocation58_spill] sm:$0xff] %v3610_v53 }
 0x12a   :  { %4275 = vst [vmem:[#allocation59_spill] sm:$0xff] %v3612_v54 }
 0x12c   :  { %v550_v60 = vpop.f32.mrf.mxu2  ;;  %v591_v61 = vpop.f32.mrf.mxu3 }
 0x12d   :  { %v3615_v59 = vadd.f32 %v550_v60, %v3560_v51  ;;  %v3618_v57 = vadd.f32 %v591_v61, %v3562_v13  ;;  %v471_v52 = vpop.f32.mrf.mxu0  ;;  %v512_v55 = vpop.f32.mrf.mxu1 }
 0x12e   :  { %v3620_v6 = vadd.f32 %v471_v52, %v425_v14  ;;  %v3622_v58 = vadd.f32 %v512_v55, %v426_v9  ;;  %v533_v52 = vadd.f32 %v3552_v62, %v3560_v51 }
 0x12f   :  { %4276 = vst [vmem:[#allocation60_spill] sm:$0xff] %v3615_v59 }
 0x130   :  { %4277 = vst [vmem:[#allocation61_spill] sm:$0xff] %v3618_v57 }
 0x131   :  { %4278 = vst [vmem:[#allocation54_spill] sm:$0xff] %v3620_v6 }
 0x132   :  { %4279 = vst [vmem:[#allocation55_spill] sm:$0xff] %v3622_v58 }
 0x134   :  { %v553_v38 = vpop.f32.mrf.mxu2  ;;  %v594_v53 = vpop.f32.mrf.mxu3 }
 0x135   :  { %v3625_v8 = vadd.f32 %v553_v38, %v3560_v51  ;;  %v3628_v54 = vadd.f32 %v594_v53, %v3562_v13  ;;  %v719_v60 = vpop.f32.mrf.mxu0  ;;  %v739_v59 = vpop.f32.mrf.mxu1 }
 0x136   :  { %v782_v61 = vadd.f32 %v719_v60, %v451_v25  ;;  %v783_v57 = vadd.f32 %v739_v59, %v492_v56  ;;  %v574_v56 = vadd.f32 %v3554_v10, %v3562_v13 }
 0x137   :  { %4280 = vst [vmem:[#allocation56_spill] sm:$0xff] %v3625_v8 }
 0x138   :  { %4281 = vst [vmem:[#allocation57_spill] sm:$0xff] %v3628_v54  ;;  %v2439_v50 = vmul.f32 -1.442695, %v782_v61  ;;  %v2440_v49 = vmul.f32 -1.442695, %v783_v57 }
 0x13a   :  { %2471 = vpow2.f32 %v2439_v50 }
 0x13b   :  { %2473 = vpow2.f32 %v2440_v49 }
 0x13c   :  { %v759_v63 = vpop.f32.mrf.mxu2  ;;  %v779_v54 = vpop.f32.mrf.mxu3 }
 0x13d   :  { %v784_v14 = vadd.f32 %v759_v63, %v533_v52  ;;  %v785_v57 = vadd.f32 %v779_v54, %v574_v56 }
 0x13f   :  { %v2441_v9 = vmul.f32 -1.442695, %v784_v14 }
 0x140   :  { %v2472_v12 = vpop.eup %2471 }
 0x141   :  { %v2474_v55 = vpop.eup %2473  ;;  %v795_v38 = vadd.f32 1.0, %v2472_v12  ;;  %2475 = vpow2.f32 %v2441_v9 }
 0x142   :  { %v796_v53 = vadd.f32 1.0, %v2474_v55 }
 0x143   :  { %2477 = vrcp.f32 %v795_v38  ;;  %v809_v52 = vand.u32 2147483648, %v795_v38  ;;  %v807_v9 = vand.u32 2147483647, %v795_v38  ;;  %vm803_vm2 = vweird.f32 %v795_v38 }
 0x144   :  { %2479 = vrcp.f32 %v796_v53  ;;  %v824_v63 = vand.u32 2147483648, %v796_v53  ;;  %v822_v55 = vand.u32 2147483647, %v796_v53  ;;  %vm818_vm3 = vweird.f32 %v796_v53 }
 0x145   :  { %v810_v54 = vor.u32 1.1754944e-38, %v809_v52  ;;  %vm808_vm5 = vcmp.eq.f32.partialorder %v807_v9, 8.507059e+37 }
 0x146   :  { %v825_v56 = vor.u32 1.1754944e-38, %v824_v63  ;;  %vm823_vm7 = vcmp.eq.f32.partialorder %v822_v55, 8.507059e+37  ;;  %v4288_v55 = vld [vmem:[#allocation34_spill] sm:$0xff] }
 0x147   :  { %v2476_v25 = vpop.eup %2475 }
 0x148   :  { %v797_v50 = vadd.f32 1.0, %v2476_v25 }
 0x149   :  { %v2478_v59 = vpop.eup %2477 }
 0x14a   :  { %v2480_v62 = vpop.eup %2479  ;;  %v799_v49 = vmul.f32 %v2478_v59, %v795_v38  ;;  %2481 = vrcp.f32 %v797_v50  ;;  %vm804_vm0 = vweird.f32 %v2478_v59  ;;  %vm833_vm9 = vweird.f32 %v797_v50 }
 0x14b   :  { %v814_v51 = vmul.f32 %v2480_v62, %v796_v53  ;;  %2483 = vtanh.f32 %v785_v57  ;;  %vm819_vm1 = vweird.f32 %v2480_v62  ;;  %vm805_vm4 = vmor %vm803_vm2, %vm804_vm0  ;;  %v839_v53 = vand.u32 2147483648, %v797_v50 }
 0x14c   :  { %v800_v60 = vsub.f32 1.0, %v799_v49  ;;  %vm820_vm6 = vmor %vm818_vm3, %vm819_vm1 }
 0x14d   :  { %v815_v61 = vsub.f32 1.0, %v814_v51  ;;  %v840_v63 = vor.u32 1.1754944e-38, %v839_v53  ;;  %v4300_v53 = vld [vmem:[#allocation22_spill] sm:$0xff] }
 0x14e   :  { %v801_v14 = vmul.f32 %v2478_v59, %v800_v60 }
 0x14f   :  { %v816_v12 = vmul.f32 %v2480_v62, %v815_v61 }
 0x150   :  { %v2482_v8 = vpop.eup %2481  ;;  %v802_v13 = vadd.f32 %v2478_v59, %v801_v14 }
 0x151   :  { %v829_v10 = vmul.f32 %v2482_v8, %v797_v50  ;;  %v817_v25 = vadd.f32 %v2480_v62, %v816_v12  ;;  %v2484_v57 = vpop.eup %2483  ;;  %vm834_vm8 = vweird.f32 %v2482_v8 }
 0x152   :  { %v806_v49 = vsel %vm805_vm4, %v2478_v59, %v802_v13  ;;  %v837_v59 = vand.u32 2147483647, %v797_v50  ;;  %vm835_vm10 = vmor %vm833_vm9, %vm834_vm8  ;;  %v4287_v50 = vld [vmem:[#allocation41_spill] sm:$0xff]  ;;  %v4289_v13 = vld [vmem:[#allocation35_spill] sm:$0xff] }
 0x153   :  { %v830_v51 = vsub.f32 1.0, %v829_v10  ;;  %v811_v60 = vsel %vm808_vm5, %v810_v54, %v806_v49  ;;  %v821_v58 = vsel %vm820_vm6, %v2480_v62, %v817_v25  ;;  %v4290_v10 = vld [vmem:[#allocation36_spill] sm:$0xff]  ;;  %v4291_v54 = vld [vmem:[#allocation37_spill] sm:$0xff]  ;;  %v4292_v25 = vld [vmem:[#allocation30_spill] sm:$0xff] }
 0x154   :  { %v826_v61 = vsel %vm823_vm7, %v825_v56, %v821_v58  ;;  %v845_v6 = vmul.f32 %v2484_v57, %v811_v60  ;;  %vm838_vm11 = vcmp.eq.f32.partialorder %v837_v59, 8.507059e+37  ;;  %v4285_v58 = vld [vmem:[#allocation39_spill] sm:$0xff]  ;;  %v4294_v49 = vld [vmem:[#allocation32_spill] sm:$0xff]  ;;  %v4295_v57 = vld [vmem:[#allocation33_spill] sm:$0xff] }
 0x155   :  { %v831_v48 = vmul.f32 %v2482_v8, %v830_v51  ;;  %v844_v47 = vmul.f32 0.0, %v826_v61  ;;  %v4293_v56 = vld [vmem:[#allocation31_spill] sm:$0xff]  ;;  %v4296_v51 = vld [vmem:[#allocation26_spill] sm:$0xff]  ;;  %v4298_v61 = vld [vmem:[#allocation28_spill] sm:$0xff] }
 0x156   :  { %v4297_v60 = vld [vmem:[#allocation27_spill] sm:$0xff] }
 0x157   :  { %v3634_v14 = vadd.f32 %v845_v6, %v844_v47  ;;  %v832_v38 = vadd.f32 %v2482_v8, %v831_v48  ;;  %v4282_v47 = vld [vmem:[#allocation44_spill] sm:$0xff]  ;;  %v4283_v48 = vld [vmem:[#allocation45_spill] sm:$0xff]  ;;  %v4284_v6 = vld [vmem:[#allocation38_spill] sm:$0xff] }
 0x158   :  { %v4301_v59 = vld [vmem:[#allocation23_spill] sm:$0xff] }
 0x159   :  { %2485 = vtanh.f32 %v3634_v14  ;;  %v836_v52 = vsel %vm835_vm10, %v2482_v8, %v832_v38  ;;  %v4286_v8 = vld [vmem:[#allocation40_spill] sm:$0xff]  ;;  %v4299_v38 = vld [vmem:[#allocation29_spill] sm:$0xff] }
 0x15a   :  { %v841_v62 = vsel %vm838_vm11, %v840_v63, %v836_v52  ;;  %v4302_v52 = vld [vmem:[#allocation24_spill] sm:$0xff]  ;;  %v4303_v63 = vld [vmem:[#allocation25_spill] sm:$0xff] }
 0x15f   :  { %v2486_v9 = vpop.eup %2485 }
 0x160   :  { %v848_v12 = vmul.f32 %v2486_v9, %v841_v62  ;;  %v4304_v9 = vld [vmem:[#allocation18_spill] sm:$0xff]  ;;  %v4305_v62 = vld [vmem:[#allocation19_spill] sm:$0xff] }
 0x162   :  { %849 = vst [vmem:[%s4038_s4] sm:$0xff] %v848_v12  ;;  %937 = vmatmul.f32.vlgmr.msra.gmra.mxu0 %v848_v12  ;;  %957 = vmatmul.f32.vlgmr.msra.gmra.mxu1 %v848_v12 }
 0x163   :  { %977 = vmatmul.f32.vlgmr.msra.gmra.mxu2 %v848_v12  ;;  %997 = vmatmul.f32.vlgmr.msra.gmra.mxu3 %v848_v12  ;;  %v4306_v12 = vld [vmem:[#allocation20_spill] sm:$0xff] }
 0x164   :  { %1361 = vmatpush.msra.mxu0 %v3252_v3  ;;  %1381 = vmatpush.msra.mxu1 %v3257_v2 }
 0x165   :  { %1401 = vmatpush.msra.mxu2 %v3262_v1  ;;  %1421 = vmatpush.msra.mxu3 %v3267_v0 }
 0x166   :  { %1362 = vmatpush.msra.mxu0 %v4193_v4  ;;  %1382 = vmatpush.msra.mxu1 %v4194_v5 }
 0x167   :  { %1402 = vmatpush.msra.mxu2 %v4195_v11  ;;  %1422 = vmatpush.msra.mxu3 %v3247_v7 }
 0x168   :  { %1363 = vmatpush.msra.mxu0 %v4196_v15  ;;  %1383 = vmatpush.msra.mxu1 %v4197_v16 }
 0x169   :  { %1403 = vmatpush.msra.mxu2 %v4198_v17  ;;  %1423 = vmatpush.msra.mxu3 %v4199_v18 }
 0x16a   :  { %1364 = vmatpush.msra.mxu0 %v4200_v19  ;;  %1384 = vmatpush.msra.mxu1 %v4201_v20 }
 0x16b   :  { %1404 = vmatpush.msra.mxu2 %v4202_v21  ;;  %1424 = vmatpush.msra.mxu3 %v4203_v22 }
 0x16c   :  { %1365 = vmatpush.msra.mxu0 %v4204_v23  ;;  %1385 = vmatpush.msra.mxu1 %v4205_v24 }
 0x16d   :  { %1405 = vmatpush.msra.mxu2 %v4206_v26  ;;  %1425 = vmatpush.msra.mxu3 %v4207_v27 }
 0x16e   :  { %1366 = vmatpush.msra.mxu0 %v4208_v28  ;;  %1386 = vmatpush.msra.mxu1 %v4209_v29 }
 0x16f   :  { %1406 = vmatpush.msra.mxu2 %v4210_v30  ;;  %1426 = vmatpush.msra.mxu3 %v4211_v31 }
 0x170   :  { %1367 = vmatpush.msra.mxu0 %v4212_v32  ;;  %1387 = vmatpush.msra.mxu1 %v4213_v33 }
 0x171   :  { %1407 = vmatpush.msra.mxu2 %v4214_v34  ;;  %1427 = vmatpush.msra.mxu3 %v4215_v35 }
 0x172   :  { %1368 = vmatpush.msra.mxu0 %v4216_v36  ;;  %1388 = vmatpush.msra.mxu1 %v4217_v37 }
 0x173   :  { %1408 = vmatpush.msra.mxu2 %v4218_v39  ;;  %1428 = vmatpush.msra.mxu3 %v4219_v40 }
 0x174   :  { %1369 = vmatpush.msra.mxu0 %v4220_v41  ;;  %1389 = vmatpush.msra.mxu1 %v4221_v42 }
 0x175   :  { %1409 = vmatpush.msra.mxu2 %v4222_v43  ;;  %1429 = vmatpush.msra.mxu3 %v4223_v44 }
 0x176   :  { %1370 = vmatpush.msra.mxu0 %v4224_v45  ;;  %1390 = vmatpush.msra.mxu1 %v4225_v46 }
 0x177   :  { %1410 = vmatpush.msra.mxu2 %v4282_v47  ;;  %1430 = vmatpush.msra.mxu3 %v4283_v48 }
 0x178   :  { %1371 = vmatpush.msra.mxu0 %v4284_v6  ;;  %1391 = vmatpush.msra.mxu1 %v4285_v58 }
 0x179   :  { %1411 = vmatpush.msra.mxu2 %v4286_v8  ;;  %1431 = vmatpush.msra.mxu3 %v4287_v50 }
 0x17a   :  { %1372 = vmatpush.msra.mxu0 %v4288_v55  ;;  %1392 = vmatpush.msra.mxu1 %v4289_v13 }
 0x17b   :  { %1412 = vmatpush.msra.mxu2 %v4290_v10  ;;  %1432 = vmatpush.msra.mxu3 %v4291_v54 }
 0x17c   :  { %1373 = vmatpush.msra.mxu0 %v4292_v25  ;;  %1393 = vmatpush.msra.mxu1 %v4293_v56 }
 0x17d   :  { %1413 = vmatpush.msra.mxu2 %v4294_v49  ;;  %1433 = vmatpush.msra.mxu3 %v4295_v57  ;;  %v4308_v57 = vld [vmem:[#allocation17_spill] sm:$0xff] }
 0x17e   :  { %1374 = vmatpush.msra.mxu0 %v4296_v51  ;;  %1394 = vmatpush.msra.mxu1 %v4297_v60  ;;  %v4307_v51 = vld [vmem:[#allocation21_spill] sm:$0xff] }
 0x17f   :  { %1414 = vmatpush.msra.mxu2 %v4298_v61  ;;  %1434 = vmatpush.msra.mxu3 %v4299_v38  ;;  %v4309_v49 = vld [vmem:[#allocation13_spill] sm:$0xff] }
 0x180   :  { %1375 = vmatpush.msra.mxu0 %v4300_v53  ;;  %1395 = vmatpush.msra.mxu1 %v4301_v59 }
 0x181   :  { %1415 = vmatpush.msra.mxu2 %v4302_v52  ;;  %1435 = vmatpush.msra.mxu3 %v4303_v63  ;;  %v4310_v63 = vld [vmem:[#allocation14_spill] sm:$0xff] }
 0x182   :  { %1376 = vmatpush.msra.mxu0 %v4304_v9  ;;  %1396 = vmatpush.msra.mxu1 %v4305_v62 }
 0x183   :  { %1416 = vmatpush.msra.mxu2 %v4306_v12  ;;  %1436 = vmatpush.msra.mxu3 %v4307_v51 }
 0x1df   :  { %v938_v60 = vpop.f32.mrf.mxu0  ;;  %v958_v61 = vpop.f32.mrf.mxu1 }
 0x1e0   :  { %v1001_v38 = vadd.f32 %v938_v60, %v4308_v57  ;;  %v1002_v53 = vadd.f32 %v958_v61, %v4309_v49  ;;  %v4311_v49 = vld [vmem:[#allocation15_spill] sm:$0xff] }
 0x1e2   :  { %v2442_v56 = vmul.f32 -1.442695, %v1001_v38  ;;  %v2443_v59 = vmul.f32 -1.442695, %v1002_v53 }
 0x1e4   :  { %2487 = vpow2.f32 %v2442_v56 }
 0x1e5   :  { %2489 = vpow2.f32 %v2443_v59 }
 0x1e6   :  { %v978_v52 = vpop.f32.mrf.mxu2  ;;  %v998_v51 = vpop.f32.mrf.mxu3 }
 0x1e7   :  { %v1003_v25 = vadd.f32 %v978_v52, %v4310_v63  ;;  %v1004_v61 = vadd.f32 %v998_v51, %v4311_v49 }
 0x1e9   :  { %v2444_v9 = vmul.f32 -1.442695, %v1003_v25 }
 0x1ea   :  { %v2488_v54 = vpop.eup %2487 }
 0x1eb   :  { %v2490_v62 = vpop.eup %2489  ;;  %v1014_v10 = vadd.f32 1.0, %v2488_v54  ;;  %2491 = vpow2.f32 %v2444_v9 }
 0x1ec   :  { %v1015_v12 = vadd.f32 1.0, %v2490_v62 }
 0x1ed   :  { %2493 = vrcp.f32 %v1014_v10  ;;  %v1028_v25 = vand.u32 2147483648, %v1014_v10  ;;  %v1026_v9 = vand.u32 2147483647, %v1014_v10  ;;  %vm1022_vm14 = vweird.f32 %v1014_v10 }
 0x1ee   :  { %2495 = vrcp.f32 %v1015_v12  ;;  %v1043_v63 = vand.u32 2147483648, %v1015_v12  ;;  %v1041_v55 = vand.u32 2147483647, %v1015_v12  ;;  %vm1037_vm15 = vweird.f32 %v1015_v12 }
 0x1ef   :  { %v1029_v49 = vor.u32 1.1754944e-38, %v1028_v25  ;;  %vm1027_vm2 = vcmp.eq.f32.partialorder %v1026_v9, 8.507059e+37 }
 0x1f0   :  { %vm1042_vm3 = vcmp.eq.f32.partialorder %v1041_v55, 8.507059e+37 }
 0x1f1   :  { %v2492_v13 = vpop.eup %2491 }
 0x1f2   :  { %v1016_v57 = vadd.f32 1.0, %v2492_v13 }
 0x1f3   :  { %v2494_v60 = vpop.eup %2493 }
 0x1f4   :  { %v2496_v38 = vpop.eup %2495  ;;  %v1018_v56 = vmul.f32 %v2494_v60, %v1014_v10  ;;  %2497 = vrcp.f32 %v1016_v57  ;;  %vm1023_vm12 = vweird.f32 %v2494_v60  ;;  %v1058_v25 = vand.u32 2147483648, %v1016_v57 }
 0x1f5   :  { %v1033_v53 = vmul.f32 %v2496_v38, %v1015_v12  ;;  %2499 = vtanh.f32 %v1004_v61  ;;  %vm1038_vm13 = vweird.f32 %v2496_v38  ;;  %vm1024_vm0 = vmor %vm1022_vm14, %vm1023_vm12  ;;  %vm1052_vm5 = vweird.f32 %v1016_v57 }
 0x1f6   :  { %v1019_v59 = vsub.f32 1.0, %v1018_v56  ;;  %vm1039_vm1 = vmor %vm1037_vm15, %vm1038_vm13  ;;  %v1044_v56 = vor.u32 1.1754944e-38, %v1043_v63  ;;  %v1059_v9 = vor.u32 1.1754944e-38, %v1058_v25  ;;  %v4330_v25 = vld [vmem:[#allocation22_spill] sm:$0xff] }
 0x1f7   :  { %v1034_v52 = vsub.f32 1.0, %v1033_v53 }
 0x1f8   :  { %v1020_v54 = vmul.f32 %v2494_v60, %v1019_v59 }
 0x1f9   :  { %v1035_v62 = vmul.f32 %v2496_v38, %v1034_v52 }
 0x1fa   :  { %v2498_v50 = vpop.eup %2497  ;;  %v1021_v13 = vadd.f32 %v2494_v60, %v1020_v54 }
 0x1fb   :  { %v1048_v51 = vmul.f32 %v2498_v50, %v1016_v57  ;;  %v1036_v8 = vadd.f32 %v2496_v38, %v1035_v62  ;;  %v2500_v61 = vpop.eup %2499  ;;  %vm1053_vm4 = vweird.f32 %v2498_v50  ;;  %v4319_v62 = vld [vmem:[#allocation35_spill] sm:$0xff] }
 0x1fc   :  { %v1025_v53 = vsel %vm1024_vm0, %v2494_v60, %v1021_v13  ;;  %v1056_v60 = vand.u32 2147483647, %v1016_v57  ;;  %vm1054_vm6 = vmor %vm1052_vm5, %vm1053_vm4  ;;  %v4317_v57 = vld [vmem:[#allocation41_spill] sm:$0xff]  ;;  %v4320_v13 = vld [vmem:[#allocation36_spill] sm:$0xff] }
 0x1fd   :  { %v1049_v58 = vsub.f32 1.0, %v1048_v51  ;;  %v1030_v59 = vsel %vm1027_vm2, %v1029_v49, %v1025_v53  ;;  %v1040_v6 = vsel %vm1039_vm1, %v2496_v38, %v1036_v8  ;;  %v4318_v38 = vld [vmem:[#allocation34_spill] sm:$0xff]  ;;  %v4321_v51 = vld [vmem:[#allocation37_spill] sm:$0xff]  ;;  %v4324_v53 = vld [vmem:[#allocation32_spill] sm:$0xff] }
 0x1fe   :  { %v1045_v52 = vsel %vm1042_vm3, %v1044_v56, %v1040_v6  ;;  %v1064_v48 = vmul.f32 %v2500_v61, %v1030_v59  ;;  %vm1057_vm7 = vcmp.eq.f32.partialorder %v1056_v60, 8.507059e+37  ;;  %v4322_v49 = vld [vmem:[#allocation30_spill] sm:$0xff]  ;;  %v4323_v56 = vld [vmem:[#allocation31_spill] sm:$0xff]  ;;  %v4325_v61 = vld [vmem:[#allocation33_spill] sm:$0xff] }
 0x1ff   :  { %v1050_v47 = vmul.f32 %v2498_v50, %v1049_v58  ;;  %v1063_v54 = vmul.f32 %v1045_v52, %v3634_v14  ;;  %v4312_v14 = vld [vmem:[#allocation44_spill] sm:$0xff]  ;;  %v4315_v58 = vld [vmem:[#allocation39_spill] sm:$0xff]  ;;  %v4326_v59 = vld [vmem:[#allocation26_spill] sm:$0xff] }
 0x200   :  { %v4327_v52 = vld [vmem:[#allocation27_spill] sm:$0xff] }
 0x201   :  { %v3709_v10 = vadd.f32 %v1064_v48, %v1063_v54  ;;  %v1051_v12 = vadd.f32 %v2498_v50, %v1050_v47  ;;  %v4313_v47 = vld [vmem:[#allocation45_spill] sm:$0xff]  ;;  %v4314_v48 = vld [vmem:[#allocation38_spill] sm:$0xff]  ;;  %v4328_v54 = vld [vmem:[#allocation28_spill] sm:$0xff] }
 0x202   :  { %v4331_v60 = vld [vmem:[#allocation23_spill] sm:$0xff] }
 0x203   :  { %2501 = vtanh.f32 %v3709_v10  ;;  %v1055_v63 = vsel %vm1054_vm6, %v2498_v50, %v1051_v12  ;;  %v4316_v50 = vld [vmem:[#allocation40_spill] sm:$0xff]  ;;  %v4329_v12 = vld [vmem:[#allocation29_spill] sm:$0xff] }
 0x204   :  { %v1060_v55 = vsel %vm1057_vm7, %v1059_v9, %v1055_v63  ;;  %v4332_v63 = vld [vmem:[#allocation24_spill] sm:$0xff]  ;;  %v4333_v9 = vld [vmem:[#allocation25_spill] sm:$0xff] }
 0x209   :  { %v2502_v8 = vpop.eup %2501 }
 0x20a   :  { %v1067_v6 = vmul.f32 %v2502_v8, %v1060_v55  ;;  %v4334_v8 = vld [vmem:[#allocation18_spill] sm:$0xff]  ;;  %v4335_v55 = vld [vmem:[#allocation19_spill] sm:$0xff] }
 0x20c   :  { %2445 = vst [vmem:[%s4038_s4 + $0x8] sm:$0xff] %v1067_v6  ;;  %1157 = vmatmul.f32.vlgmr.msrb.gmra.mxu0 %v1067_v6  ;;  %1177 = vmatmul.f32.vlgmr.msrb.gmra.mxu1 %v1067_v6 }
 0x20d   :  { %1197 = vmatmul.f32.vlgmr.msrb.gmra.mxu2 %v1067_v6  ;;  %1217 = vmatmul.f32.vlgmr.msrb.gmra.mxu3 %v1067_v6  ;;  %v4336_v6 = vld [vmem:[#allocation20_spill] sm:$0xff] }
 0x20e   :  { %1581 = vmatpush.msrb.mxu0 %v3252_v3  ;;  %1601 = vmatpush.msrb.mxu1 %v3257_v2 }
 0x20f   :  { %1621 = vmatpush.msrb.mxu2 %v3262_v1  ;;  %1641 = vmatpush.msrb.mxu3 %v3267_v0 }
 0x210   :  { %1582 = vmatpush.msrb.mxu0 %v4193_v4  ;;  %1602 = vmatpush.msrb.mxu1 %v4194_v5 }
 0x211   :  { %1622 = vmatpush.msrb.mxu2 %v4195_v11  ;;  %1642 = vmatpush.msrb.mxu3 %v3247_v7 }
 0x212   :  { %1583 = vmatpush.msrb.mxu0 %v4196_v15  ;;  %1603 = vmatpush.msrb.mxu1 %v4197_v16 }
 0x213   :  { %1623 = vmatpush.msrb.mxu2 %v4198_v17  ;;  %1643 = vmatpush.msrb.mxu3 %v4199_v18 }
 0x214   :  { %1584 = vmatpush.msrb.mxu0 %v4200_v19  ;;  %1604 = vmatpush.msrb.mxu1 %v4201_v20 }
 0x215   :  { %1624 = vmatpush.msrb.mxu2 %v4202_v21  ;;  %1644 = vmatpush.msrb.mxu3 %v4203_v22 }
 0x216   :  { %1585 = vmatpush.msrb.mxu0 %v4204_v23  ;;  %1605 = vmatpush.msrb.mxu1 %v4205_v24 }
 0x217   :  { %1625 = vmatpush.msrb.mxu2 %v4206_v26  ;;  %1645 = vmatpush.msrb.mxu3 %v4207_v27 }
 0x218   :  { %1586 = vmatpush.msrb.mxu0 %v4208_v28  ;;  %1606 = vmatpush.msrb.mxu1 %v4209_v29 }
 0x219   :  { %1626 = vmatpush.msrb.mxu2 %v4210_v30  ;;  %1646 = vmatpush.msrb.mxu3 %v4211_v31 }
 0x21a   :  { %1587 = vmatpush.msrb.mxu0 %v4212_v32  ;;  %1607 = vmatpush.msrb.mxu1 %v4213_v33 }
 0x21b   :  { %1627 = vmatpush.msrb.mxu2 %v4214_v34  ;;  %1647 = vmatpush.msrb.mxu3 %v4215_v35 }
 0x21c   :  { %1588 = vmatpush.msrb.mxu0 %v4216_v36  ;;  %1608 = vmatpush.msrb.mxu1 %v4217_v37 }
 0x21d   :  { %1628 = vmatpush.msrb.mxu2 %v4218_v39  ;;  %1648 = vmatpush.msrb.mxu3 %v4219_v40 }
 0x21e   :  { %1589 = vmatpush.msrb.mxu0 %v4220_v41  ;;  %1609 = vmatpush.msrb.mxu1 %v4221_v42 }
 0x21f   :  { %1629 = vmatpush.msrb.mxu2 %v4222_v43  ;;  %1649 = vmatpush.msrb.mxu3 %v4223_v44 }
 0x220   :  { %1590 = vmatpush.msrb.mxu0 %v4224_v45  ;;  %1610 = vmatpush.msrb.mxu1 %v4225_v46 }
 0x221   :  { %1630 = vmatpush.msrb.mxu2 %v4312_v14  ;;  %1650 = vmatpush.msrb.mxu3 %v4313_v47 }
 0x222   :  { %1591 = vmatpush.msrb.mxu0 %v4314_v48  ;;  %1611 = vmatpush.msrb.mxu1 %v4315_v58 }
 0x223   :  { %1631 = vmatpush.msrb.mxu2 %v4316_v50  ;;  %1651 = vmatpush.msrb.mxu3 %v4317_v57 }
 0x224   :  { %1592 = vmatpush.msrb.mxu0 %v4318_v38  ;;  %1612 = vmatpush.msrb.mxu1 %v4319_v62 }
 0x225   :  { %1632 = vmatpush.msrb.mxu2 %v4320_v13  ;;  %1652 = vmatpush.msrb.mxu3 %v4321_v51 }
 0x226   :  { %1593 = vmatpush.msrb.mxu0 %v4322_v49  ;;  %1613 = vmatpush.msrb.mxu1 %v4323_v56 }
 0x227   :  { %1633 = vmatpush.msrb.mxu2 %v4324_v53  ;;  %1653 = vmatpush.msrb.mxu3 %v4325_v61  ;;  %v4338_v61 = vld [vmem:[#allocation16_spill] sm:$0xff]  ;;  %v4339_v53 = vld [vmem:[#allocation74_spill] sm:$0xff] }
 0x228   :  { %1594 = vmatpush.msrb.mxu0 %v4326_v59  ;;  %1614 = vmatpush.msrb.mxu1 %v4327_v52  ;;  %v4337_v59 = vld [vmem:[#allocation21_spill] sm:$0xff] }
 0x229   :  { %1634 = vmatpush.msrb.mxu2 %v4328_v54  ;;  %1654 = vmatpush.msrb.mxu3 %v4329_v12 }
 0x22a   :  { %1595 = vmatpush.msrb.mxu0 %v4330_v25  ;;  %1615 = vmatpush.msrb.mxu1 %v4331_v60 }
 0x22b   :  { %1635 = vmatpush.msrb.mxu2 %v4332_v63  ;;  %1655 = vmatpush.msrb.mxu3 %v4333_v9  ;;  %v4340_v9 = vld [vmem:[#allocation75_spill] sm:$0xff] }
 0x22c   :  { %1596 = vmatpush.msrb.mxu0 %v4334_v8  ;;  %1616 = vmatpush.msrb.mxu1 %v4335_v55 }
 0x22d   :  { %1636 = vmatpush.msrb.mxu2 %v4336_v6  ;;  %1656 = vmatpush.msrb.mxu3 %v4337_v59 }
 0x289   :  { %v1158_v52 = vpop.f32.mrf.mxu0  ;;  %v1178_v54 = vpop.f32.mrf.mxu1 }
 0x28a   :  { %v1221_v12 = vadd.f32 %v1158_v52, %v4338_v61  ;;  %v1222_v25 = vadd.f32 %v1178_v54, %v4339_v53  ;;  %v4341_v53 = vld [vmem:[#allocation76_spill] sm:$0xff] }
 0x28c   :  { %v2446_v56 = vmul.f32 -1.442695, %v1221_v12  ;;  %v2447_v60 = vmul.f32 -1.442695, %v1222_v25 }
 0x28e   :  { %2503 = vpow2.f32 %v2446_v56 }
 0x28f   :  { %2505 = vpow2.f32 %v2447_v60 }
 0x290   :  { %v1198_v63 = vpop.f32.mrf.mxu2  ;;  %v1218_v59 = vpop.f32.mrf.mxu3 }
 0x291   :  { %v1223_v49 = vadd.f32 %v1198_v63, %v4340_v9  ;;  %v1224_v54 = vadd.f32 %v1218_v59, %v4341_v53 }
 0x293   :  { %v2448_v8 = vmul.f32 -1.442695, %v1223_v49 }
 0x294   :  { %v2504_v51 = vpop.eup %2503 }
 0x295   :  { %v2506_v55 = vpop.eup %2505  ;;  %v1234_v13 = vadd.f32 1.0, %v2504_v51  ;;  %2507 = vpow2.f32 %v2448_v8 }
 0x296   :  { %v1235_v6 = vadd.f32 1.0, %v2506_v55 }
 0x297   :  { %2509 = vrcp.f32 %v1234_v13  ;;  %v1248_v49 = vand.u32 2147483648, %v1234_v13  ;;  %v1246_v8 = vand.u32 2147483647, %v1234_v13  ;;  %vm1242_vm10 = vweird.f32 %v1234_v13 }
 0x298   :  { %2511 = vrcp.f32 %v1235_v6  ;;  %v1263_v9 = vand.u32 2147483648, %v1235_v6  ;;  %v1261_v38 = vand.u32 2147483647, %v1235_v6  ;;  %vm1257_vm11 = vweird.f32 %v1235_v6 }
 0x299   :  { %v1249_v53 = vor.u32 1.1754944e-38, %v1248_v49  ;;  %vm1247_vm14 = vcmp.eq.f32.partialorder %v1246_v8, 8.507059e+37 }
 0x29a   :  { %vm1262_vm15 = vcmp.eq.f32.partialorder %v1261_v38, 8.507059e+37 }
 0x29b   :  { %v2508_v62 = vpop.eup %2507 }
 0x29c   :  { %v1236_v61 = vadd.f32 1.0, %v2508_v62 }
 0x29d   :  { %v2510_v52 = vpop.eup %2509 }
 0x29e   :  { %v2512_v12 = vpop.eup %2511  ;;  %v1238_v56 = vmul.f32 %v2510_v52, %v1234_v13  ;;  %2513 = vrcp.f32 %v1236_v61  ;;  %vm1243_vm8 = vweird.f32 %v2510_v52  ;;  %v1278_v49 = vand.u32 2147483648, %v1236_v61 }
 0x29f   :  { %v1253_v25 = vmul.f32 %v2512_v12, %v1235_v6  ;;  %2515 = vtanh.f32 %v1224_v54  ;;  %vm1258_vm9 = vweird.f32 %v2512_v12  ;;  %vm1244_vm12 = vmor %vm1242_vm10, %vm1243_vm8  ;;  %vm1272_vm1 = vweird.f32 %v1236_v61 }
 0x2a0   :  { %v1239_v60 = vsub.f32 1.0, %v1238_v56  ;;  %vm1259_vm13 = vmor %vm1257_vm11, %vm1258_vm9  ;;  %v1264_v56 = vor.u32 1.1754944e-38, %v1263_v9  ;;  %v1279_v8 = vor.u32 1.1754944e-38, %v1278_v49  ;;  %v4360_v49 = vld [vmem:[#allocation22_spill] sm:$0xff] }
 0x2a1   :  { %v1254_v63 = vsub.f32 1.0, %v1253_v25 }
 0x2a2   :  { %v1240_v51 = vmul.f32 %v2510_v52, %v1239_v60 }
 0x2a3   :  { %v1255_v55 = vmul.f32 %v2512_v12, %v1254_v63 }
 0x2a4   :  { %v2514_v57 = vpop.eup %2513  ;;  %v1241_v62 = vadd.f32 %v2510_v52, %v1240_v51 }
 0x2a5   :  { %v1268_v59 = vmul.f32 %v2514_v57, %v1236_v61  ;;  %v1256_v50 = vadd.f32 %v2512_v12, %v1255_v55  ;;  %v2516_v54 = vpop.eup %2515  ;;  %vm1273_vm0 = vweird.f32 %v2514_v57  ;;  %v4349_v55 = vld [vmem:[#allocation35_spill] sm:$0xff] }
 0x2a6   :  { %v1245_v25 = vsel %vm1244_vm12, %v2510_v52, %v1241_v62  ;;  %v1276_v52 = vand.u32 2147483647, %v1236_v61  ;;  %vm1274_vm2 = vmor %vm1272_vm1, %vm1273_vm0  ;;  %v4347_v61 = vld [vmem:[#allocation41_spill] sm:$0xff]  ;;  %v4350_v62 = vld [vmem:[#allocation36_spill] sm:$0xff] }
 0x2a7   :  { %v1269_v58 = vsub.f32 1.0, %v1268_v59  ;;  %v1250_v60 = vsel %vm1247_vm14, %v1249_v53, %v1245_v25  ;;  %v1260_v48 = vsel %vm1259_vm13, %v2512_v12, %v1256_v50  ;;  %v4348_v12 = vld [vmem:[#allocation34_spill] sm:$0xff]  ;;  %v4351_v59 = vld [vmem:[#allocation37_spill] sm:$0xff]  ;;  %v4354_v25 = vld [vmem:[#allocation32_spill] sm:$0xff] }
 0x2a8   :  { %v1265_v63 = vsel %vm1262_vm15, %v1264_v56, %v1260_v48  ;;  %v1284_v47 = vmul.f32 %v2516_v54, %v1250_v60  ;;  %vm1277_vm3 = vcmp.eq.f32.partialorder %v1276_v52, 8.507059e+37  ;;  %v4352_v53 = vld [vmem:[#allocation30_spill] sm:$0xff]  ;;  %v4353_v56 = vld [vmem:[#allocation31_spill] sm:$0xff]  ;;  %v4355_v54 = vld [vmem:[#allocation33_spill] sm:$0xff] }
 0x2a9   :  { %v1270_v14 = vmul.f32 %v2514_v57, %v1269_v58  ;;  %v1283_v51 = vmul.f32 %v1265_v63, %v3709_v10  ;;  %v4342_v10 = vld [vmem:[#allocation44_spill] sm:$0xff]  ;;  %v4345_v58 = vld [vmem:[#allocation39_spill] sm:$0xff]  ;;  %v4356_v60 = vld [vmem:[#allocation26_spill] sm:$0xff] }
 0x2aa   :  { %v4357_v63 = vld [vmem:[#allocation27_spill] sm:$0xff] }
 0x2ab   :  { %v3784_v13 = vadd.f32 %v1284_v47, %v1283_v51  ;;  %v1271_v6 = vadd.f32 %v2514_v57, %v1270_v14  ;;  %v4343_v14 = vld [vmem:[#allocation45_spill] sm:$0xff]  ;;  %v4344_v47 = vld [vmem:[#allocation38_spill] sm:$0xff]  ;;  %v4358_v51 = vld [vmem:[#allocation28_spill] sm:$0xff] }
 0x2ac   :  { %v4361_v52 = vld [vmem:[#allocation23_spill] sm:$0xff] }
 0x2ad   :  { %2517 = vtanh.f32 %v3784_v13  ;;  %v1275_v9 = vsel %vm1274_vm2, %v2514_v57, %v1271_v6  ;;  %v4346_v57 = vld [vmem:[#allocation40_spill] sm:$0xff]  ;;  %v4359_v6 = vld [vmem:[#allocation29_spill] sm:$0xff] }
 0x2ae   :  { %v1280_v38 = vsel %vm1277_vm3, %v1279_v8, %v1275_v9  ;;  %v4362_v9 = vld [vmem:[#allocation24_spill] sm:$0xff]  ;;  %v4363_v8 = vld [vmem:[#allocation25_spill] sm:$0xff] }
 0x2b3   :  { %v2518_v50 = vpop.eup %2517 }
 0x2b4   :  { %v1287_v48 = vmul.f32 %v2518_v50, %v1280_v38  ;;  %v4364_v50 = vld [vmem:[#allocation18_spill] sm:$0xff]  ;;  %v4365_v38 = vld [vmem:[#allocation19_spill] sm:$0xff] }
 0x2b6   :  { %2449 = vst [vmem:[%s4038_s4 + $0x10] sm:$0xff] %v1287_v48  ;;  %1377 = vmatmul.f32.vlgmr.msra.gmra.mxu0 %v1287_v48  ;;  %1397 = vmatmul.f32.vlgmr.msra.gmra.mxu1 %v1287_v48 }
 0x2b7   :  { %1417 = vmatmul.f32.vlgmr.msra.gmra.mxu2 %v1287_v48  ;;  %1437 = vmatmul.f32.vlgmr.msra.gmra.mxu3 %v1287_v48  ;;  %v4366_v48 = vld [vmem:[#allocation20_spill] sm:$0xff] }
 0x2b8   :  { %1801 = vmatpush.msra.mxu0 %v3252_v3  ;;  %1821 = vmatpush.msra.mxu1 %v3257_v2 }
 0x2b9   :  { %1841 = vmatpush.msra.mxu2 %v3262_v1  ;;  %1861 = vmatpush.msra.mxu3 %v3267_v0 }
 0x2ba   :  { %1802 = vmatpush.msra.mxu0 %v4193_v4  ;;  %1822 = vmatpush.msra.mxu1 %v4194_v5 }
 0x2bb   :  { %1842 = vmatpush.msra.mxu2 %v4195_v11  ;;  %1862 = vmatpush.msra.mxu3 %v3247_v7 }
 0x2bc   :  { %1803 = vmatpush.msra.mxu0 %v4196_v15  ;;  %1823 = vmatpush.msra.mxu1 %v4197_v16 }
 0x2bd   :  { %1843 = vmatpush.msra.mxu2 %v4198_v17  ;;  %1863 = vmatpush.msra.mxu3 %v4199_v18 }
 0x2be   :  { %1804 = vmatpush.msra.mxu0 %v4200_v19  ;;  %1824 = vmatpush.msra.mxu1 %v4201_v20 }
 0x2bf   :  { %1844 = vmatpush.msra.mxu2 %v4202_v21  ;;  %1864 = vmatpush.msra.mxu3 %v4203_v22 }
 0x2c0   :  { %1805 = vmatpush.msra.mxu0 %v4204_v23  ;;  %1825 = vmatpush.msra.mxu1 %v4205_v24 }
 0x2c1   :  { %1845 = vmatpush.msra.mxu2 %v4206_v26  ;;  %1865 = vmatpush.msra.mxu3 %v4207_v27 }
 0x2c2   :  { %1806 = vmatpush.msra.mxu0 %v4208_v28  ;;  %1826 = vmatpush.msra.mxu1 %v4209_v29 }
 0x2c3   :  { %1846 = vmatpush.msra.mxu2 %v4210_v30  ;;  %1866 = vmatpush.msra.mxu3 %v4211_v31 }
 0x2c4   :  { %1807 = vmatpush.msra.mxu0 %v4212_v32  ;;  %1827 = vmatpush.msra.mxu1 %v4213_v33 }
 0x2c5   :  { %1847 = vmatpush.msra.mxu2 %v4214_v34  ;;  %1867 = vmatpush.msra.mxu3 %v4215_v35 }
 0x2c6   :  { %1808 = vmatpush.msra.mxu0 %v4216_v36  ;;  %1828 = vmatpush.msra.mxu1 %v4217_v37 }
 0x2c7   :  { %1848 = vmatpush.msra.mxu2 %v4218_v39  ;;  %1868 = vmatpush.msra.mxu3 %v4219_v40 }
 0x2c8   :  { %1809 = vmatpush.msra.mxu0 %v4220_v41  ;;  %1829 = vmatpush.msra.mxu1 %v4221_v42 }
 0x2c9   :  { %1849 = vmatpush.msra.mxu2 %v4222_v43  ;;  %1869 = vmatpush.msra.mxu3 %v4223_v44 }
 0x2ca   :  { %1810 = vmatpush.msra.mxu0 %v4224_v45  ;;  %1830 = vmatpush.msra.mxu1 %v4225_v46 }
 0x2cb   :  { %1850 = vmatpush.msra.mxu2 %v4342_v10  ;;  %1870 = vmatpush.msra.mxu3 %v4343_v14 }
 0x2cc   :  { %1811 = vmatpush.msra.mxu0 %v4344_v47  ;;  %1831 = vmatpush.msra.mxu1 %v4345_v58 }
 0x2cd   :  { %1851 = vmatpush.msra.mxu2 %v4346_v57  ;;  %1871 = vmatpush.msra.mxu3 %v4347_v61 }
 0x2ce   :  { %1812 = vmatpush.msra.mxu0 %v4348_v12  ;;  %1832 = vmatpush.msra.mxu1 %v4349_v55 }
 0x2cf   :  { %1852 = vmatpush.msra.mxu2 %v4350_v62  ;;  %1872 = vmatpush.msra.mxu3 %v4351_v59 }
 0x2d0   :  { %1813 = vmatpush.msra.mxu0 %v4352_v53  ;;  %1833 = vmatpush.msra.mxu1 %v4353_v56 }
 0x2d1   :  { %1853 = vmatpush.msra.mxu2 %v4354_v25  ;;  %1873 = vmatpush.msra.mxu3 %v4355_v54  ;;  %v4368_v54 = vld [vmem:[#allocation70_spill] sm:$0xff]  ;;  %v4369_v25 = vld [vmem:[#allocation71_spill] sm:$0xff] }
 0x2d2   :  { %1814 = vmatpush.msra.mxu0 %v4356_v60  ;;  %1834 = vmatpush.msra.mxu1 %v4357_v63  ;;  %v4367_v60 = vld [vmem:[#allocation21_spill] sm:$0xff] }
 0x2d3   :  { %1854 = vmatpush.msra.mxu2 %v4358_v51  ;;  %1874 = vmatpush.msra.mxu3 %v4359_v6 }
 0x2d4   :  { %1815 = vmatpush.msra.mxu0 %v4360_v49  ;;  %1835 = vmatpush.msra.mxu1 %v4361_v52 }
 0x2d5   :  { %1855 = vmatpush.msra.mxu2 %v4362_v9  ;;  %1875 = vmatpush.msra.mxu3 %v4363_v8  ;;  %v4370_v8 = vld [vmem:[#allocation72_spill] sm:$0xff] }
 0x2d6   :  { %1816 = vmatpush.msra.mxu0 %v4364_v50  ;;  %1836 = vmatpush.msra.mxu1 %v4365_v38 }
 0x2d7   :  { %1856 = vmatpush.msra.mxu2 %v4366_v48  ;;  %1876 = vmatpush.msra.mxu3 %v4367_v60 }
 0x333   :  { %v1378_v63 = vpop.f32.mrf.mxu0  ;;  %v1398_v51 = vpop.f32.mrf.mxu1 }
 0x334   :  { %v1441_v6 = vadd.f32 %v1378_v63, %v4368_v54  ;;  %v1442_v49 = vadd.f32 %v1398_v51, %v4369_v25  ;;  %v4371_v25 = vld [vmem:[#allocation73_spill] sm:$0xff] }
 0x336   :  { %v2450_v56 = vmul.f32 -1.442695, %v1441_v6  ;;  %v2451_v52 = vmul.f32 -1.442695, %v1442_v49 }
 0x338   :  { %2519 = vpow2.f32 %v2450_v56 }
 0x339   :  { %2521 = vpow2.f32 %v2451_v52 }
 0x33a   :  { %v1418_v9 = vpop.f32.mrf.mxu2  ;;  %v1438_v60 = vpop.f32.mrf.mxu3 }
 0x33b   :  { %v1443_v53 = vadd.f32 %v1418_v9, %v4370_v8  ;;  %v1444_v51 = vadd.f32 %v1438_v60, %v4371_v25 }
 0x33d   :  { %v2452_v50 = vmul.f32 -1.442695, %v1443_v53 }
 0x33e   :  { %v2520_v59 = vpop.eup %2519 }
 0x33f   :  { %v2522_v38 = vpop.eup %2521  ;;  %v1454_v62 = vadd.f32 1.0, %v2520_v59  ;;  %2523 = vpow2.f32 %v2452_v50 }
 0x340   :  { %v1455_v48 = vadd.f32 1.0, %v2522_v38 }
 0x341   :  { %2525 = vrcp.f32 %v1454_v62  ;;  %v1468_v53 = vand.u32 2147483648, %v1454_v62  ;;  %v1466_v50 = vand.u32 2147483647, %v1454_v62  ;;  %vm1462_vm6 = vweird.f32 %v1454_v62 }
 0x342   :  { %2527 = vrcp.f32 %v1455_v48  ;;  %v1483_v8 = vand.u32 2147483648, %v1455_v48  ;;  %v1481_v12 = vand.u32 2147483647, %v1455_v48  ;;  %vm1477_vm7 = vweird.f32 %v1455_v48 }
 0x343   :  { %v1469_v25 = vor.u32 1.1754944e-38, %v1468_v53  ;;  %vm1467_vm10 = vcmp.eq.f32.partialorder %v1466_v50, 8.507059e+37 }
 0x344   :  { %vm1482_vm11 = vcmp.eq.f32.partialorder %v1481_v12, 8.507059e+37 }
 0x345   :  { %v2524_v55 = vpop.eup %2523 }
 0x346   :  { %v1456_v54 = vadd.f32 1.0, %v2524_v55 }
 0x347   :  { %v2526_v63 = vpop.eup %2525 }
 0x348   :  { %v2528_v6 = vpop.eup %2527  ;;  %v1458_v56 = vmul.f32 %v2526_v63, %v1454_v62  ;;  %2529 = vrcp.f32 %v1456_v54  ;;  %vm1463_vm4 = vweird.f32 %v2526_v63  ;;  %v1498_v53 = vand.u32 2147483648, %v1456_v54 }
 0x349   :  { %v1473_v49 = vmul.f32 %v2528_v6, %v1455_v48  ;;  %2531 = vtanh.f32 %v1444_v51  ;;  %vm1478_vm5 = vweird.f32 %v2528_v6  ;;  %vm1464_vm8 = vmor %vm1462_vm6, %vm1463_vm4  ;;  %vm1492_vm13 = vweird.f32 %v1456_v54 }
 0x34a   :  { %v1459_v52 = vsub.f32 1.0, %v1458_v56  ;;  %vm1479_vm9 = vmor %vm1477_vm7, %vm1478_vm5  ;;  %v1484_v56 = vor.u32 1.1754944e-38, %v1483_v8  ;;  %v1499_v50 = vor.u32 1.1754944e-38, %v1498_v53  ;;  %v4390_v53 = vld [vmem:[#allocation22_spill] sm:$0xff] }
 0x34b   :  { %v1474_v9 = vsub.f32 1.0, %v1473_v49 }
 0x34c   :  { %v1460_v59 = vmul.f32 %v2526_v63, %v1459_v52 }
 0x34d   :  { %v1475_v38 = vmul.f32 %v2528_v6, %v1474_v9 }
 0x34e   :  { %v2530_v61 = vpop.eup %2529  ;;  %v1461_v55 = vadd.f32 %v2526_v63, %v1460_v59 }
 0x34f   :  { %v1488_v60 = vmul.f32 %v2530_v61, %v1456_v54  ;;  %v1476_v57 = vadd.f32 %v2528_v6, %v1475_v38  ;;  %v2532_v51 = vpop.eup %2531  ;;  %vm1493_vm12 = vweird.f32 %v2530_v61  ;;  %v4379_v38 = vld [vmem:[#allocation35_spill] sm:$0xff] }
 0x350   :  { %v1465_v49 = vsel %vm1464_vm8, %v2526_v63, %v1461_v55  ;;  %v1496_v63 = vand.u32 2147483647, %v1456_v54  ;;  %vm1494_vm14 = vmor %vm1492_vm13, %vm1493_vm12  ;;  %v4377_v54 = vld [vmem:[#allocation41_spill] sm:$0xff]  ;;  %v4380_v55 = vld [vmem:[#allocation36_spill] sm:$0xff] }
 0x351   :  { %v1489_v58 = vsub.f32 1.0, %v1488_v60  ;;  %v1470_v52 = vsel %vm1467_vm10, %v1469_v25, %v1465_v49  ;;  %v1480_v47 = vsel %vm1479_vm9, %v2528_v6, %v1476_v57  ;;  %v4378_v6 = vld [vmem:[#allocation34_spill] sm:$0xff]  ;;  %v4381_v60 = vld [vmem:[#allocation37_spill] sm:$0xff]  ;;  %v4384_v49 = vld [vmem:[#allocation32_spill] sm:$0xff] }
 0x352   :  { %v1485_v9 = vsel %vm1482_vm11, %v1484_v56, %v1480_v47  ;;  %v1504_v14 = vmul.f32 %v2532_v51, %v1470_v52  ;;  %vm1497_vm15 = vcmp.eq.f32.partialorder %v1496_v63, 8.507059e+37  ;;  %v4382_v25 = vld [vmem:[#allocation30_spill] sm:$0xff]  ;;  %v4383_v56 = vld [vmem:[#allocation31_spill] sm:$0xff]  ;;  %v4385_v51 = vld [vmem:[#allocation33_spill] sm:$0xff] }
 0x353   :  { %v1490_v10 = vmul.f32 %v2530_v61, %v1489_v58  ;;  %v1503_v59 = vmul.f32 %v1485_v9, %v3784_v13  ;;  %v4372_v13 = vld [vmem:[#allocation44_spill] sm:$0xff]  ;;  %v4375_v58 = vld [vmem:[#allocation39_spill] sm:$0xff]  ;;  %v4386_v52 = vld [vmem:[#allocation26_spill] sm:$0xff] }
 0x354   :  { %v4387_v9 = vld [vmem:[#allocation27_spill] sm:$0xff] }
 0x355   :  { %v3859_v62 = vadd.f32 %v1504_v14, %v1503_v59  ;;  %v1491_v48 = vadd.f32 %v2530_v61, %v1490_v10  ;;  %v4373_v10 = vld [vmem:[#allocation45_spill] sm:$0xff]  ;;  %v4374_v14 = vld [vmem:[#allocation38_spill] sm:$0xff]  ;;  %v4388_v59 = vld [vmem:[#allocation28_spill] sm:$0xff] }
 0x356   :  { %v4391_v63 = vld [vmem:[#allocation23_spill] sm:$0xff] }
 0x357   :  { %2533 = vtanh.f32 %v3859_v62  ;;  %v1495_v8 = vsel %vm1494_vm14, %v2530_v61, %v1491_v48  ;;  %v4376_v61 = vld [vmem:[#allocation40_spill] sm:$0xff]  ;;  %v4389_v48 = vld [vmem:[#allocation29_spill] sm:$0xff] }
 0x358   :  { %v1500_v12 = vsel %vm1497_vm15, %v1499_v50, %v1495_v8  ;;  %v4392_v8 = vld [vmem:[#allocation24_spill] sm:$0xff]  ;;  %v4393_v50 = vld [vmem:[#allocation25_spill] sm:$0xff] }
 0x35d   :  { %v2534_v57 = vpop.eup %2533 }
 0x35e   :  { %v1507_v47 = vmul.f32 %v2534_v57, %v1500_v12  ;;  %v4394_v57 = vld [vmem:[#allocation18_spill] sm:$0xff]  ;;  %v4395_v12 = vld [vmem:[#allocation19_spill] sm:$0xff] }
 0x360   :  { %2453 = vst [vmem:[%s4038_s4 + $0x18] sm:$0xff] %v1507_v47  ;;  %1597 = vmatmul.f32.vlgmr.msrb.gmra.mxu0 %v1507_v47  ;;  %1617 = vmatmul.f32.vlgmr.msrb.gmra.mxu1 %v1507_v47 }
 0x361   :  { %1637 = vmatmul.f32.vlgmr.msrb.gmra.mxu2 %v1507_v47  ;;  %1657 = vmatmul.f32.vlgmr.msrb.gmra.mxu3 %v1507_v47  ;;  %v4396_v47 = vld [vmem:[#allocation20_spill] sm:$0xff] }
 0x362   :  { %2021 = vmatpush.msrb.mxu0 %v3252_v3  ;;  %2041 = vmatpush.msrb.mxu1 %v3257_v2 }
 0x363   :  { %2061 = vmatpush.msrb.mxu2 %v3262_v1  ;;  %2081 = vmatpush.msrb.mxu3 %v3267_v0 }
 0x364   :  { %2022 = vmatpush.msrb.mxu0 %v4193_v4  ;;  %2042 = vmatpush.msrb.mxu1 %v4194_v5 }
 0x365   :  { %2062 = vmatpush.msrb.mxu2 %v4195_v11  ;;  %2082 = vmatpush.msrb.mxu3 %v3247_v7 }
 0x366   :  { %2023 = vmatpush.msrb.mxu0 %v4196_v15  ;;  %2043 = vmatpush.msrb.mxu1 %v4197_v16 }
 0x367   :  { %2063 = vmatpush.msrb.mxu2 %v4198_v17  ;;  %2083 = vmatpush.msrb.mxu3 %v4199_v18 }
 0x368   :  { %2024 = vmatpush.msrb.mxu0 %v4200_v19  ;;  %2044 = vmatpush.msrb.mxu1 %v4201_v20 }
 0x369   :  { %2064 = vmatpush.msrb.mxu2 %v4202_v21  ;;  %2084 = vmatpush.msrb.mxu3 %v4203_v22 }
 0x36a   :  { %2025 = vmatpush.msrb.mxu0 %v4204_v23  ;;  %2045 = vmatpush.msrb.mxu1 %v4205_v24 }
 0x36b   :  { %2065 = vmatpush.msrb.mxu2 %v4206_v26  ;;  %2085 = vmatpush.msrb.mxu3 %v4207_v27 }
 0x36c   :  { %2026 = vmatpush.msrb.mxu0 %v4208_v28  ;;  %2046 = vmatpush.msrb.mxu1 %v4209_v29 }
 0x36d   :  { %2066 = vmatpush.msrb.mxu2 %v4210_v30  ;;  %2086 = vmatpush.msrb.mxu3 %v4211_v31 }
 0x36e   :  { %2027 = vmatpush.msrb.mxu0 %v4212_v32  ;;  %2047 = vmatpush.msrb.mxu1 %v4213_v33 }
 0x36f   :  { %2067 = vmatpush.msrb.mxu2 %v4214_v34  ;;  %2087 = vmatpush.msrb.mxu3 %v4215_v35 }
 0x370   :  { %2028 = vmatpush.msrb.mxu0 %v4216_v36  ;;  %2048 = vmatpush.msrb.mxu1 %v4217_v37 }
 0x371   :  { %2068 = vmatpush.msrb.mxu2 %v4218_v39  ;;  %2088 = vmatpush.msrb.mxu3 %v4219_v40 }
 0x372   :  { %2029 = vmatpush.msrb.mxu0 %v4220_v41  ;;  %2049 = vmatpush.msrb.mxu1 %v4221_v42 }
 0x373   :  { %2069 = vmatpush.msrb.mxu2 %v4222_v43  ;;  %2089 = vmatpush.msrb.mxu3 %v4223_v44 }
 0x374   :  { %2030 = vmatpush.msrb.mxu0 %v4224_v45  ;;  %2050 = vmatpush.msrb.mxu1 %v4225_v46 }
 0x375   :  { %2070 = vmatpush.msrb.mxu2 %v4372_v13  ;;  %2090 = vmatpush.msrb.mxu3 %v4373_v10 }
 0x376   :  { %2031 = vmatpush.msrb.mxu0 %v4374_v14  ;;  %2051 = vmatpush.msrb.mxu1 %v4375_v58 }
 0x377   :  { %2071 = vmatpush.msrb.mxu2 %v4376_v61  ;;  %2091 = vmatpush.msrb.mxu3 %v4377_v54 }
 0x378   :  { %2032 = vmatpush.msrb.mxu0 %v4378_v6  ;;  %2052 = vmatpush.msrb.mxu1 %v4379_v38 }
 0x379   :  { %2072 = vmatpush.msrb.mxu2 %v4380_v55  ;;  %2092 = vmatpush.msrb.mxu3 %v4381_v60 }
 0x37a   :  { %2033 = vmatpush.msrb.mxu0 %v4382_v25  ;;  %2053 = vmatpush.msrb.mxu1 %v4383_v56 }
 0x37b   :  { %2073 = vmatpush.msrb.mxu2 %v4384_v49  ;;  %2093 = vmatpush.msrb.mxu3 %v4385_v51  ;;  %v4398_v51 = vld [vmem:[#allocation66_spill] sm:$0xff]  ;;  %v4399_v49 = vld [vmem:[#allocation67_spill] sm:$0xff] }
 0x37c   :  { %2034 = vmatpush.msrb.mxu0 %v4386_v52  ;;  %2054 = vmatpush.msrb.mxu1 %v4387_v9  ;;  %v4397_v52 = vld [vmem:[#allocation21_spill] sm:$0xff] }
 0x37d   :  { %2074 = vmatpush.msrb.mxu2 %v4388_v59  ;;  %2094 = vmatpush.msrb.mxu3 %v4389_v48 }
 0x37e   :  { %2035 = vmatpush.msrb.mxu0 %v4390_v53  ;;  %2055 = vmatpush.msrb.mxu1 %v4391_v63 }
 0x37f   :  { %2075 = vmatpush.msrb.mxu2 %v4392_v8  ;;  %2095 = vmatpush.msrb.mxu3 %v4393_v50  ;;  %v4400_v50 = vld [vmem:[#allocation68_spill] sm:$0xff] }
 0x380   :  { %2036 = vmatpush.msrb.mxu0 %v4394_v57  ;;  %2056 = vmatpush.msrb.mxu1 %v4395_v12 }
 0x381   :  { %2076 = vmatpush.msrb.mxu2 %v4396_v47  ;;  %2096 = vmatpush.msrb.mxu3 %v4397_v52 }
 0x3dd   :  { %v1598_v9 = vpop.f32.mrf.mxu0  ;;  %v1618_v59 = vpop.f32.mrf.mxu1 }
 0x3de   :  { %v1661_v48 = vadd.f32 %v1598_v9, %v4398_v51  ;;  %v1662_v53 = vadd.f32 %v1618_v59, %v4399_v49  ;;  %v4401_v49 = vld [vmem:[#allocation69_spill] sm:$0xff] }
 0x3e0   :  { %v2454_v56 = vmul.f32 -1.442695, %v1661_v48  ;;  %v2455_v63 = vmul.f32 -1.442695, %v1662_v53 }
 0x3e2   :  { %2535 = vpow2.f32 %v2454_v56 }
 0x3e3   :  { %2537 = vpow2.f32 %v2455_v63 }
 0x3e4   :  { %v1638_v8 = vpop.f32.mrf.mxu2  ;;  %v1658_v52 = vpop.f32.mrf.mxu3 }
 0x3e5   :  { %v1663_v25 = vadd.f32 %v1638_v8, %v4400_v50  ;;  %v1664_v59 = vadd.f32 %v1658_v52, %v4401_v49 }
 0x3e7   :  { %v2456_v57 = vmul.f32 -1.442695, %v1663_v25 }
 0x3e8   :  { %v2536_v60 = vpop.eup %2535 }
 0x3e9   :  { %v2538_v12 = vpop.eup %2537  ;;  %v1674_v55 = vadd.f32 1.0, %v2536_v60  ;;  %2539 = vpow2.f32 %v2456_v57 }
 0x3ea   :  { %v1675_v47 = vadd.f32 1.0, %v2538_v12 }
 0x3eb   :  { %2541 = vrcp.f32 %v1674_v55  ;;  %v1688_v25 = vand.u32 2147483648, %v1674_v55  ;;  %v1686_v57 = vand.u32 2147483647, %v1674_v55  ;;  %vm1682_vm2 = vweird.f32 %v1674_v55 }
 0x3ec   :  { %2543 = vrcp.f32 %v1675_v47  ;;  %v1703_v50 = vand.u32 2147483648, %v1675_v47  ;;  %v1701_v6 = vand.u32 2147483647, %v1675_v47  ;;  %vm1697_vm3 = vweird.f32 %v1675_v47 }
 0x3ed   :  { %v1689_v49 = vor.u32 1.1754944e-38, %v1688_v25  ;;  %vm1687_vm6 = vcmp.eq.f32.partialorder %v1686_v57, 8.507059e+37 }
 0x3ee   :  { %vm1702_vm7 = vcmp.eq.f32.partialorder %v1701_v6, 8.507059e+37 }
 0x3ef   :  { %v2540_v38 = vpop.eup %2539 }
 0x3f0   :  { %v1676_v51 = vadd.f32 1.0, %v2540_v38 }
 0x3f1   :  { %v2542_v9 = vpop.eup %2541 }
 0x3f2   :  { %v2544_v48 = vpop.eup %2543  ;;  %v1678_v56 = vmul.f32 %v2542_v9, %v1674_v55  ;;  %2545 = vrcp.f32 %v1676_v51  ;;  %vm1683_vm0 = vweird.f32 %v2542_v9  ;;  %v1718_v25 = vand.u32 2147483648, %v1676_v51 }
 0x3f3   :  { %v1693_v53 = vmul.f32 %v2544_v48, %v1675_v47  ;;  %2547 = vtanh.f32 %v1664_v59  ;;  %vm1698_vm1 = vweird.f32 %v2544_v48  ;;  %vm1684_vm4 = vmor %vm1682_vm2, %vm1683_vm0  ;;  %vm1712_vm9 = vweird.f32 %v1676_v51 }
 0x3f4   :  { %v1679_v63 = vsub.f32 1.0, %v1678_v56  ;;  %vm1699_vm5 = vmor %vm1697_vm3, %vm1698_vm1  ;;  %v1704_v56 = vor.u32 1.1754944e-38, %v1703_v50  ;;  %v1719_v57 = vor.u32 1.1754944e-38, %v1718_v25 }
 0x3f5   :  { %v1694_v8 = vsub.f32 1.0, %v1693_v53 }
 0x3f6   :  { %v1680_v60 = vmul.f32 %v2542_v9, %v1679_v63 }
 0x3f7   :  { %v1695_v12 = vmul.f32 %v2544_v48, %v1694_v8 }
 0x3f8   :  { %v2546_v54 = vpop.eup %2545  ;;  %v1681_v38 = vadd.f32 %v2542_v9, %v1680_v60 }
 0x3f9   :  { %v1708_v52 = vmul.f32 %v2546_v54, %v1676_v51  ;;  %v1696_v61 = vadd.f32 %v2544_v48, %v1695_v12  ;;  %v2548_v59 = vpop.eup %2547  ;;  %vm1713_vm8 = vweird.f32 %v2546_v54 }
 0x3fa   :  { %v1685_v53 = vsel %vm1684_vm4, %v2542_v9, %v1681_v38  ;;  %v1716_v9 = vand.u32 2147483647, %v1676_v51  ;;  %vm1714_vm10 = vmor %vm1712_vm9, %vm1713_vm8  ;;  %v4431_v38 = vld [vmem:[#allocation65_spill] sm:$0xff] }
 0x3fb   :  { %v1709_v58 = vsub.f32 1.0, %v1708_v52  ;;  %v1690_v63 = vsel %vm1687_vm6, %v1689_v49, %v1685_v53  ;;  %v1700_v14 = vsel %vm1699_vm5, %v2544_v48, %v1696_v61 }
 0x3fc   :  { %v1705_v8 = vsel %vm1702_vm7, %v1704_v56, %v1700_v14  ;;  %v1724_v10 = vmul.f32 %v2548_v59, %v1690_v63  ;;  %vm1717_vm11 = vcmp.eq.f32.partialorder %v1716_v9, 8.507059e+37 }
 0x3fd   :  { %v1710_v13 = vmul.f32 %v2546_v54, %v1709_v58  ;;  %v1723_v60 = vmul.f32 %v1705_v8, %v3859_v62 }
 0x3ff   :  { %v3934_v55 = vadd.f32 %v1724_v10, %v1723_v60  ;;  %v1711_v47 = vadd.f32 %v2546_v54, %v1710_v13 }
 0x401   :  { %2549 = vtanh.f32 %v3934_v55  ;;  %v1715_v50 = vsel %vm1714_vm10, %v2546_v54, %v1711_v47 }
 0x402   :  { %v1720_v6 = vsel %vm1717_vm11, %v1719_v57, %v1715_v50 }
 0x407   :  { %v2550_v61 = vpop.eup %2549 }
 0x408   :  { %v1727_v14 = vmul.f32 %v2550_v61, %v1720_v6 }
 0x40a   :  { %2457 = vst [vmem:[%s4038_s4 + $0x20] sm:$0xff] %v1727_v14  ;;  %1817 = vmatmul.f32.vlgmr.msra.gmra.mxu0 %v1727_v14  ;;  %1837 = vmatmul.f32.vlgmr.msra.gmra.mxu1 %v1727_v14 }
 0x40b   :  { %1857 = vmatmul.f32.vlgmr.msra.gmra.mxu2 %v1727_v14  ;;  %1877 = vmatmul.f32.vlgmr.msra.gmra.mxu3 %v1727_v14 }
 0x40c   :  { %2241 = vmatpush.msra.mxu0 %v3252_v3  ;;  %2261 = vmatpush.msra.mxu1 %v3257_v2  ;;  %v4404_v2 = vld [vmem:[#allocation38_spill] sm:$0xff]  ;;  %v4405_v3 = vld [vmem:[#allocation39_spill] sm:$0xff] }
 0x40d   :  { %2281 = vmatpush.msra.mxu2 %v3262_v1  ;;  %2301 = vmatpush.msra.mxu3 %v3267_v0  ;;  %v4402_v0 = vld [vmem:[#allocation44_spill] sm:$0xff]  ;;  %v4403_v1 = vld [vmem:[#allocation45_spill] sm:$0xff] }
 0x40e   :  { %2242 = vmatpush.msra.mxu0 %v4193_v4  ;;  %2262 = vmatpush.msra.mxu1 %v4194_v5  ;;  %v4407_v4 = vld [vmem:[#allocation41_spill] sm:$0xff]  ;;  %v4408_v5 = vld [vmem:[#allocation34_spill] sm:$0xff] }
 0x40f   :  { %2282 = vmatpush.msra.mxu2 %v4195_v11  ;;  %2302 = vmatpush.msra.mxu3 %v3247_v7  ;;  %v4406_v7 = vld [vmem:[#allocation40_spill] sm:$0xff]  ;;  %v4409_v11 = vld [vmem:[#allocation35_spill] sm:$0xff] }
 0x410   :  { %2243 = vmatpush.msra.mxu0 %v4196_v15  ;;  %2263 = vmatpush.msra.mxu1 %v4197_v16  ;;  %v4410_v15 = vld [vmem:[#allocation36_spill] sm:$0xff]  ;;  %v4411_v16 = vld [vmem:[#allocation37_spill] sm:$0xff] }
 0x411   :  { %2283 = vmatpush.msra.mxu2 %v4198_v17  ;;  %2303 = vmatpush.msra.mxu3 %v4199_v18  ;;  %v4412_v17 = vld [vmem:[#allocation30_spill] sm:$0xff]  ;;  %v4413_v18 = vld [vmem:[#allocation31_spill] sm:$0xff] }
 0x412   :  { %2244 = vmatpush.msra.mxu0 %v4200_v19  ;;  %2264 = vmatpush.msra.mxu1 %v4201_v20  ;;  %v4414_v19 = vld [vmem:[#allocation32_spill] sm:$0xff]  ;;  %v4415_v20 = vld [vmem:[#allocation33_spill] sm:$0xff] }
 0x413   :  { %2284 = vmatpush.msra.mxu2 %v4202_v21  ;;  %2304 = vmatpush.msra.mxu3 %v4203_v22  ;;  %v4416_v21 = vld [vmem:[#allocation26_spill] sm:$0xff]  ;;  %v4417_v22 = vld [vmem:[#allocation27_spill] sm:$0xff] }
 0x414   :  { %2245 = vmatpush.msra.mxu0 %v4204_v23  ;;  %2265 = vmatpush.msra.mxu1 %v4205_v24  ;;  %v4418_v23 = vld [vmem:[#allocation28_spill] sm:$0xff]  ;;  %v4419_v24 = vld [vmem:[#allocation29_spill] sm:$0xff] }
 0x415   :  { %2285 = vmatpush.msra.mxu2 %v4206_v26  ;;  %2305 = vmatpush.msra.mxu3 %v4207_v27  ;;  %v4420_v26 = vld [vmem:[#allocation22_spill] sm:$0xff]  ;;  %v4421_v27 = vld [vmem:[#allocation23_spill] sm:$0xff] }
 0x416   :  { %2246 = vmatpush.msra.mxu0 %v4208_v28  ;;  %2266 = vmatpush.msra.mxu1 %v4209_v29  ;;  %v4422_v28 = vld [vmem:[#allocation24_spill] sm:$0xff]  ;;  %v4423_v29 = vld [vmem:[#allocation25_spill] sm:$0xff] }
 0x417   :  { %2286 = vmatpush.msra.mxu2 %v4210_v30  ;;  %2306 = vmatpush.msra.mxu3 %v4211_v31  ;;  %v4424_v30 = vld [vmem:[#allocation18_spill] sm:$0xff]  ;;  %v4425_v31 = vld [vmem:[#allocation19_spill] sm:$0xff] }
 0x418   :  { %2247 = vmatpush.msra.mxu0 %v4212_v32  ;;  %2267 = vmatpush.msra.mxu1 %v4213_v33  ;;  %v4426_v32 = vld [vmem:[#allocation20_spill] sm:$0xff]  ;;  %v4427_v33 = vld [vmem:[#allocation21_spill] sm:$0xff] }
 0x419   :  { %2287 = vmatpush.msra.mxu2 %v4214_v34  ;;  %2307 = vmatpush.msra.mxu3 %v4215_v35 }
 0x41a   :  { %2248 = vmatpush.msra.mxu0 %v4216_v36  ;;  %2268 = vmatpush.msra.mxu1 %v4217_v37  ;;  %v4428_v36 = vld [vmem:[#allocation62_spill] sm:$0xff] }
 0x41b   :  { %2288 = vmatpush.msra.mxu2 %v4218_v39  ;;  %2308 = vmatpush.msra.mxu3 %v4219_v40  ;;  %v4429_v39 = vld [vmem:[#allocation63_spill] sm:$0xff] }
 0x41c   :  { %2249 = vmatpush.msra.mxu0 %v4220_v41  ;;  %2269 = vmatpush.msra.mxu1 %v4221_v42 }
 0x41d   :  { %2289 = vmatpush.msra.mxu2 %v4222_v43  ;;  %2309 = vmatpush.msra.mxu3 %v4223_v44  ;;  %v4430_v44 = vld [vmem:[#allocation64_spill] sm:$0xff] }
 0x41e   :  { %2250 = vmatpush.msra.mxu0 %v4224_v45  ;;  %2270 = vmatpush.msra.mxu1 %v4225_v46 }
 0x41f   :  { %2290 = vmatpush.msra.mxu2 %v4402_v0  ;;  %2310 = vmatpush.msra.mxu3 %v4403_v1 }
 0x420   :  { %2251 = vmatpush.msra.mxu0 %v4404_v2  ;;  %2271 = vmatpush.msra.mxu1 %v4405_v3 }
 0x421   :  { %2291 = vmatpush.msra.mxu2 %v4406_v7  ;;  %2311 = vmatpush.msra.mxu3 %v4407_v4 }
 0x422   :  { %2252 = vmatpush.msra.mxu0 %v4408_v5  ;;  %2272 = vmatpush.msra.mxu1 %v4409_v11 }
 0x423   :  { %2292 = vmatpush.msra.mxu2 %v4410_v15  ;;  %2312 = vmatpush.msra.mxu3 %v4411_v16 }
 0x424   :  { %2253 = vmatpush.msra.mxu0 %v4412_v17  ;;  %2273 = vmatpush.msra.mxu1 %v4413_v18 }
 0x425   :  { %2293 = vmatpush.msra.mxu2 %v4414_v19  ;;  %2313 = vmatpush.msra.mxu3 %v4415_v20 }
 0x426   :  { %2254 = vmatpush.msra.mxu0 %v4416_v21  ;;  %2274 = vmatpush.msra.mxu1 %v4417_v22 }
 0x427   :  { %2294 = vmatpush.msra.mxu2 %v4418_v23  ;;  %2314 = vmatpush.msra.mxu3 %v4419_v24 }
 0x428   :  { %2255 = vmatpush.msra.mxu0 %v4420_v26  ;;  %2275 = vmatpush.msra.mxu1 %v4421_v27 }
 0x429   :  { %2295 = vmatpush.msra.mxu2 %v4422_v28  ;;  %2315 = vmatpush.msra.mxu3 %v4423_v29  ;;  %v4432_v29 = vld [vmem:[#allocation58_spill] sm:$0xff] }
 0x42a   :  { %2256 = vmatpush.msra.mxu0 %v4424_v30  ;;  %2276 = vmatpush.msra.mxu1 %v4425_v31  ;;  %v4433_v31 = vld [vmem:[#allocation59_spill] sm:$0xff] }
 0x42b   :  { %2296 = vmatpush.msra.mxu2 %v4426_v32  ;;  %2316 = vmatpush.msra.mxu3 %v4427_v33 }
 0x487   :  { %v1818_v34 = vpop.f32.mrf.mxu0  ;;  %v1838_v35 = vpop.f32.mrf.mxu1 }
 0x488   :  { %v1881_v37 = vadd.f32 %v1818_v34, %v4428_v36  ;;  %v1882_v40 = vadd.f32 %v1838_v35, %v4429_v39  ;;  %v4434_v36 = vld [vmem:[#allocation60_spill] sm:$0xff] }
 0x48a   :  { %v2458_v41 = vmul.f32 -1.442695, %v1881_v37  ;;  %v2459_v42 = vmul.f32 -1.442695, %v1882_v40 }
 0x48c   :  { %2551 = vpow2.f32 %v2458_v41 }
 0x48d   :  { %2553 = vpow2.f32 %v2459_v42 }
 0x48e   :  { %v1858_v43 = vpop.f32.mrf.mxu2  ;;  %v1878_v54 = vpop.f32.mrf.mxu3 }
 0x48f   :  { %v1883_v45 = vadd.f32 %v1858_v43, %v4430_v44  ;;  %v1884_v52 = vadd.f32 %v1878_v54, %v4431_v38 }
 0x491   :  { %v2460_v46 = vmul.f32 -1.442695, %v1883_v45 }
 0x492   :  { %v2552_v62 = vpop.eup %2551 }
 0x493   :  { %v2554_v13 = vpop.eup %2553  ;;  %v1894_v10 = vadd.f32 1.0, %v2552_v62  ;;  %2555 = vpow2.f32 %v2460_v46 }
 0x494   :  { %v1895_v58 = vadd.f32 1.0, %v2554_v13  ;;  %v4435_v13 = vld [vmem:[#allocation61_spill] sm:$0xff] }
 0x495   :  { %2557 = vrcp.f32 %v1894_v10  ;;  %v1908_v8 = vand.u32 2147483648, %v1894_v10  ;;  %v1906_v25 = vand.u32 2147483647, %v1894_v10  ;;  %vm1902_vm14 = vweird.f32 %v1894_v10 }
 0x496   :  { %2559 = vrcp.f32 %v1895_v58  ;;  %v1923_v60 = vand.u32 2147483648, %v1895_v58  ;;  %v1921_v50 = vand.u32 2147483647, %v1895_v58  ;;  %vm1917_vm15 = vweird.f32 %v1895_v58 }
 0x497   :  { %v1909_v14 = vor.u32 1.1754944e-38, %v1908_v8  ;;  %vm1907_vm2 = vcmp.eq.f32.partialorder %v1906_v25, 8.507059e+37 }
 0x498   :  { %v1924_v1 = vor.u32 1.1754944e-38, %v1923_v60  ;;  %vm1922_vm3 = vcmp.eq.f32.partialorder %v1921_v50, 8.507059e+37 }
 0x499   :  { %v2556_v51 = vpop.eup %2555 }
 0x49a   :  { %v1896_v48 = vadd.f32 1.0, %v2556_v51 }
 0x49b   :  { %v2558_v12 = vpop.eup %2557 }
 0x49c   :  { %v2560_v49 = vpop.eup %2559  ;;  %v1898_v56 = vmul.f32 %v2558_v12, %v1894_v10  ;;  %2561 = vrcp.f32 %v1896_v48  ;;  %vm1903_vm12 = vweird.f32 %v2558_v12  ;;  %v1938_v20 = vand.u32 2147483648, %v1896_v48 }
 0x49d   :  { %v1913_v53 = vmul.f32 %v2560_v49, %v1895_v58  ;;  %2563 = vtanh.f32 %v1884_v52  ;;  %vm1918_vm13 = vweird.f32 %v2560_v49  ;;  %vm1904_vm0 = vmor %vm1902_vm14, %vm1903_vm12  ;;  %vm1932_vm5 = vweird.f32 %v1896_v48 }
 0x49e   :  { %v1899_v59 = vsub.f32 1.0, %v1898_v56  ;;  %vm1919_vm1 = vmor %vm1917_vm15, %vm1918_vm13  ;;  %v1936_v21 = vand.u32 2147483647, %v1896_v48  ;;  %v1939_v23 = vor.u32 1.1754944e-38, %v1938_v20 }
 0x49f   :  { %v1914_v63 = vsub.f32 1.0, %v1913_v53 }
 0x4a0   :  { %v1900_v47 = vmul.f32 %v2558_v12, %v1899_v59  ;;  %vm1937_vm7 = vcmp.eq.f32.partialorder %v1936_v21, 8.507059e+37 }
 0x4a1   :  { %v1915_v9 = vmul.f32 %v2560_v49, %v1914_v63 }
 0x4a2   :  { %v2562_v57 = vpop.eup %2561  ;;  %v1901_v61 = vadd.f32 %v2558_v12, %v1900_v47 }
 0x4a3   :  { %v1928_v6 = vmul.f32 %v2562_v57, %v1896_v48  ;;  %v1916_v0 = vadd.f32 %v2560_v49, %v1915_v9  ;;  %v2564_v3 = vpop.eup %2563  ;;  %vm1933_vm4 = vweird.f32 %v2562_v57 }
 0x4a4   :  { %v1905_v2 = vsel %vm1904_vm0, %v2558_v12, %v1901_v61  ;;  %vm1934_vm6 = vmor %vm1932_vm5, %vm1933_vm4 }
 0x4a5   :  { %v1929_v7 = vsub.f32 1.0, %v1928_v6  ;;  %v1910_v4 = vsel %vm1907_vm2, %v1909_v14, %v1905_v2  ;;  %v1920_v5 = vsel %vm1919_vm1, %v2560_v49, %v1916_v0 }
 0x4a6   :  { %v1925_v11 = vsel %vm1922_vm3, %v1924_v1, %v1920_v5  ;;  %v1944_v15 = vmul.f32 %v2564_v3, %v1910_v4 }
 0x4a7   :  { %v1930_v16 = vmul.f32 %v2562_v57, %v1929_v7  ;;  %v1943_v17 = vmul.f32 %v1925_v11, %v3934_v55 }
 0x4a9   :  { %v4009_v18 = vadd.f32 %v1944_v15, %v1943_v17  ;;  %v1931_v19 = vadd.f32 %v2562_v57, %v1930_v16 }
 0x4ab   :  { %2565 = vtanh.f32 %v4009_v18  ;;  %v1935_v22 = vsel %vm1934_vm6, %v2562_v57, %v1931_v19 }
 0x4ac   :  { %v1940_v26 = vsel %vm1937_vm7, %v1939_v23, %v1935_v22  ;;  %v4436_v22 = vld [vmem:[#allocation54_spill] sm:$0xff] }
 0x4b1   :  { %v2566_v24 = vpop.eup %2565 }
 0x4b2   :  { %v1947_v27 = vmul.f32 %v2566_v24, %v1940_v26  ;;  %v4437_v24 = vld [vmem:[#allocation55_spill] sm:$0xff] }
 0x4b4   :  { %2461 = vst [vmem:[%s4038_s4 + $0x28] sm:$0xff] %v1947_v27  ;;  %2037 = vmatmul.f32.vlgmr.msrb.gmra.mxu0 %v1947_v27  ;;  %2057 = vmatmul.f32.vlgmr.msrb.gmra.mxu1 %v1947_v27 }
 0x4b5   :  { %2077 = vmatmul.f32.vlgmr.msrb.gmra.mxu2 %v1947_v27  ;;  %2097 = vmatmul.f32.vlgmr.msrb.gmra.mxu3 %v1947_v27 }
 0x531   :  { %v2038_v55 = vpop.f32.mrf.mxu0  ;;  %v2058_v28 = vpop.f32.mrf.mxu1 }
 0x532   :  { %v2101_v30 = vadd.f32 %v2038_v55, %v4432_v29  ;;  %v2102_v32 = vadd.f32 %v2058_v28, %v4433_v31  ;;  %v4438_v29 = vld [vmem:[#allocation56_spill] sm:$0xff] }
 0x534   :  { %v2462_v33 = vmul.f32 -1.442695, %v2101_v30  ;;  %v2463_v34 = vmul.f32 -1.442695, %v2102_v32 }
 0x536   :  { %2567 = vpow2.f32 %v2462_v33 }
 0x537   :  { %2569 = vpow2.f32 %v2463_v34 }
 0x538   :  { %v2078_v35 = vpop.f32.mrf.mxu2  ;;  %v2098_v44 = vpop.f32.mrf.mxu3 }
 0x539   :  { %v2103_v37 = vadd.f32 %v2078_v35, %v4434_v36  ;;  %v2104_v10 = vadd.f32 %v2098_v44, %v4435_v13 }
 0x53b   :  { %v2464_v39 = vmul.f32 -1.442695, %v2103_v37 }
 0x53c   :  { %v2568_v40 = vpop.eup %2567 }
 0x53d   :  { %v2570_v41 = vpop.eup %2569  ;;  %v2114_v42 = vadd.f32 1.0, %v2568_v40  ;;  %2571 = vpow2.f32 %v2464_v39 }
 0x53e   :  { %v2115_v43 = vadd.f32 1.0, %v2570_v41  ;;  %v4439_v41 = vld [vmem:[#allocation57_spill] sm:$0xff] }
 0x53f   :  { %2573 = vrcp.f32 %v2114_v42  ;;  %v2128_v38 = vand.u32 2147483648, %v2114_v42  ;;  %v2126_v56 = vand.u32 2147483647, %v2114_v42  ;;  %vm2122_vm10 = vweird.f32 %v2114_v42 }
 0x540   :  { %2575 = vrcp.f32 %v2115_v43  ;;  %v2143_v52 = vand.u32 2147483648, %v2115_v43  ;;  %v2141_v59 = vand.u32 2147483647, %v2115_v43  ;;  %vm2137_vm11 = vweird.f32 %v2115_v43 }
 0x541   :  { %v2129_v47 = vor.u32 1.1754944e-38, %v2128_v38  ;;  %vm2127_vm14 = vcmp.eq.f32.partialorder %v2126_v56, 8.507059e+37 }
 0x542   :  { %v2144_v9 = vor.u32 1.1754944e-38, %v2143_v52  ;;  %vm2142_vm15 = vcmp.eq.f32.partialorder %v2141_v59, 8.507059e+37 }
 0x543   :  { %v2572_v45 = vpop.eup %2571 }
 0x544   :  { %v2116_v46 = vadd.f32 1.0, %v2572_v45 }
 0x545   :  { %v2574_v62 = vpop.eup %2573 }
 0x546   :  { %v2576_v58 = vpop.eup %2575  ;;  %v2118_v54 = vmul.f32 %v2574_v62, %v2114_v42  ;;  %2577 = vrcp.f32 %v2116_v46  ;;  %vm2123_vm8 = vweird.f32 %v2574_v62  ;;  %v2158_v5 = vand.u32 2147483648, %v2116_v46 }
 0x547   :  { %v2133_v51 = vmul.f32 %v2576_v58, %v2115_v43  ;;  %2579 = vtanh.f32 %v2104_v10  ;;  %vm2138_vm9 = vweird.f32 %v2576_v58  ;;  %vm2124_vm12 = vmor %vm2122_vm10, %vm2123_vm8  ;;  %vm2152_vm1 = vweird.f32 %v2116_v46 }
 0x548   :  { %v2119_v48 = vsub.f32 1.0, %v2118_v54  ;;  %vm2139_vm13 = vmor %vm2137_vm11, %vm2138_vm9  ;;  %v2156_v11 = vand.u32 2147483647, %v2116_v46  ;;  %v2159_v16 = vor.u32 1.1754944e-38, %v2158_v5 }
 0x549   :  { %v2134_v12 = vsub.f32 1.0, %v2133_v51 }
 0x54a   :  { %v2120_v49 = vmul.f32 %v2574_v62, %v2119_v48  ;;  %vm2157_vm3 = vcmp.eq.f32.partialorder %v2156_v11, 8.507059e+37 }
 0x54b   :  { %v2135_v53 = vmul.f32 %v2576_v58, %v2134_v12 }
 0x54c   :  { %v2578_v63 = vpop.eup %2577  ;;  %v2121_v8 = vadd.f32 %v2574_v62, %v2120_v49 }
 0x54d   :  { %v2148_v60 = vmul.f32 %v2578_v63, %v2116_v46  ;;  %v2136_v25 = vadd.f32 %v2576_v58, %v2135_v53  ;;  %v2580_v57 = vpop.eup %2579  ;;  %vm2153_vm0 = vweird.f32 %v2578_v63 }
 0x54e   :  { %v2125_v50 = vsel %vm2124_vm12, %v2574_v62, %v2121_v8  ;;  %vm2154_vm2 = vmor %vm2152_vm1, %vm2153_vm0 }
 0x54f   :  { %v2149_v61 = vsub.f32 1.0, %v2148_v60  ;;  %v2130_v6 = vsel %vm2127_vm14, %v2129_v47, %v2125_v50  ;;  %v2140_v14 = vsel %vm2139_vm13, %v2576_v58, %v2136_v25 }
 0x550   :  { %v2145_v0 = vsel %vm2142_vm15, %v2144_v9, %v2140_v14  ;;  %v2164_v1 = vmul.f32 %v2580_v57, %v2130_v6 }
 0x551   :  { %v2150_v2 = vmul.f32 %v2578_v63, %v2149_v61  ;;  %v2163_v3 = vmul.f32 %v2145_v0, %v4009_v18 }
 0x553   :  { %v4020_v7 = vadd.f32 %v2164_v1, %v2163_v3  ;;  %v2151_v4 = vadd.f32 %v2578_v63, %v2150_v2 }
 0x555   :  { %2581 = vtanh.f32 %v4020_v7  ;;  %v2155_v15 = vsel %vm2154_vm2, %v2578_v63, %v2151_v4 }
 0x556   :  { %v2160_v19 = vsel %vm2157_vm3, %v2159_v16, %v2155_v15 }
 0x55b   :  { %v2582_v17 = vpop.eup %2581 }
 0x55c   :  { %v2167_v20 = vmul.f32 %v2582_v17, %v2160_v19 }
 0x55e   :  { %2465 = vst [vmem:[%s4038_s4 + $0x30] sm:$0xff] %v2167_v20  ;;  %2257 = vmatmul.f32.vlgmr.msra.gmra.mxu0 %v2167_v20  ;;  %2277 = vmatmul.f32.vlgmr.msra.gmra.mxu1 %v2167_v20 }
 0x55f   :  { %2297 = vmatmul.f32.vlgmr.msra.gmra.mxu2 %v2167_v20  ;;  %2317 = vmatmul.f32.vlgmr.msra.gmra.mxu3 %v2167_v20 }
 0x5db   :  { %v2258_v18 = vpop.f32.mrf.mxu0  ;;  %v2278_v21 = vpop.f32.mrf.mxu1 }
 0x5dc   :  { %v2321_v23 = vadd.f32 %v2258_v18, %v4436_v22  ;;  %v2322_v26 = vadd.f32 %v2278_v21, %v4437_v24 }
 0x5de   :  { %v2466_v27 = vmul.f32 -1.442695, %v2321_v23  ;;  %v2467_v55 = vmul.f32 -1.442695, %v2322_v26 }
 0x5e0   :  { %2583 = vpow2.f32 %v2466_v27 }
 0x5e1   :  { %2585 = vpow2.f32 %v2467_v55 }
 0x5e2   :  { %v2298_v28 = vpop.f32.mrf.mxu2  ;;  %v2318_v36 = vpop.f32.mrf.mxu3 }
 0x5e3   :  { %v2323_v30 = vadd.f32 %v2298_v28, %v4438_v29  ;;  %v2324_v42 = vadd.f32 %v2318_v36, %v4439_v41 }
 0x5e5   :  { %v2468_v31 = vmul.f32 -1.442695, %v2323_v30 }
 0x5e6   :  { %v2584_v32 = vpop.eup %2583 }
 0x5e7   :  { %v2586_v33 = vpop.eup %2585  ;;  %v2334_v34 = vadd.f32 1.0, %v2584_v32  ;;  %2587 = vpow2.f32 %v2468_v31 }
 0x5e8   :  { %v2335_v35 = vadd.f32 1.0, %v2586_v33 }
 0x5e9   :  { %2589 = vrcp.f32 %v2334_v34  ;;  %v2348_v13 = vand.u32 2147483648, %v2334_v34  ;;  %v2346_v54 = vand.u32 2147483647, %v2334_v34  ;;  %vm2342_vm6 = vweird.f32 %v2334_v34 }
 0x5ea   :  { %2591 = vrcp.f32 %v2335_v35  ;;  %v2363_v10 = vand.u32 2147483648, %v2335_v35  ;;  %v2361_v48 = vand.u32 2147483647, %v2335_v35  ;;  %vm2357_vm7 = vweird.f32 %v2335_v35 }
 0x5eb   :  { %v2349_v49 = vor.u32 1.1754944e-38, %v2348_v13  ;;  %vm2347_vm10 = vcmp.eq.f32.partialorder %v2346_v54, 8.507059e+37 }
 0x5ec   :  { %v2364_v53 = vor.u32 1.1754944e-38, %v2363_v10  ;;  %vm2362_vm11 = vcmp.eq.f32.partialorder %v2361_v48, 8.507059e+37 }
 0x5ed   :  { %v2588_v37 = vpop.eup %2587 }
 0x5ee   :  { %v2336_v39 = vadd.f32 1.0, %v2588_v37 }
 0x5ef   :  { %v2590_v40 = vpop.eup %2589 }
 0x5f0   :  { %v2592_v43 = vpop.eup %2591  ;;  %v2338_v44 = vmul.f32 %v2590_v40, %v2334_v34  ;;  %2593 = vrcp.f32 %v2336_v39  ;;  %vm2343_vm4 = vweird.f32 %v2590_v40  ;;  %v2378_v14 = vand.u32 2147483648, %v2336_v39 }
 0x5f1   :  { %v2353_v45 = vmul.f32 %v2592_v43, %v2335_v35  ;;  %2595 = vtanh.f32 %v2324_v42  ;;  %vm2358_vm5 = vweird.f32 %v2592_v43  ;;  %vm2344_vm8 = vmor %vm2342_vm6, %vm2343_vm4  ;;  %vm2372_vm13 = vweird.f32 %v2336_v39 }
 0x5f2   :  { %v2339_v46 = vsub.f32 1.0, %v2338_v44  ;;  %vm2359_vm9 = vmor %vm2357_vm7, %vm2358_vm5  ;;  %v2376_v0 = vand.u32 2147483647, %v2336_v39  ;;  %v2379_v2 = vor.u32 1.1754944e-38, %v2378_v14 }
 0x5f3   :  { %v2354_v62 = vsub.f32 1.0, %v2353_v45 }
 0x5f4   :  { %v2340_v58 = vmul.f32 %v2590_v40, %v2339_v46  ;;  %vm2377_vm15 = vcmp.eq.f32.partialorder %v2376_v0, 8.507059e+37 }
 0x5f5   :  { %v2355_v51 = vmul.f32 %v2592_v43, %v2354_v62 }
 0x5f6   :  { %v2594_v12 = vpop.eup %2593  ;;  %v2341_v38 = vadd.f32 %v2590_v40, %v2340_v58 }
 0x5f7   :  { %v2368_v52 = vmul.f32 %v2594_v12, %v2336_v39  ;;  %v2356_v56 = vadd.f32 %v2592_v43, %v2355_v51  ;;  %v2596_v63 = vpop.eup %2595  ;;  %vm2373_vm12 = vweird.f32 %v2594_v12 }
 0x5f8   :  { %v2345_v59 = vsel %vm2344_vm8, %v2590_v40, %v2341_v38  ;;  %vm2374_vm14 = vmor %vm2372_vm13, %vm2373_vm12 }
 0x5f9   :  { %v2369_v8 = vsub.f32 1.0, %v2368_v52  ;;  %v2350_v60 = vsel %vm2347_vm10, %v2349_v49, %v2345_v59  ;;  %v2360_v47 = vsel %vm2359_vm9, %v2592_v43, %v2356_v56 }
 0x5fa   :  { %v2365_v25 = vsel %vm2362_vm11, %v2364_v53, %v2360_v47  ;;  %v2384_v9 = vmul.f32 %v2596_v63, %v2350_v60 }
 0x5fb   :  { %v2370_v50 = vmul.f32 %v2594_v12, %v2369_v8  ;;  %v2383_v57 = vmul.f32 %v2365_v25, %v4020_v7 }
 0x5fd   :  { %v2385_v61 = vadd.f32 %v2384_v9, %v2383_v57  ;;  %v2371_v6 = vadd.f32 %v2594_v12, %v2370_v50 }
 0x5ff   :  { %2597 = vtanh.f32 %v2385_v61  ;;  %v2375_v1 = vsel %vm2374_vm14, %v2594_v12, %v2371_v6 }
 0x600   :  { %v2380_v4 = vsel %vm2377_vm15, %v2379_v2, %v2375_v1 }
 0x605   :  { %v2598_v3 = vpop.eup %2597 }
 0x606   :  { %v2387_v5 = vmul.f32 %v2598_v3, %v2380_v4 }
 0x608   :  { %2469 = vst [vmem:[%s4038_s4 + $0x38] sm:$0xff] %v2387_v5 }

// kernel: _lstm_forward_impl.2
= control target key start
LH: loop header
LB: loop body
LE: loop exit
PB: predicated region body
PF: predicated region fallthrough
CT: control target
= control target key end

     0   :  { %s3619_s0 = inlined_call_operand.vmem [shape: f32[64,16], index: 0, kind: input, shape index: {}]   ;;  %s3620_s1 = inlined_call_operand.vmem [shape: f32[16,512], index: 1, kind: input, shape index: {}]   ;;  %s3621_s2 = inlined_call_operand.vmem [shape: f32[128,512], index: 2, kind: input, shape index: {}]   ;;  %s3622_s3 = inlined_call_operand.vmem [shape: f32[1,512], index: 3, kind: input, shape index: {}]   ;;  %s3623_s4 = inlined_call_operand.vmem [shape: f32[64,128], index: 4, kind: output, shape index: {}]  }
   0x1   :  { %v2521_v0 = vld [vmem:[%s3620_s1] sm:$0xff]  ;;  %v2526_v1 = vld [vmem:[%s3620_s1 + $0x8] sm:$0xff]  ;;  %v2531_v2 = vld [vmem:[%s3620_s1 + $0x10] sm:$0xff] }
   0x2   :  { %v2536_v3 = vld [vmem:[%s3620_s1 + $0x18] sm:$0xff]  ;;  %v2541_v4 = vld [vmem:[%s3620_s1 + $0x20] sm:$0xff]  ;;  %v2546_v5 = vld [vmem:[%s3620_s1 + $0x28] sm:$0xff] }
   0x3   :  { %v2551_v6 = vld [vmem:[%s3620_s1 + $0x30] sm:$0xff]  ;;  %v2556_v7 = vld [vmem:[%s3620_s1 + $0x38] sm:$0xff] }
   0x4   :  { %84 = vsyncadd [#allocation7], 1024 }
   0x5   :  { %2488 = dma.done.wait [#allocation7], 1024 }
   0x6   :  { %2489 = vsyncadd [#allocation7], 4294966272 }
   0x7   :  { %v2561_v8 = vld [vmem:[%s3621_s2] sm:$0xff]  ;;  %v2566_v9 = vld [vmem:[%s3621_s2 + $0x8] sm:$0xff]  ;;  %v2571_v10 = vld [vmem:[%s3621_s2 + $0x10] sm:$0xff] }
   0x8   :  { %3676 = vst [vmem:[#allocation13_spill] sm:$0xff] %v2561_v8  ;;  %v2576_v11 = vld [vmem:[%s3621_s2 + $0x18] sm:$0xff]  ;;  %v2581_v12 = vld [vmem:[%s3621_s2 + $0x20] sm:$0xff]  ;;  %v2586_v13 = vld [vmem:[%s3621_s2 + $0x28] sm:$0xff] }
   0x9   :  { %3677 = vst [vmem:[#allocation14_spill] sm:$0xff] %v2566_v9  ;;  %v2591_v14 = vld [vmem:[%s3621_s2 + $0x30] sm:$0xff]  ;;  %v2596_v15 = vld [vmem:[%s3621_s2 + $0x38] sm:$0xff]  ;;  %v2601_v16 = vld [vmem:[%s3621_s2 + $0x40] sm:$0xff] }
   0xa   :  { %3678 = vst [vmem:[#allocation15_spill] sm:$0xff] %v2571_v10  ;;  %v2606_v17 = vld [vmem:[%s3621_s2 + $0x48] sm:$0xff]  ;;  %v2611_v18 = vld [vmem:[%s3621_s2 + $0x50] sm:$0xff]  ;;  %v2616_v19 = vld [vmem:[%s3621_s2 + $0x58] sm:$0xff] }
   0xb   :  { %3679 = vst [vmem:[#allocation16_spill] sm:$0xff] %v2576_v11  ;;  %v2621_v20 = vld [vmem:[%s3621_s2 + $0x60] sm:$0xff]  ;;  %v2626_v21 = vld [vmem:[%s3621_s2 + $0x68] sm:$0xff]  ;;  %v2631_v22 = vld [vmem:[%s3621_s2 + $0x70] sm:$0xff] }
   0xc   :  { %3680 = vst [vmem:[#allocation17_spill] sm:$0xff] %v2581_v12  ;;  %v2636_v23 = vld [vmem:[%s3621_s2 + $0x78] sm:$0xff]  ;;  %v2641_v24 = vld [vmem:[%s3621_s2 + $0x80] sm:$0xff]  ;;  %v2646_v25 = vld [vmem:[%s3621_s2 + $0x88] sm:$0xff] }
   0xd   :  { %3681 = vst [vmem:[#allocation18_spill] sm:$0xff] %v2586_v13  ;;  %v2651_v26 = vld [vmem:[%s3621_s2 + $0x90] sm:$0xff]  ;;  %v2656_v27 = vld [vmem:[%s3621_s2 + $0x98] sm:$0xff]  ;;  %v2661_v28 = vld [vmem:[%s3621_s2 + $0xa0] sm:$0xff] }
   0xe   :  { %3682 = vst [vmem:[#allocation19_spill] sm:$0xff] %v2591_v14  ;;  %v2666_v29 = vld [vmem:[%s3621_s2 + $0xa8] sm:$0xff]  ;;  %v2671_v30 = vld [vmem:[%s3621_s2 + $0xb0] sm:$0xff]  ;;  %v2676_v31 = vld [vmem:[%s3621_s2 + $0xb8] sm:$0xff] }
   0xf   :  { %3683 = vst [vmem:[#allocation20_spill] sm:$0xff] %v2596_v15  ;;  %v2681_v32 = vld [vmem:[%s3621_s2 + $0xc0] sm:$0xff]  ;;  %v2686_v33 = vld [vmem:[%s3621_s2 + $0xc8] sm:$0xff]  ;;  %v2691_v34 = vld [vmem:[%s3621_s2 + $0xd0] sm:$0xff] }
  0x10   :  { %3684 = vst [vmem:[#allocation21_spill] sm:$0xff] %v2601_v16  ;;  %v2696_v35 = vld [vmem:[%s3621_s2 + $0xd8] sm:$0xff]  ;;  %v2701_v36 = vld [vmem:[%s3621_s2 + $0xe0] sm:$0xff]  ;;  %v2706_v37 = vld [vmem:[%s3621_s2 + $0xe8] sm:$0xff] }
  0x11   :  { %3685 = vst [vmem:[#allocation22_spill] sm:$0xff] %v2606_v17  ;;  %v2711_v38 = vld [vmem:[%s3621_s2 + $0xf0] sm:$0xff]  ;;  %v2716_v39 = vld [vmem:[%s3621_s2 + $0xf8] sm:$0xff]  ;;  %v2721_v40 = vld [vmem:[%s3621_s2 + $0x100] sm:$0xff] }
  0x12   :  { %3686 = vst [vmem:[#allocation23_spill] sm:$0xff] %v2611_v18  ;;  %v2726_v41 = vld [vmem:[%s3621_s2 + $0x108] sm:$0xff]  ;;  %v2731_v42 = vld [vmem:[%s3621_s2 + $0x110] sm:$0xff]  ;;  %v2736_v43 = vld [vmem:[%s3621_s2 + $0x118] sm:$0xff] }
  0x13   :  { %3687 = vst [vmem:[#allocation24_spill] sm:$0xff] %v2616_v19  ;;  %v2741_v44 = vld [vmem:[%s3621_s2 + $0x120] sm:$0xff]  ;;  %v2746_v45 = vld [vmem:[%s3621_s2 + $0x128] sm:$0xff]  ;;  %v2751_v46 = vld [vmem:[%s3621_s2 + $0x130] sm:$0xff] }
  0x14   :  { %3688 = vst [vmem:[#allocation25_spill] sm:$0xff] %v2621_v20  ;;  %v2756_v47 = vld [vmem:[%s3621_s2 + $0x138] sm:$0xff]  ;;  %v2761_v48 = vld [vmem:[%s3621_s2 + $0x140] sm:$0xff]  ;;  %v2766_v49 = vld [vmem:[%s3621_s2 + $0x148] sm:$0xff] }
  0x15   :  { %3689 = vst [vmem:[#allocation26_spill] sm:$0xff] %v2626_v21  ;;  %v2771_v50 = vld [vmem:[%s3621_s2 + $0x150] sm:$0xff]  ;;  %v2776_v51 = vld [vmem:[%s3621_s2 + $0x158] sm:$0xff]  ;;  %v2781_v52 = vld [vmem:[%s3621_s2 + $0x160] sm:$0xff] }
  0x16   :  { %3690 = vst [vmem:[#allocation27_spill] sm:$0xff] %v2631_v22  ;;  %v2786_v53 = vld [vmem:[%s3621_s2 + $0x168] sm:$0xff]  ;;  %v2791_v54 = vld [vmem:[%s3621_s2 + $0x170] sm:$0xff]  ;;  %v2796_v55 = vld [vmem:[%s3621_s2 + $0x178] sm:$0xff] }
  0x17   :  { %3691 = vst [vmem:[#allocation28_spill] sm:$0xff] %v2636_v23  ;;  %v2801_v56 = vld [vmem:[%s3621_s2 + $0x180] sm:$0xff]  ;;  %v2806_v57 = vld [vmem:[%s3621_s2 + $0x188] sm:$0xff]  ;;  %v2811_v58 = vld [vmem:[%s3621_s2 + $0x190] sm:$0xff] }
  0x18   :  { %3692 = vst [vmem:[#allocation29_spill] sm:$0xff] %v2641_v24  ;;  %v2816_v59 = vld [vmem:[%s3621_s2 + $0x198] sm:$0xff]  ;;  %v2821_v60 = vld [vmem:[%s3621_s2 + $0x1a0] sm:$0xff]  ;;  %v2826_v61 = vld [vmem:[%s3621_s2 + $0x1a8] sm:$0xff] }
  0x19   :  { %3693 = vst [vmem:[#allocation30_spill] sm:$0xff] %v2646_v25  ;;  %v2831_v62 = vld [vmem:[%s3621_s2 + $0x1b0] sm:$0xff]  ;;  %v2836_v63 = vld [vmem:[%s3621_s2 + $0x1b8] sm:$0xff]  ;;  %v2841_v11 = vld [vmem:[%s3621_s2 + $0x1c0] sm:$0xff] }
  0x1a   :  { %3694 = vst [vmem:[#allocation31_spill] sm:$0xff] %v2651_v26  ;;  %v2846_v10 = vld [vmem:[%s3621_s2 + $0x1c8] sm:$0xff]  ;;  %v2851_v9 = vld [vmem:[%s3621_s2 + $0x1d0] sm:$0xff]  ;;  %v2856_v8 = vld [vmem:[%s3621_s2 + $0x1d8] sm:$0xff] }
  0x1b   :  { %3695 = vst [vmem:[#allocation32_spill] sm:$0xff] %v2656_v27  ;;  %v2861_v15 = vld [vmem:[%s3621_s2 + $0x1e0] sm:$0xff]  ;;  %v2866_v14 = vld [vmem:[%s3621_s2 + $0x1e8] sm:$0xff]  ;;  %v2871_v13 = vld [vmem:[%s3621_s2 + $0x1f0] sm:$0xff] }
  0x1c   :  { %3696 = vst [vmem:[#allocation33_spill] sm:$0xff] %v2661_v28  ;;  %v2876_v12 = vld [vmem:[%s3621_s2 + $0x1f8] sm:$0xff] }
  0x1d   :  { %3697 = vst [vmem:[#allocation34_spill] sm:$0xff] %v2666_v29 }
  0x1e   :  { %3698 = vst [vmem:[#allocation35_spill] sm:$0xff] %v2671_v30 }
  0x1f   :  { %3699 = vst [vmem:[#allocation36_spill] sm:$0xff] %v2676_v31 }
  0x20   :  { %3700 = vst [vmem:[#allocation37_spill] sm:$0xff] %v2691_v34 }
  0x21   :  { %3701 = vst [vmem:[#allocation38_spill] sm:$0xff] %v2696_v35 }
  0x22   :  { %232 = vsyncadd [#allocation9], 8192 }
  0x23   :  { %2490 = dma.done.wait [#allocation9], 8192 }
  0x24   :  { %2491 = vsyncadd [#allocation9], 4294959104  ;;  %304 = vmatpush.msra.mxu0 %v2541_v4  ;;  %345 = vmatpush.msra.mxu1 %v2546_v5  ;;  %v239_v19 = vld [vmem:[%s3619_s0] sm:$0xff]  ;;  %vm265_vm0 = vcmask 130048   ;;  %v244_v4 = vld [vmem:[%s3619_s0 + $0x28] sm:$0xff] }
  0x25   :  { %386 = vmatpush.msra.mxu2 %v2551_v6  ;;  %427 = vmatpush.msra.mxu3 %v2556_v7  ;;  %v3702_v5 = vld [vmem:[#allocation24_spill] sm:$0xff]  ;;  %v3703_v6 = vld [vmem:[#allocation17_spill] sm:$0xff]  ;;  %v3704_v7 = vld [vmem:[#allocation18_spill] sm:$0xff] }
  0x26   :  { %305 = vmatpush.msra.mxu0 %v2521_v0  ;;  %346 = vmatpush.msra.mxu1 %v2526_v1  ;;  %v240_v0 = vld [vmem:[%s3619_s0 + $0x8] sm:$0xff]  ;;  %v241_v1 = vld [vmem:[%s3619_s0 + $0x10] sm:$0xff] }
  0x27   :  { %387 = vmatpush.msra.mxu2 %v2531_v2  ;;  %428 = vmatpush.msra.mxu3 %v2536_v3  ;;  %v242_v2 = vld [vmem:[%s3619_s0 + $0x18] sm:$0xff]  ;;  %v243_v3 = vld [vmem:[%s3619_s0 + $0x20] sm:$0xff] }
  0x28   :  { %2296 = vmatmul.msk.f32.vlgmr.msra.gmra.mxu0 %vm265_vm0, %v239_v19  ;;  %2304 = vmatmul.msk.f32.vlgmr.msra.gmra.mxu1 %vm265_vm0, %v239_v19 }
  0x29   :  { %2312 = vmatmul.msk.f32.vlgmr.msra.gmra.mxu2 %vm265_vm0, %v239_v19  ;;  %2320 = vmatmul.msk.f32.vlgmr.msra.gmra.mxu3 %vm265_vm0, %v239_v19  ;;  %v3705_v19 = vld [vmem:[#allocation19_spill] sm:$0xff] }
  0x2a   :  { %559 = vmatpush.msrb.mxu0 %v2861_v15  ;;  %579 = vmatpush.msrb.mxu1 %v2866_v14 }
  0x2b   :  { %599 = vmatpush.msrb.mxu2 %v2871_v13  ;;  %619 = vmatpush.msrb.mxu3 %v2876_v12 }
  0x2c   :  { %560 = vmatpush.msrb.mxu0 %v2841_v11  ;;  %580 = vmatpush.msrb.mxu1 %v2846_v10 }
  0x2d   :  { %600 = vmatpush.msrb.mxu2 %v2851_v9  ;;  %620 = vmatpush.msrb.mxu3 %v2856_v8 }
  0x2e   :  { %561 = vmatpush.msrb.mxu0 %v2821_v60  ;;  %581 = vmatpush.msrb.mxu1 %v2826_v61 }
  0x2f   :  { %601 = vmatpush.msrb.mxu2 %v2831_v62  ;;  %621 = vmatpush.msrb.mxu3 %v2836_v63 }
  0x30   :  { %2297 = vmatmul.msk.f32.gmra.mxu0 %vm265_vm0, %v240_v0  ;;  %2305 = vmatmul.msk.f32.gmra.mxu1 %vm265_vm0, %v240_v0 }
  0x31   :  { %2313 = vmatmul.msk.f32.gmra.mxu2 %vm265_vm0, %v240_v0  ;;  %2321 = vmatmul.msk.f32.gmra.mxu3 %vm265_vm0, %v240_v0  ;;  %v3706_v0 = vld [vmem:[#allocation20_spill] sm:$0xff] }
  0x32   :  { %562 = vmatpush.msrb.mxu0 %v2801_v56  ;;  %582 = vmatpush.msrb.mxu1 %v2806_v57 }
  0x33   :  { %602 = vmatpush.msrb.mxu2 %v2811_v58  ;;  %622 = vmatpush.msrb.mxu3 %v2816_v59 }
  0x34   :  { %563 = vmatpush.msrb.mxu0 %v2781_v52  ;;  %583 = vmatpush.msrb.mxu1 %v2786_v53 }
  0x35   :  { %603 = vmatpush.msrb.mxu2 %v2791_v54  ;;  %623 = vmatpush.msrb.mxu3 %v2796_v55 }
  0x36   :  { %564 = vmatpush.msrb.mxu0 %v2761_v48  ;;  %584 = vmatpush.msrb.mxu1 %v2766_v49 }
  0x37   :  { %604 = vmatpush.msrb.mxu2 %v2771_v50  ;;  %624 = vmatpush.msrb.mxu3 %v2776_v51 }
  0x38   :  { %2298 = vmatmul.msk.f32.gmra.mxu0 %vm265_vm0, %v241_v1  ;;  %2306 = vmatmul.msk.f32.gmra.mxu1 %vm265_vm0, %v241_v1 }
  0x39   :  { %2314 = vmatmul.msk.f32.gmra.mxu2 %vm265_vm0, %v241_v1  ;;  %2322 = vmatmul.msk.f32.gmra.mxu3 %vm265_vm0, %v241_v1  ;;  %v3707_v1 = vld [vmem:[#allocation13_spill] sm:$0xff] }
  0x3a   :  { %565 = vmatpush.msrb.mxu0 %v2741_v44  ;;  %585 = vmatpush.msrb.mxu1 %v2746_v45 }
  0x3b   :  { %605 = vmatpush.msrb.mxu2 %v2751_v46  ;;  %625 = vmatpush.msrb.mxu3 %v2756_v47 }
  0x3c   :  { %566 = vmatpush.msrb.mxu0 %v2721_v40  ;;  %586 = vmatpush.msrb.mxu1 %v2726_v41 }
  0x3d   :  { %606 = vmatpush.msrb.mxu2 %v2731_v42  ;;  %626 = vmatpush.msrb.mxu3 %v2736_v43 }
  0x3e   :  { %567 = vmatpush.msrb.mxu0 %v2701_v36  ;;  %587 = vmatpush.msrb.mxu1 %v2706_v37 }
  0x3f   :  { %607 = vmatpush.msrb.mxu2 %v2711_v38  ;;  %627 = vmatpush.msrb.mxu3 %v2716_v39 }
  0x40   :  { %2299 = vmatmul.msk.f32.gmra.mxu0 %vm265_vm0, %v242_v2  ;;  %2307 = vmatmul.msk.f32.gmra.mxu1 %vm265_vm0, %v242_v2 }
  0x41   :  { %2315 = vmatmul.msk.f32.gmra.mxu2 %vm265_vm0, %v242_v2  ;;  %2323 = vmatmul.msk.f32.gmra.mxu3 %vm265_vm0, %v242_v2  ;;  %v3708_v2 = vld [vmem:[#allocation14_spill] sm:$0xff] }
  0x42   :  { %568 = vmatpush.msrb.mxu0 %v2681_v32  ;;  %588 = vmatpush.msrb.mxu1 %v2686_v33 }
  0x43   :  { %608 = vmatpush.msrb.mxu2 %v2691_v34  ;;  %628 = vmatpush.msrb.mxu3 %v2696_v35 }
  0x44   :  { %569 = vmatpush.msrb.mxu0 %v2661_v28  ;;  %589 = vmatpush.msrb.mxu1 %v2666_v29 }
  0x45   :  { %609 = vmatpush.msrb.mxu2 %v2671_v30  ;;  %629 = vmatpush.msrb.mxu3 %v2676_v31 }
  0x46   :  { %570 = vmatpush.msrb.mxu0 %v2641_v24  ;;  %590 = vmatpush.msrb.mxu1 %v2646_v25 }
  0x47   :  { %610 = vmatpush.msrb.mxu2 %v2651_v26  ;;  %630 = vmatpush.msrb.mxu3 %v2656_v27 }
  0x48   :  { %2300 = vmatmul.msk.f32.gmra.mxu0 %vm265_vm0, %v243_v3  ;;  %2308 = vmatmul.msk.f32.gmra.mxu1 %vm265_vm0, %v243_v3 }
  0x49   :  { %2316 = vmatmul.msk.f32.gmra.mxu2 %vm265_vm0, %v243_v3  ;;  %2324 = vmatmul.msk.f32.gmra.mxu3 %vm265_vm0, %v243_v3  ;;  %v3709_v3 = vld [vmem:[#allocation15_spill] sm:$0xff] }
  0x4a   :  { %571 = vmatpush.msrb.mxu0 %v2621_v20  ;;  %591 = vmatpush.msrb.mxu1 %v2626_v21 }
  0x4b   :  { %611 = vmatpush.msrb.mxu2 %v2631_v22  ;;  %631 = vmatpush.msrb.mxu3 %v2636_v23 }
  0x4c   :  { %572 = vmatpush.msrb.mxu0 %v2601_v16  ;;  %592 = vmatpush.msrb.mxu1 %v2606_v17 }
  0x4d   :  { %612 = vmatpush.msrb.mxu2 %v2611_v18  ;;  %632 = vmatpush.msrb.mxu3 %v3702_v5 }
  0x4e   :  { %573 = vmatpush.msrb.mxu0 %v3703_v6  ;;  %593 = vmatpush.msrb.mxu1 %v3704_v7  ;;  %v3710_v6 = vld [vmem:[#allocation16_spill] sm:$0xff] }
  0x4f   :  { %613 = vmatpush.msrb.mxu2 %v3705_v19  ;;  %633 = vmatpush.msrb.mxu3 %v3706_v0  ;;  %v245_v0 = vld [vmem:[%s3619_s0 + $0x30] sm:$0xff] }
  0x50   :  { %2301 = vmatmul.msk.f32.gmra.mxu0 %vm265_vm0, %v244_v4  ;;  %2309 = vmatmul.msk.f32.gmra.mxu1 %vm265_vm0, %v244_v4 }
  0x51   :  { %2317 = vmatmul.msk.f32.gmra.mxu2 %vm265_vm0, %v244_v4  ;;  %2325 = vmatmul.msk.f32.gmra.mxu3 %vm265_vm0, %v244_v4  ;;  %v246_v4 = vld [vmem:[%s3619_s0 + $0x38] sm:$0xff] }
  0x52   :  { %574 = vmatpush.msrb.mxu0 %v3707_v1  ;;  %594 = vmatpush.msrb.mxu1 %v3708_v2 }
  0x53   :  { %614 = vmatpush.msrb.mxu2 %v3709_v3  ;;  %634 = vmatpush.msrb.mxu3 %v3710_v6 }
  0x54   :  { %778 = vmatpush.msra.mxu0 %v2861_v15  ;;  %798 = vmatpush.msra.mxu1 %v2866_v14 }
  0x55   :  { %818 = vmatpush.msra.mxu2 %v2871_v13  ;;  %838 = vmatpush.msra.mxu3 %v2876_v12 }
  0x56   :  { %779 = vmatpush.msra.mxu0 %v2841_v11  ;;  %799 = vmatpush.msra.mxu1 %v2846_v10 }
  0x57   :  { %819 = vmatpush.msra.mxu2 %v2851_v9  ;;  %839 = vmatpush.msra.mxu3 %v2856_v8 }
  0x58   :  { %2302 = vmatmul.msk.f32.gmra.mxu0 %vm265_vm0, %v245_v0  ;;  %2310 = vmatmul.msk.f32.gmra.mxu1 %vm265_vm0, %v245_v0 }
  0x59   :  { %2318 = vmatmul.msk.f32.gmra.mxu2 %vm265_vm0, %v245_v0  ;;  %2326 = vmatmul.msk.f32.gmra.mxu3 %vm265_vm0, %v245_v0  ;;  %v2492_v0 = vmov 0.0  }
  0x5a   :  { %780 = vmatpush.msra.mxu0 %v2821_v60  ;;  %800 = vmatpush.msra.mxu1 %v2826_v61 }
  0x5b   :  { %820 = vmatpush.msra.mxu2 %v2831_v62  ;;  %840 = vmatpush.msra.mxu3 %v2836_v63 }
  0x5c   :  { %781 = vmatpush.msra.mxu0 %v2801_v56  ;;  %801 = vmatpush.msra.mxu1 %v2806_v57 }
  0x5d   :  { %821 = vmatpush.msra.mxu2 %v2811_v58  ;;  %841 = vmatpush.msra.mxu3 %v2816_v59 }
  0x5e   :  { %782 = vmatpush.msra.mxu0 %v2781_v52  ;;  %802 = vmatpush.msra.mxu1 %v2786_v53 }
  0x5f   :  { %822 = vmatpush.msra.mxu2 %v2791_v54  ;;  %842 = vmatpush.msra.mxu3 %v2796_v55 }
  0x60   :  { %2303 = vmatmul.msk.f32.gmra.mxu0 %vm265_vm0, %v246_v4  ;;  %2311 = vmatmul.msk.f32.gmra.mxu1 %vm265_vm0, %v246_v4 }
  0x61   :  { %2319 = vmatmul.msk.f32.gmra.mxu2 %vm265_vm0, %v246_v4  ;;  %2327 = vmatmul.msk.f32.gmra.mxu3 %vm265_vm0, %v246_v4  ;;  %v3711_v4 = vld [vmem:[#allocation17_spill] sm:$0xff] }
  0x62   :  { %783 = vmatpush.msra.mxu0 %v2761_v48  ;;  %803 = vmatpush.msra.mxu1 %v2766_v49 }
  0x63   :  { %823 = vmatpush.msra.mxu2 %v2771_v50  ;;  %843 = vmatpush.msra.mxu3 %v2776_v51 }
  0x64   :  { %784 = vmatpush.msra.mxu0 %v2741_v44  ;;  %804 = vmatpush.msra.mxu1 %v2746_v45 }
  0x65   :  { %824 = vmatpush.msra.mxu2 %v2751_v46  ;;  %844 = vmatpush.msra.mxu3 %v2756_v47 }
  0x66   :  { %785 = vmatpush.msra.mxu0 %v2721_v40  ;;  %805 = vmatpush.msra.mxu1 %v2726_v41 }
  0x67   :  { %825 = vmatpush.msra.mxu2 %v2731_v42  ;;  %845 = vmatpush.msra.mxu3 %v2736_v43 }
  0x68   :  { %575 = vmatmul.f32.vlgmr.msrb.gmra.mxu0 %v2492_v0  ;;  %595 = vmatmul.f32.vlgmr.msrb.gmra.mxu1 %v2492_v0 }
  0x69   :  { %615 = vmatmul.f32.vlgmr.msrb.gmra.mxu2 %v2492_v0  ;;  %635 = vmatmul.f32.vlgmr.msrb.gmra.mxu3 %v2492_v0  ;;  %v3712_v0 = vld [vmem:[#allocation20_spill] sm:$0xff] }
  0x6a   :  { %786 = vmatpush.msra.mxu0 %v2701_v36  ;;  %806 = vmatpush.msra.mxu1 %v2706_v37 }
  0x6b   :  { %826 = vmatpush.msra.mxu2 %v2711_v38  ;;  %846 = vmatpush.msra.mxu3 %v2716_v39 }
  0x6c   :  { %787 = vmatpush.msra.mxu0 %v2681_v32  ;;  %807 = vmatpush.msra.mxu1 %v2686_v33 }
  0x6d   :  { %827 = vmatpush.msra.mxu2 %v2691_v34  ;;  %847 = vmatpush.msra.mxu3 %v2696_v35 }
  0x6e   :  { %788 = vmatpush.msra.mxu0 %v2661_v28  ;;  %808 = vmatpush.msra.mxu1 %v2666_v29 }
  0x6f   :  { %828 = vmatpush.msra.mxu2 %v2671_v30  ;;  %848 = vmatpush.msra.mxu3 %v2676_v31 }
  0x70   :  { %789 = vmatpush.msra.mxu0 %v2641_v24  ;;  %809 = vmatpush.msra.mxu1 %v2646_v25 }
  0x71   :  { %829 = vmatpush.msra.mxu2 %v2651_v26  ;;  %849 = vmatpush.msra.mxu3 %v2656_v27 }
  0x72   :  { %790 = vmatpush.msra.mxu0 %v2621_v20  ;;  %810 = vmatpush.msra.mxu1 %v2626_v21 }
  0x73   :  { %830 = vmatpush.msra.mxu2 %v2631_v22  ;;  %850 = vmatpush.msra.mxu3 %v2636_v23 }
  0x74   :  { %791 = vmatpush.msra.mxu0 %v2601_v16  ;;  %811 = vmatpush.msra.mxu1 %v2606_v17 }
  0x75   :  { %831 = vmatpush.msra.mxu2 %v2611_v18  ;;  %851 = vmatpush.msra.mxu3 %v3702_v5 }
  0x76   :  { %792 = vmatpush.msra.mxu0 %v3711_v4  ;;  %812 = vmatpush.msra.mxu1 %v3704_v7 }
  0x77   :  { %832 = vmatpush.msra.mxu2 %v3705_v19  ;;  %852 = vmatpush.msra.mxu3 %v3712_v0 }
  0x78   :  { %793 = vmatpush.msra.mxu0 %v3707_v1  ;;  %813 = vmatpush.msra.mxu1 %v3708_v2 }
  0x79   :  { %833 = vmatpush.msra.mxu2 %v3709_v3  ;;  %853 = vmatpush.msra.mxu3 %v3710_v6 }
  0x7a   :  { %998 = vmatpush.msrb.mxu0 %v2861_v15  ;;  %1018 = vmatpush.msrb.mxu1 %v2866_v14 }
  0x7b   :  { %1038 = vmatpush.msrb.mxu2 %v2871_v13  ;;  %1058 = vmatpush.msrb.mxu3 %v2876_v12 }
  0x7c   :  { %999 = vmatpush.msrb.mxu0 %v2841_v11  ;;  %1019 = vmatpush.msrb.mxu1 %v2846_v10 }
  0x7d   :  { %1039 = vmatpush.msrb.mxu2 %v2851_v9  ;;  %1059 = vmatpush.msrb.mxu3 %v2856_v8 }
  0x7e   :  { %1000 = vmatpush.msrb.mxu0 %v2821_v60  ;;  %1020 = vmatpush.msrb.mxu1 %v2826_v61 }
  0x7f   :  { %1040 = vmatpush.msrb.mxu2 %v2831_v62  ;;  %1060 = vmatpush.msrb.mxu3 %v2836_v63 }
  0x80   :  { %1001 = vmatpush.msrb.mxu0 %v2801_v56  ;;  %1021 = vmatpush.msrb.mxu1 %v2806_v57 }
  0x81   :  { %1041 = vmatpush.msrb.mxu2 %v2811_v58  ;;  %1061 = vmatpush.msrb.mxu3 %v2816_v59 }
  0x82   :  { %1002 = vmatpush.msrb.mxu0 %v2781_v52  ;;  %1022 = vmatpush.msrb.mxu1 %v2786_v53 }
  0x83   :  { %1042 = vmatpush.msrb.mxu2 %v2791_v54  ;;  %1062 = vmatpush.msrb.mxu3 %v2796_v55 }
  0x84   :  { %1003 = vmatpush.msrb.mxu0 %v2761_v48  ;;  %1023 = vmatpush.msrb.mxu1 %v2766_v49 }
  0x85   :  { %1043 = vmatpush.msrb.mxu2 %v2771_v50  ;;  %1063 = vmatpush.msrb.mxu3 %v2776_v51 }
  0x86   :  { %1004 = vmatpush.msrb.mxu0 %v2741_v44  ;;  %1024 = vmatpush.msrb.mxu1 %v2746_v45 }
  0x87   :  { %1044 = vmatpush.msrb.mxu2 %v2751_v46  ;;  %1064 = vmatpush.msrb.mxu3 %v2756_v47 }
  0x88   :  { %1005 = vmatpush.msrb.mxu0 %v2721_v40  ;;  %1025 = vmatpush.msrb.mxu1 %v2726_v41 }
  0x89   :  { %1045 = vmatpush.msrb.mxu2 %v2731_v42  ;;  %1065 = vmatpush.msrb.mxu3 %v2736_v43 }
  0x8a   :  { %1006 = vmatpush.msrb.mxu0 %v2701_v36  ;;  %1026 = vmatpush.msrb.mxu1 %v2706_v37 }
  0x8b   :  { %1046 = vmatpush.msrb.mxu2 %v2711_v38  ;;  %1066 = vmatpush.msrb.mxu3 %v2716_v39 }
  0x8c   :  { %1007 = vmatpush.msrb.mxu0 %v2681_v32  ;;  %1027 = vmatpush.msrb.mxu1 %v2686_v33 }
  0x8d   :  { %1047 = vmatpush.msrb.mxu2 %v2691_v34  ;;  %1067 = vmatpush.msrb.mxu3 %v2696_v35 }
  0x8e   :  { %1008 = vmatpush.msrb.mxu0 %v2661_v28  ;;  %1028 = vmatpush.msrb.mxu1 %v2666_v29 }
  0x8f   :  { %1048 = vmatpush.msrb.mxu2 %v2671_v30  ;;  %1068 = vmatpush.msrb.mxu3 %v2676_v31 }
  0x90   :  { %1009 = vmatpush.msrb.mxu0 %v2641_v24  ;;  %1029 = vmatpush.msrb.mxu1 %v2646_v25 }
  0x91   :  { %1049 = vmatpush.msrb.mxu2 %v2651_v26  ;;  %1069 = vmatpush.msrb.mxu3 %v2656_v27 }
  0x92   :  { %1010 = vmatpush.msrb.mxu0 %v2621_v20  ;;  %1030 = vmatpush.msrb.mxu1 %v2626_v21 }
  0x93   :  { %1050 = vmatpush.msrb.mxu2 %v2631_v22  ;;  %1070 = vmatpush.msrb.mxu3 %v2636_v23 }
  0x94   :  { %1011 = vmatpush.msrb.mxu0 %v2601_v16  ;;  %1031 = vmatpush.msrb.mxu1 %v2606_v17 }
  0x95   :  { %1051 = vmatpush.msrb.mxu2 %v2611_v18  ;;  %1071 = vmatpush.msrb.mxu3 %v3702_v5 }
  0x96   :  { %1012 = vmatpush.msrb.mxu0 %v3711_v4  ;;  %1032 = vmatpush.msrb.mxu1 %v3704_v7  ;;  %v255_v4 = vld [vmem:[%s3622_s3] sm:$0xf] }
  0x97   :  { %1052 = vmatpush.msrb.mxu2 %v3705_v19  ;;  %1072 = vmatpush.msrb.mxu3 %v3712_v0  ;;  %v257_v5 = vperm.slane %v255_v4, 0  ;;  %v258_v7 = vperm.slane %v255_v4, 1 }
  0x98   :  { %1013 = vmatpush.msrb.mxu0 %v3707_v1  ;;  %1033 = vmatpush.msrb.mxu1 %v3708_v2 }
  0x99   :  { %1053 = vmatpush.msrb.mxu2 %v3709_v3  ;;  %1073 = vmatpush.msrb.mxu3 %v3710_v6  ;;  %v3145_v3 = vperm.slane %v255_v4, 2  ;;  %v3147_v6 = vperm.slane %v255_v4, 3 }
  0xa5   :  { %v307_v17 = vpop.f32.mrf.mxu0  ;;  %v348_v18 = vpop.f32.mrf.mxu1 }
  0xac   :  { %v3137_v16 = vpop.f32.mrf.mxu2  ;;  %v3139_v19 = vpop.f32.mrf.mxu3 }
  0xad   :  { %v310_v0 = vpop.f32.mrf.mxu0  ;;  %v351_v1 = vpop.f32.mrf.mxu1 }
  0xae   :  { %v3141_v23 = vadd.f32 %v310_v0, %v257_v5  ;;  %v3143_v2 = vadd.f32 %v351_v1, %v258_v7 }
  0xb0   :  { %3713 = vst [vmem:[#allocation39_spill] sm:$0xff] %v3141_v23 }
  0xb1   :  { %3714 = vst [vmem:[#allocation40_spill] sm:$0xff] %v3143_v2 }
  0xb4   :  { %v392_v22 = vpop.f32.mrf.mxu2  ;;  %v433_v21 = vpop.f32.mrf.mxu3 }
  0xb5   :  { %v3150_v20 = vadd.f32 %v392_v22, %v3145_v3  ;;  %v3153_v27 = vadd.f32 %v433_v21, %v3147_v6  ;;  %v313_v26 = vpop.f32.mrf.mxu0  ;;  %v354_v25 = vpop.f32.mrf.mxu1 }
  0xb6   :  { %v3155_v24 = vadd.f32 %v313_v26, %v257_v5  ;;  %v3157_v0 = vadd.f32 %v354_v25, %v258_v7 }
  0xb7   :  { %3715 = vst [vmem:[#allocation41_spill] sm:$0xff] %v3150_v20 }
  0xb8   :  { %3716 = vst [vmem:[#allocation42_spill] sm:$0xff] %v3153_v27 }
  0xb9   :  { %3717 = vst [vmem:[#allocation43_spill] sm:$0xff] %v3155_v24 }
  0xba   :  { %3718 = vst [vmem:[#allocation44_spill] sm:$0xff] %v3157_v0 }
  0xbc   :  { %v395_v1 = vpop.f32.mrf.mxu2  ;;  %v436_v2 = vpop.f32.mrf.mxu3 }
  0xbd   :  { %v3160_v23 = vadd.f32 %v395_v1, %v3145_v3  ;;  %v3163_v4 = vadd.f32 %v436_v2, %v3147_v6  ;;  %v316_v31 = vpop.f32.mrf.mxu0  ;;  %v357_v22 = vpop.f32.mrf.mxu1 }
  0xbe   :  { %v3165_v20 = vadd.f32 %v316_v31, %v257_v5  ;;  %v3167_v21 = vadd.f32 %v357_v22, %v258_v7 }
  0xbf   :  { %3719 = vst [vmem:[#allocation45_spill] sm:$0xff] %v3160_v23 }
  0xc0   :  { %3720 = vst [vmem:[#allocation46_spill] sm:$0xff] %v3163_v4 }
  0xc1   :  { %3721 = vst [vmem:[#allocation47_spill] sm:$0xff] %v3165_v20 }
  0xc2   :  { %3722 = vst [vmem:[#allocation48_spill] sm:$0xff] %v3167_v21 }
  0xc4   :  { %v398_v27 = vpop.f32.mrf.mxu2  ;;  %v439_v30 = vpop.f32.mrf.mxu3 }
  0xc5   :  { %v3170_v26 = vadd.f32 %v398_v27, %v3145_v3  ;;  %v3173_v25 = vadd.f32 %v439_v30, %v3147_v6  ;;  %v319_v0 = vpop.f32.mrf.mxu0  ;;  %v360_v1 = vpop.f32.mrf.mxu1 }
  0xc6   :  { %v3175_v23 = vadd.f32 %v319_v0, %v257_v5  ;;  %v3177_v2 = vadd.f32 %v360_v1, %v258_v7 }
  0xc7   :  { %3723 = vst [vmem:[#allocation49_spill] sm:$0xff] %v3170_v26 }
  0xc8   :  { %3724 = vst [vmem:[#allocation50_spill] sm:$0xff] %v3173_v25 }
  0xc9   :  { %3725 = vst [vmem:[#allocation51_spill] sm:$0xff] %v3175_v23 }
  0xca   :  { %3726 = vst [vmem:[#allocation52_spill] sm:$0xff] %v3177_v2 }
  0xcc   :  { %v401_v4 = vpop.f32.mrf.mxu2  ;;  %v442_v24 = vpop.f32.mrf.mxu3 }
  0xcd   :  { %v3180_v31 = vadd.f32 %v401_v4, %v3145_v3  ;;  %v3183_v22 = vadd.f32 %v442_v24, %v3147_v6  ;;  %v322_v21 = vpop.f32.mrf.mxu0  ;;  %v363_v27 = vpop.f32.mrf.mxu1 }
  0xce   :  { %v3185_v26 = vadd.f32 %v322_v21, %v257_v5  ;;  %v3187_v30 = vadd.f32 %v363_v27, %v258_v7 }
  0xcf   :  { %3727 = vst [vmem:[#allocation53_spill] sm:$0xff] %v3180_v31 }
  0xd0   :  { %3728 = vst [vmem:[#allocation54_spill] sm:$0xff] %v3183_v22 }
  0xd1   :  { %3729 = vst [vmem:[#allocation55_spill] sm:$0xff] %v3185_v26  ;;  %v349_v26 = vadd.f32 %v348_v18, %v258_v7 }
  0xd2   :  { %3730 = vst [vmem:[#allocation56_spill] sm:$0xff] %v3187_v30 }
  0xd4   :  { %v404_v25 = vpop.f32.mrf.mxu2  ;;  %v445_v20 = vpop.f32.mrf.mxu3 }
  0xd5   :  { %v3190_v0 = vadd.f32 %v404_v25, %v3145_v3  ;;  %v3193_v1 = vadd.f32 %v445_v20, %v3147_v6  ;;  %v325_v2 = vpop.f32.mrf.mxu0  ;;  %v366_v4 = vpop.f32.mrf.mxu1 }
  0xd6   :  { %v3195_v31 = vadd.f32 %v325_v2, %v257_v5  ;;  %v3197_v24 = vadd.f32 %v366_v4, %v258_v7 }
  0xd7   :  { %3731 = vst [vmem:[#allocation57_spill] sm:$0xff] %v3190_v0 }
  0xd8   :  { %3732 = vst [vmem:[#allocation58_spill] sm:$0xff] %v3193_v1  ;;  %v308_v1 = vadd.f32 %v307_v17, %v257_v5 }
  0xd9   :  { %3733 = vst [vmem:[#allocation59_spill] sm:$0xff] %v3195_v31 }
  0xda   :  { %3734 = vst [vmem:[#allocation60_spill] sm:$0xff] %v3197_v24 }
  0xdc   :  { %v407_v22 = vpop.f32.mrf.mxu2  ;;  %v448_v23 = vpop.f32.mrf.mxu3 }
  0xdd   :  { %v3200_v21 = vadd.f32 %v407_v22, %v3145_v3  ;;  %v3203_v27 = vadd.f32 %v448_v23, %v3147_v6  ;;  %v328_v30 = vpop.f32.mrf.mxu0  ;;  %v369_v25 = vpop.f32.mrf.mxu1 }
  0xde   :  { %v3205_v0 = vadd.f32 %v328_v30, %v257_v5  ;;  %v3207_v20 = vadd.f32 %v369_v25, %v258_v7  ;;  %v390_v30 = vadd.f32 %v3137_v16, %v3145_v3 }
  0xdf   :  { %3735 = vst [vmem:[#allocation61_spill] sm:$0xff] %v3200_v21 }
  0xe0   :  { %3736 = vst [vmem:[#allocation62_spill] sm:$0xff] %v3203_v27 }
  0xe1   :  { %3737 = vst [vmem:[#allocation63_spill] sm:$0xff] %v3205_v0 }
  0xe2   :  { %3738 = vst [vmem:[#allocation64_spill] sm:$0xff] %v3207_v20 }
  0xe4   :  { %v410_v2 = vpop.f32.mrf.mxu2  ;;  %v451_v31 = vpop.f32.mrf.mxu3 }
  0xe5   :  { %v3210_v4 = vadd.f32 %v410_v2, %v3145_v3  ;;  %v3213_v24 = vadd.f32 %v451_v31, %v3147_v6  ;;  %v576_v22 = vpop.f32.mrf.mxu0  ;;  %v596_v21 = vpop.f32.mrf.mxu1 }
  0xe6   :  { %v639_v23 = vadd.f32 %v576_v22, %v308_v1  ;;  %v640_v27 = vadd.f32 %v596_v21, %v349_v26  ;;  %v431_v26 = vadd.f32 %v3139_v19, %v3147_v6 }
  0xe7   :  { %3739 = vst [vmem:[#allocation65_spill] sm:$0xff] %v3210_v4 }
  0xe8   :  { %3740 = vst [vmem:[#allocation66_spill] sm:$0xff] %v3213_v24  ;;  %v2328_v29 = vmul.f32 -1.442695, %v639_v23  ;;  %v2329_v28 = vmul.f32 -1.442695, %v640_v27 }
  0xea   :  { %2360 = vpow2.f32 %v2328_v29 }
  0xeb   :  { %2362 = vpow2.f32 %v2329_v28 }
  0xec   :  { %v616_v17 = vpop.f32.mrf.mxu2  ;;  %v636_v24 = vpop.f32.mrf.mxu3 }
  0xed   :  { %v641_v18 = vadd.f32 %v616_v17, %v390_v30  ;;  %v642_v27 = vadd.f32 %v636_v24, %v431_v26 }
  0xef   :  { %v2330_v5 = vmul.f32 -1.442695, %v641_v18 }
  0xf0   :  { %v2361_v7 = vpop.eup %2360 }
  0xf1   :  { %v2363_v25 = vpop.eup %2362  ;;  %v652_v2 = vadd.f32 1.0, %v2361_v7  ;;  %2364 = vpow2.f32 %v2330_v5 }
  0xf2   :  { %v653_v31 = vadd.f32 1.0, %v2363_v25 }
  0xf3   :  { %2366 = vrcp.f32 %v652_v2  ;;  %v666_v30 = vand.u32 2147483648, %v652_v2  ;;  %v664_v5 = vand.u32 2147483647, %v652_v2  ;;  %vm660_vm3 = vweird.f32 %v652_v2 }
  0xf4   :  { %2368 = vrcp.f32 %v653_v31  ;;  %v681_v17 = vand.u32 2147483648, %v653_v31  ;;  %v679_v25 = vand.u32 2147483647, %v653_v31  ;;  %vm675_vm4 = vweird.f32 %v653_v31 }
  0xf5   :  { %v667_v24 = vor.u32 1.1754944e-38, %v666_v30  ;;  %vm665_vm6 = vcmp.eq.f32.partialorder %v664_v5, 8.507059e+37 }
  0xf6   :  { %v682_v26 = vor.u32 1.1754944e-38, %v681_v17  ;;  %vm680_vm8 = vcmp.eq.f32.partialorder %v679_v25, 8.507059e+37  ;;  %v3747_v25 = vld [vmem:[#allocation29_spill] sm:$0xff] }
  0xf7   :  { %v2365_v1 = vpop.eup %2364 }
  0xf8   :  { %v654_v29 = vadd.f32 1.0, %v2365_v1 }
  0xf9   :  { %v2367_v21 = vpop.eup %2366 }
  0xfa   :  { %v2369_v16 = vpop.eup %2368  ;;  %v656_v28 = vmul.f32 %v2367_v21, %v652_v2  ;;  %2370 = vrcp.f32 %v654_v29  ;;  %vm661_vm1 = vweird.f32 %v2367_v21  ;;  %vm690_vm10 = vweird.f32 %v654_v29 }
  0xfb   :  { %v671_v3 = vmul.f32 %v2369_v16, %v653_v31  ;;  %2372 = vtanh.f32 %v642_v27  ;;  %vm676_vm2 = vweird.f32 %v2369_v16  ;;  %vm662_vm5 = vmor %vm660_vm3, %vm661_vm1  ;;  %v696_v31 = vand.u32 2147483648, %v654_v29 }
  0xfc   :  { %v657_v22 = vsub.f32 1.0, %v656_v28  ;;  %vm677_vm7 = vmor %vm675_vm4, %vm676_vm2 }
  0xfd   :  { %v672_v23 = vsub.f32 1.0, %v671_v3  ;;  %v697_v17 = vor.u32 1.1754944e-38, %v696_v31  ;;  %v3759_v31 = vld [vmem:[#allocation17_spill] sm:$0xff] }
  0xfe   :  { %v658_v18 = vmul.f32 %v2367_v21, %v657_v22 }
  0xff   :  { %v673_v7 = vmul.f32 %v2369_v16, %v672_v23 }
 0x100   :  { %v2371_v4 = vpop.eup %2370  ;;  %v659_v6 = vadd.f32 %v2367_v21, %v658_v18 }
 0x101   :  { %v686_v19 = vmul.f32 %v2371_v4, %v654_v29  ;;  %v674_v1 = vadd.f32 %v2369_v16, %v673_v7  ;;  %v2373_v27 = vpop.eup %2372  ;;  %vm691_vm9 = vweird.f32 %v2371_v4 }
 0x102   :  { %v663_v28 = vsel %vm662_vm5, %v2367_v21, %v659_v6  ;;  %v694_v21 = vand.u32 2147483647, %v654_v29  ;;  %vm692_vm11 = vmor %vm690_vm10, %vm691_vm9  ;;  %v3746_v29 = vld [vmem:[#allocation36_spill] sm:$0xff]  ;;  %v3748_v6 = vld [vmem:[#allocation30_spill] sm:$0xff] }
 0x103   :  { %v687_v3 = vsub.f32 1.0, %v686_v19  ;;  %v668_v22 = vsel %vm665_vm6, %v667_v24, %v663_v28  ;;  %v678_v20 = vsel %vm677_vm7, %v2369_v16, %v674_v1  ;;  %v3749_v19 = vld [vmem:[#allocation31_spill] sm:$0xff]  ;;  %v3750_v24 = vld [vmem:[#allocation32_spill] sm:$0xff]  ;;  %v3751_v1 = vld [vmem:[#allocation25_spill] sm:$0xff] }
 0x104   :  { %v683_v23 = vsel %vm680_vm8, %v682_v26, %v678_v20  ;;  %v702_v0 = vmul.f32 %v2373_v27, %v668_v22  ;;  %vm695_vm12 = vcmp.eq.f32.partialorder %v694_v21, 8.507059e+37  ;;  %v3744_v20 = vld [vmem:[#allocation34_spill] sm:$0xff]  ;;  %v3753_v28 = vld [vmem:[#allocation27_spill] sm:$0xff]  ;;  %v3754_v27 = vld [vmem:[#allocation28_spill] sm:$0xff] }
 0x105   :  { %v688_v35 = vmul.f32 %v2371_v4, %v687_v3  ;;  %v701_v34 = vmul.f32 0.0, %v683_v23  ;;  %v3752_v26 = vld [vmem:[#allocation26_spill] sm:$0xff]  ;;  %v3755_v3 = vld [vmem:[#allocation21_spill] sm:$0xff]  ;;  %v3757_v23 = vld [vmem:[#allocation23_spill] sm:$0xff] }
 0x106   :  { %v3756_v22 = vld [vmem:[#allocation22_spill] sm:$0xff] }
 0x107   :  { %v3219_v18 = vadd.f32 %v702_v0, %v701_v34  ;;  %v689_v2 = vadd.f32 %v2371_v4, %v688_v35  ;;  %v3741_v34 = vld [vmem:[#allocation37_spill] sm:$0xff]  ;;  %v3742_v35 = vld [vmem:[#allocation38_spill] sm:$0xff] }
 0x108   :  { %v3743_v0 = vld [vmem:[#allocation33_spill] sm:$0xff]  ;;  %v3760_v21 = vld [vmem:[#allocation18_spill] sm:$0xff] }
 0x109   :  { %2374 = vtanh.f32 %v3219_v18  ;;  %v693_v30 = vsel %vm692_vm11, %v2371_v4, %v689_v2  ;;  %v3745_v4 = vld [vmem:[#allocation35_spill] sm:$0xff]  ;;  %v3758_v2 = vld [vmem:[#allocation24_spill] sm:$0xff] }
 0x10a   :  { %v698_v16 = vsel %vm695_vm12, %v697_v17, %v693_v30  ;;  %v3761_v30 = vld [vmem:[#allocation19_spill] sm:$0xff]  ;;  %v3762_v17 = vld [vmem:[#allocation20_spill] sm:$0xff] }
 0x10f   :  { %v2375_v5 = vpop.eup %2374 }
 0x110   :  { %v705_v7 = vmul.f32 %v2375_v5, %v698_v16  ;;  %v3763_v5 = vld [vmem:[#allocation13_spill] sm:$0xff]  ;;  %v3764_v16 = vld [vmem:[#allocation14_spill] sm:$0xff] }
 0x112   :  { %706 = vst [vmem:[%s3623_s4] sm:$0xff] %v705_v7  ;;  %794 = vmatmul.f32.vlgmr.msra.gmra.mxu0 %v705_v7  ;;  %814 = vmatmul.f32.vlgmr.msra.gmra.mxu1 %v705_v7 }
 0x113   :  { %834 = vmatmul.f32.vlgmr.msra.gmra.mxu2 %v705_v7  ;;  %854 = vmatmul.f32.vlgmr.msra.gmra.mxu3 %v705_v7  ;;  %v3765_v7 = vld [vmem:[#allocation15_spill] sm:$0xff] }
 0x114   :  { %1218 = vmatpush.msra.mxu0 %v2861_v15  ;;  %1238 = vmatpush.msra.mxu1 %v2866_v14 }
 0x115   :  { %1258 = vmatpush.msra.mxu2 %v2871_v13  ;;  %1278 = vmatpush.msra.mxu3 %v2876_v12 }
 0x116   :  { %1219 = vmatpush.msra.mxu0 %v2841_v11  ;;  %1239 = vmatpush.msra.mxu1 %v2846_v10 }
 0x117   :  { %1259 = vmatpush.msra.mxu2 %v2851_v9  ;;  %1279 = vmatpush.msra.mxu3 %v2856_v8 }
 0x118   :  { %1220 = vmatpush.msra.mxu0 %v2821_v60  ;;  %1240 = vmatpush.msra.mxu1 %v2826_v61 }
 0x119   :  { %1260 = vmatpush.msra.mxu2 %v2831_v62  ;;  %1280 = vmatpush.msra.mxu3 %v2836_v63 }
 0x11a   :  { %1221 = vmatpush.msra.mxu0 %v2801_v56  ;;  %1241 = vmatpush.msra.mxu1 %v2806_v57 }
 0x11b   :  { %1261 = vmatpush.msra.mxu2 %v2811_v58  ;;  %1281 = vmatpush.msra.mxu3 %v2816_v59 }
 0x11c   :  { %1222 = vmatpush.msra.mxu0 %v2781_v52  ;;  %1242 = vmatpush.msra.mxu1 %v2786_v53 }
 0x11d   :  { %1262 = vmatpush.msra.mxu2 %v2791_v54  ;;  %1282 = vmatpush.msra.mxu3 %v2796_v55 }
 0x11e   :  { %1223 = vmatpush.msra.mxu0 %v2761_v48  ;;  %1243 = vmatpush.msra.mxu1 %v2766_v49 }
 0x11f   :  { %1263 = vmatpush.msra.mxu2 %v2771_v50  ;;  %1283 = vmatpush.msra.mxu3 %v2776_v51 }
 0x120   :  { %1224 = vmatpush.msra.mxu0 %v2741_v44  ;;  %1244 = vmatpush.msra.mxu1 %v2746_v45 }
 0x121   :  { %1264 = vmatpush.msra.mxu2 %v2751_v46  ;;  %1284 = vmatpush.msra.mxu3 %v2756_v47 }
 0x122   :  { %1225 = vmatpush.msra.mxu0 %v2721_v40  ;;  %1245 = vmatpush.msra.mxu1 %v2726_v41 }
 0x123   :  { %1265 = vmatpush.msra.mxu2 %v2731_v42  ;;  %1285 = vmatpush.msra.mxu3 %v2736_v43 }
 0x124   :  { %1226 = vmatpush.msra.mxu0 %v2701_v36  ;;  %1246 = vmatpush.msra.mxu1 %v2706_v37 }
 0x125   :  { %1266 = vmatpush.msra.mxu2 %v2711_v38  ;;  %1286 = vmatpush.msra.mxu3 %v2716_v39 }
 0x126   :  { %1227 = vmatpush.msra.mxu0 %v2681_v32  ;;  %1247 = vmatpush.msra.mxu1 %v2686_v33 }
 0x127   :  { %1267 = vmatpush.msra.mxu2 %v3741_v34  ;;  %1287 = vmatpush.msra.mxu3 %v3742_v35 }
 0x128   :  { %1228 = vmatpush.msra.mxu0 %v3743_v0  ;;  %1248 = vmatpush.msra.mxu1 %v3744_v20 }
 0x129   :  { %1268 = vmatpush.msra.mxu2 %v3745_v4  ;;  %1288 = vmatpush.msra.mxu3 %v3746_v29 }
 0x12a   :  { %1229 = vmatpush.msra.mxu0 %v3747_v25  ;;  %1249 = vmatpush.msra.mxu1 %v3748_v6 }
 0x12b   :  { %1269 = vmatpush.msra.mxu2 %v3749_v19  ;;  %1289 = vmatpush.msra.mxu3 %v3750_v24 }
 0x12c   :  { %1230 = vmatpush.msra.mxu0 %v3751_v1  ;;  %1250 = vmatpush.msra.mxu1 %v3752_v26 }
 0x12d   :  { %1270 = vmatpush.msra.mxu2 %v3753_v28  ;;  %1290 = vmatpush.msra.mxu3 %v3754_v27  ;;  %v3767_v27 = vld [vmem:[#allocation39_spill] sm:$0xff]  ;;  %v3768_v28 = vld [vmem:[#allocation40_spill] sm:$0xff] }
 0x12e   :  { %1231 = vmatpush.msra.mxu0 %v3755_v3  ;;  %1251 = vmatpush.msra.mxu1 %v3756_v22  ;;  %v3766_v3 = vld [vmem:[#allocation16_spill] sm:$0xff] }
 0x12f   :  { %1271 = vmatpush.msra.mxu2 %v3757_v23  ;;  %1291 = vmatpush.msra.mxu3 %v3758_v2 }
 0x130   :  { %1232 = vmatpush.msra.mxu0 %v3759_v31  ;;  %1252 = vmatpush.msra.mxu1 %v3760_v21 }
 0x131   :  { %1272 = vmatpush.msra.mxu2 %v3761_v30  ;;  %1292 = vmatpush.msra.mxu3 %v3762_v17  ;;  %v3769_v17 = vld [vmem:[#allocation41_spill] sm:$0xff] }
 0x132   :  { %1233 = vmatpush.msra.mxu0 %v3763_v5  ;;  %1253 = vmatpush.msra.mxu1 %v3764_v16 }
 0x133   :  { %1273 = vmatpush.msra.mxu2 %v3765_v7  ;;  %1293 = vmatpush.msra.mxu3 %v3766_v3 }
 0x18f   :  { %v795_v22 = vpop.f32.mrf.mxu0  ;;  %v815_v23 = vpop.f32.mrf.mxu1 }
 0x190   :  { %v858_v2 = vadd.f32 %v795_v22, %v3767_v27  ;;  %v859_v31 = vadd.f32 %v815_v23, %v3768_v28  ;;  %v3770_v28 = vld [vmem:[#allocation42_spill] sm:$0xff] }
 0x192   :  { %v2331_v26 = vmul.f32 -1.442695, %v858_v2  ;;  %v2332_v21 = vmul.f32 -1.442695, %v859_v31 }
 0x194   :  { %2376 = vpow2.f32 %v2331_v26 }
 0x195   :  { %2378 = vpow2.f32 %v2332_v21 }
 0x196   :  { %v835_v30 = vpop.f32.mrf.mxu2  ;;  %v855_v3 = vpop.f32.mrf.mxu3 }
 0x197   :  { %v860_v1 = vadd.f32 %v835_v30, %v3769_v17  ;;  %v861_v23 = vadd.f32 %v855_v3, %v3770_v28 }
 0x199   :  { %v2333_v5 = vmul.f32 -1.442695, %v860_v1 }
 0x19a   :  { %v2377_v24 = vpop.eup %2376 }
 0x19b   :  { %v2379_v16 = vpop.eup %2378  ;;  %v871_v19 = vadd.f32 1.0, %v2377_v24  ;;  %2380 = vpow2.f32 %v2333_v5 }
 0x19c   :  { %v872_v7 = vadd.f32 1.0, %v2379_v16 }
 0x19d   :  { %2382 = vrcp.f32 %v871_v19  ;;  %v885_v1 = vand.u32 2147483648, %v871_v19  ;;  %v883_v5 = vand.u32 2147483647, %v871_v19  ;;  %vm879_vm15 = vweird.f32 %v871_v19 }
 0x19e   :  { %2384 = vrcp.f32 %v872_v7  ;;  %v900_v17 = vand.u32 2147483648, %v872_v7  ;;  %v898_v25 = vand.u32 2147483647, %v872_v7  ;;  %vm894_vm0 = vweird.f32 %v872_v7 }
 0x19f   :  { %v886_v28 = vor.u32 1.1754944e-38, %v885_v1  ;;  %vm884_vm3 = vcmp.eq.f32.partialorder %v883_v5, 8.507059e+37 }
 0x1a0   :  { %vm899_vm4 = vcmp.eq.f32.partialorder %v898_v25, 8.507059e+37 }
 0x1a1   :  { %v2381_v6 = vpop.eup %2380 }
 0x1a2   :  { %v873_v27 = vadd.f32 1.0, %v2381_v6 }
 0x1a3   :  { %v2383_v22 = vpop.eup %2382 }
 0x1a4   :  { %v2385_v2 = vpop.eup %2384  ;;  %v875_v26 = vmul.f32 %v2383_v22, %v871_v19  ;;  %2386 = vrcp.f32 %v873_v27  ;;  %vm880_vm13 = vweird.f32 %v2383_v22  ;;  %v915_v1 = vand.u32 2147483648, %v873_v27 }
 0x1a5   :  { %v890_v31 = vmul.f32 %v2385_v2, %v872_v7  ;;  %2388 = vtanh.f32 %v861_v23  ;;  %vm895_vm14 = vweird.f32 %v2385_v2  ;;  %vm881_vm1 = vmor %vm879_vm15, %vm880_vm13  ;;  %vm909_vm6 = vweird.f32 %v873_v27 }
 0x1a6   :  { %v876_v21 = vsub.f32 1.0, %v875_v26  ;;  %vm896_vm2 = vmor %vm894_vm0, %vm895_vm14  ;;  %v901_v26 = vor.u32 1.1754944e-38, %v900_v17  ;;  %v916_v5 = vor.u32 1.1754944e-38, %v915_v1  ;;  %v3789_v1 = vld [vmem:[#allocation17_spill] sm:$0xff] }
 0x1a7   :  { %v891_v30 = vsub.f32 1.0, %v890_v31 }
 0x1a8   :  { %v877_v24 = vmul.f32 %v2383_v22, %v876_v21 }
 0x1a9   :  { %v892_v16 = vmul.f32 %v2385_v2, %v891_v30 }
 0x1aa   :  { %v2387_v29 = vpop.eup %2386  ;;  %v878_v6 = vadd.f32 %v2383_v22, %v877_v24 }
 0x1ab   :  { %v905_v3 = vmul.f32 %v2387_v29, %v873_v27  ;;  %v893_v4 = vadd.f32 %v2385_v2, %v892_v16  ;;  %v2389_v23 = vpop.eup %2388  ;;  %vm910_vm5 = vweird.f32 %v2387_v29  ;;  %v3778_v16 = vld [vmem:[#allocation30_spill] sm:$0xff] }
 0x1ac   :  { %v882_v31 = vsel %vm881_vm1, %v2383_v22, %v878_v6  ;;  %v913_v22 = vand.u32 2147483647, %v873_v27  ;;  %vm911_vm7 = vmor %vm909_vm6, %vm910_vm5  ;;  %v3776_v27 = vld [vmem:[#allocation36_spill] sm:$0xff]  ;;  %v3779_v6 = vld [vmem:[#allocation31_spill] sm:$0xff] }
 0x1ad   :  { %v906_v20 = vsub.f32 1.0, %v905_v3  ;;  %v887_v21 = vsel %vm884_vm3, %v886_v28, %v882_v31  ;;  %v897_v0 = vsel %vm896_vm2, %v2385_v2, %v893_v4  ;;  %v3777_v2 = vld [vmem:[#allocation29_spill] sm:$0xff]  ;;  %v3780_v3 = vld [vmem:[#allocation32_spill] sm:$0xff]  ;;  %v3783_v31 = vld [vmem:[#allocation27_spill] sm:$0xff] }
 0x1ae   :  { %v902_v30 = vsel %vm899_vm4, %v901_v26, %v897_v0  ;;  %v921_v35 = vmul.f32 %v2389_v23, %v887_v21  ;;  %vm914_vm8 = vcmp.eq.f32.partialorder %v913_v22, 8.507059e+37  ;;  %v3781_v28 = vld [vmem:[#allocation25_spill] sm:$0xff]  ;;  %v3782_v26 = vld [vmem:[#allocation26_spill] sm:$0xff]  ;;  %v3784_v23 = vld [vmem:[#allocation28_spill] sm:$0xff] }
 0x1af   :  { %v907_v34 = vmul.f32 %v2387_v29, %v906_v20  ;;  %v920_v24 = vmul.f32 %v902_v30, %v3219_v18  ;;  %v3771_v18 = vld [vmem:[#allocation37_spill] sm:$0xff]  ;;  %v3774_v20 = vld [vmem:[#allocation34_spill] sm:$0xff] }
 0x1b0   :  { %v3785_v21 = vld [vmem:[#allocation21_spill] sm:$0xff]  ;;  %v3786_v30 = vld [vmem:[#allocation22_spill] sm:$0xff] }
 0x1b1   :  { %v3294_v19 = vadd.f32 %v921_v35, %v920_v24  ;;  %v908_v7 = vadd.f32 %v2387_v29, %v907_v34  ;;  %v3772_v34 = vld [vmem:[#allocation38_spill] sm:$0xff]  ;;  %v3773_v35 = vld [vmem:[#allocation33_spill] sm:$0xff]  ;;  %v3787_v24 = vld [vmem:[#allocation23_spill] sm:$0xff] }
 0x1b2   :  { %v3790_v22 = vld [vmem:[#allocation18_spill] sm:$0xff] }
 0x1b3   :  { %2390 = vtanh.f32 %v3294_v19  ;;  %v912_v17 = vsel %vm911_vm7, %v2387_v29, %v908_v7  ;;  %v3775_v29 = vld [vmem:[#allocation35_spill] sm:$0xff]  ;;  %v3788_v7 = vld [vmem:[#allocation24_spill] sm:$0xff] }
 0x1b4   :  { %v917_v25 = vsel %vm914_vm8, %v916_v5, %v912_v17  ;;  %v3791_v17 = vld [vmem:[#allocation19_spill] sm:$0xff]  ;;  %v3792_v5 = vld [vmem:[#allocation20_spill] sm:$0xff] }
 0x1b9   :  { %v2391_v4 = vpop.eup %2390 }
 0x1ba   :  { %v924_v0 = vmul.f32 %v2391_v4, %v917_v25  ;;  %v3793_v4 = vld [vmem:[#allocation13_spill] sm:$0xff]  ;;  %v3794_v25 = vld [vmem:[#allocation14_spill] sm:$0xff] }
 0x1bc   :  { %2334 = vst [vmem:[%s3623_s4 + $0x8] sm:$0xff] %v924_v0  ;;  %1014 = vmatmul.f32.vlgmr.msrb.gmra.mxu0 %v924_v0  ;;  %1034 = vmatmul.f32.vlgmr.msrb.gmra.mxu1 %v924_v0 }
 0x1bd   :  { %1054 = vmatmul.f32.vlgmr.msrb.gmra.mxu2 %v924_v0  ;;  %1074 = vmatmul.f32.vlgmr.msrb.gmra.mxu3 %v924_v0  ;;  %v3795_v0 = vld [vmem:[#allocation15_spill] sm:$0xff] }
 0x1be   :  { %1438 = vmatpush.msrb.mxu0 %v2861_v15  ;;  %1458 = vmatpush.msrb.mxu1 %v2866_v14 }
 0x1bf   :  { %1478 = vmatpush.msrb.mxu2 %v2871_v13  ;;  %1498 = vmatpush.msrb.mxu3 %v2876_v12 }
 0x1c0   :  { %1439 = vmatpush.msrb.mxu0 %v2841_v11  ;;  %1459 = vmatpush.msrb.mxu1 %v2846_v10 }
 0x1c1   :  { %1479 = vmatpush.msrb.mxu2 %v2851_v9  ;;  %1499 = vmatpush.msrb.mxu3 %v2856_v8 }
 0x1c2   :  { %1440 = vmatpush.msrb.mxu0 %v2821_v60  ;;  %1460 = vmatpush.msrb.mxu1 %v2826_v61 }
 0x1c3   :  { %1480 = vmatpush.msrb.mxu2 %v2831_v62  ;;  %1500 = vmatpush.msrb.mxu3 %v2836_v63 }
 0x1c4   :  { %1441 = vmatpush.msrb.mxu0 %v2801_v56  ;;  %1461 = vmatpush.msrb.mxu1 %v2806_v57 }
 0x1c5   :  { %1481 = vmatpush.msrb.mxu2 %v2811_v58  ;;  %1501 = vmatpush.msrb.mxu3 %v2816_v59 }
 0x1c6   :  { %1442 = vmatpush.msrb.mxu0 %v2781_v52  ;;  %1462 = vmatpush.msrb.mxu1 %v2786_v53 }
 0x1c7   :  { %1482 = vmatpush.msrb.mxu2 %v2791_v54  ;;  %1502 = vmatpush.msrb.mxu3 %v2796_v55 }
 0x1c8   :  { %1443 = vmatpush.msrb.mxu0 %v2761_v48  ;;  %1463 = vmatpush.msrb.mxu1 %v2766_v49 }
 0x1c9   :  { %1483 = vmatpush.msrb.mxu2 %v2771_v50  ;;  %1503 = vmatpush.msrb.mxu3 %v2776_v51 }
 0x1ca   :  { %1444 = vmatpush.msrb.mxu0 %v2741_v44  ;;  %1464 = vmatpush.msrb.mxu1 %v2746_v45 }
 0x1cb   :  { %1484 = vmatpush.msrb.mxu2 %v2751_v46  ;;  %1504 = vmatpush.msrb.mxu3 %v2756_v47 }
 0x1cc   :  { %1445 = vmatpush.msrb.mxu0 %v2721_v40  ;;  %1465 = vmatpush.msrb.mxu1 %v2726_v41 }
 0x1cd   :  { %1485 = vmatpush.msrb.mxu2 %v2731_v42  ;;  %1505 = vmatpush.msrb.mxu3 %v2736_v43 }
 0x1ce   :  { %1446 = vmatpush.msrb.mxu0 %v2701_v36  ;;  %1466 = vmatpush.msrb.mxu1 %v2706_v37 }
 0x1cf   :  { %1486 = vmatpush.msrb.mxu2 %v2711_v38  ;;  %1506 = vmatpush.msrb.mxu3 %v2716_v39 }
 0x1d0   :  { %1447 = vmatpush.msrb.mxu0 %v2681_v32  ;;  %1467 = vmatpush.msrb.mxu1 %v2686_v33 }
 0x1d1   :  { %1487 = vmatpush.msrb.mxu2 %v3771_v18  ;;  %1507 = vmatpush.msrb.mxu3 %v3772_v34 }
 0x1d2   :  { %1448 = vmatpush.msrb.mxu0 %v3773_v35  ;;  %1468 = vmatpush.msrb.mxu1 %v3774_v20 }
 0x1d3   :  { %1488 = vmatpush.msrb.mxu2 %v3775_v29  ;;  %1508 = vmatpush.msrb.mxu3 %v3776_v27 }
 0x1d4   :  { %1449 = vmatpush.msrb.mxu0 %v3777_v2  ;;  %1469 = vmatpush.msrb.mxu1 %v3778_v16 }
 0x1d5   :  { %1489 = vmatpush.msrb.mxu2 %v3779_v6  ;;  %1509 = vmatpush.msrb.mxu3 %v3780_v3 }
 0x1d6   :  { %1450 = vmatpush.msrb.mxu0 %v3781_v28  ;;  %1470 = vmatpush.msrb.mxu1 %v3782_v26 }
 0x1d7   :  { %1490 = vmatpush.msrb.mxu2 %v3783_v31  ;;  %1510 = vmatpush.msrb.mxu3 %v3784_v23  ;;  %v3797_v23 = vld [vmem:[#allocation43_spill] sm:$0xff]  ;;  %v3798_v31 = vld [vmem:[#allocation44_spill] sm:$0xff] }
 0x1d8   :  { %1451 = vmatpush.msrb.mxu0 %v3785_v21  ;;  %1471 = vmatpush.msrb.mxu1 %v3786_v30  ;;  %v3796_v21 = vld [vmem:[#allocation16_spill] sm:$0xff] }
 0x1d9   :  { %1491 = vmatpush.msrb.mxu2 %v3787_v24  ;;  %1511 = vmatpush.msrb.mxu3 %v3788_v7 }
 0x1da   :  { %1452 = vmatpush.msrb.mxu0 %v3789_v1  ;;  %1472 = vmatpush.msrb.mxu1 %v3790_v22 }
 0x1db   :  { %1492 = vmatpush.msrb.mxu2 %v3791_v17  ;;  %1512 = vmatpush.msrb.mxu3 %v3792_v5  ;;  %v3799_v5 = vld [vmem:[#allocation45_spill] sm:$0xff] }
 0x1dc   :  { %1453 = vmatpush.msrb.mxu0 %v3793_v4  ;;  %1473 = vmatpush.msrb.mxu1 %v3794_v25 }
 0x1dd   :  { %1493 = vmatpush.msrb.mxu2 %v3795_v0  ;;  %1513 = vmatpush.msrb.mxu3 %v3796_v21 }
 0x239   :  { %v1015_v30 = vpop.f32.mrf.mxu0  ;;  %v1035_v24 = vpop.f32.mrf.mxu1 }
 0x23a   :  { %v1078_v7 = vadd.f32 %v1015_v30, %v3797_v23  ;;  %v1079_v1 = vadd.f32 %v1035_v24, %v3798_v31  ;;  %v3800_v31 = vld [vmem:[#allocation46_spill] sm:$0xff] }
 0x23c   :  { %v2335_v26 = vmul.f32 -1.442695, %v1078_v7  ;;  %v2336_v22 = vmul.f32 -1.442695, %v1079_v1 }
 0x23e   :  { %2392 = vpow2.f32 %v2335_v26 }
 0x23f   :  { %2394 = vpow2.f32 %v2336_v22 }
 0x240   :  { %v1055_v17 = vpop.f32.mrf.mxu2  ;;  %v1075_v21 = vpop.f32.mrf.mxu3 }
 0x241   :  { %v1080_v28 = vadd.f32 %v1055_v17, %v3799_v5  ;;  %v1081_v24 = vadd.f32 %v1075_v21, %v3800_v31 }
 0x243   :  { %v2337_v4 = vmul.f32 -1.442695, %v1080_v28 }
 0x244   :  { %v2393_v3 = vpop.eup %2392 }
 0x245   :  { %v2395_v25 = vpop.eup %2394  ;;  %v1091_v6 = vadd.f32 1.0, %v2393_v3  ;;  %2396 = vpow2.f32 %v2337_v4 }
 0x246   :  { %v1092_v0 = vadd.f32 1.0, %v2395_v25 }
 0x247   :  { %2398 = vrcp.f32 %v1091_v6  ;;  %v1105_v28 = vand.u32 2147483648, %v1091_v6  ;;  %v1103_v4 = vand.u32 2147483647, %v1091_v6  ;;  %vm1099_vm11 = vweird.f32 %v1091_v6 }
 0x248   :  { %2400 = vrcp.f32 %v1092_v0  ;;  %v1120_v5 = vand.u32 2147483648, %v1092_v0  ;;  %v1118_v2 = vand.u32 2147483647, %v1092_v0  ;;  %vm1114_vm12 = vweird.f32 %v1092_v0 }
 0x249   :  { %v1106_v31 = vor.u32 1.1754944e-38, %v1105_v28  ;;  %vm1104_vm15 = vcmp.eq.f32.partialorder %v1103_v4, 8.507059e+37 }
 0x24a   :  { %vm1119_vm0 = vcmp.eq.f32.partialorder %v1118_v2, 8.507059e+37 }
 0x24b   :  { %v2397_v16 = vpop.eup %2396 }
 0x24c   :  { %v1093_v23 = vadd.f32 1.0, %v2397_v16 }
 0x24d   :  { %v2399_v30 = vpop.eup %2398 }
 0x24e   :  { %v2401_v7 = vpop.eup %2400  ;;  %v1095_v26 = vmul.f32 %v2399_v30, %v1091_v6  ;;  %2402 = vrcp.f32 %v1093_v23  ;;  %vm1100_vm9 = vweird.f32 %v2399_v30  ;;  %v1135_v28 = vand.u32 2147483648, %v1093_v23 }
 0x24f   :  { %v1110_v1 = vmul.f32 %v2401_v7, %v1092_v0  ;;  %2404 = vtanh.f32 %v1081_v24  ;;  %vm1115_vm10 = vweird.f32 %v2401_v7  ;;  %vm1101_vm13 = vmor %vm1099_vm11, %vm1100_vm9  ;;  %vm1129_vm2 = vweird.f32 %v1093_v23 }
 0x250   :  { %v1096_v22 = vsub.f32 1.0, %v1095_v26  ;;  %vm1116_vm14 = vmor %vm1114_vm12, %vm1115_vm10  ;;  %v1121_v26 = vor.u32 1.1754944e-38, %v1120_v5  ;;  %v1136_v4 = vor.u32 1.1754944e-38, %v1135_v28  ;;  %v3819_v28 = vld [vmem:[#allocation17_spill] sm:$0xff] }
 0x251   :  { %v1111_v17 = vsub.f32 1.0, %v1110_v1 }
 0x252   :  { %v1097_v3 = vmul.f32 %v2399_v30, %v1096_v22 }
 0x253   :  { %v1112_v25 = vmul.f32 %v2401_v7, %v1111_v17 }
 0x254   :  { %v2403_v27 = vpop.eup %2402  ;;  %v1098_v16 = vadd.f32 %v2399_v30, %v1097_v3 }
 0x255   :  { %v1125_v21 = vmul.f32 %v2403_v27, %v1093_v23  ;;  %v1113_v29 = vadd.f32 %v2401_v7, %v1112_v25  ;;  %v2405_v24 = vpop.eup %2404  ;;  %vm1130_vm1 = vweird.f32 %v2403_v27  ;;  %v3808_v25 = vld [vmem:[#allocation30_spill] sm:$0xff] }
 0x256   :  { %v1102_v1 = vsel %vm1101_vm13, %v2399_v30, %v1098_v16  ;;  %v1133_v30 = vand.u32 2147483647, %v1093_v23  ;;  %vm1131_vm3 = vmor %vm1129_vm2, %vm1130_vm1  ;;  %v3806_v23 = vld [vmem:[#allocation36_spill] sm:$0xff]  ;;  %v3809_v16 = vld [vmem:[#allocation31_spill] sm:$0xff] }
 0x257   :  { %v1126_v20 = vsub.f32 1.0, %v1125_v21  ;;  %v1107_v22 = vsel %vm1104_vm15, %v1106_v31, %v1102_v1  ;;  %v1117_v35 = vsel %vm1116_vm14, %v2401_v7, %v1113_v29  ;;  %v3807_v7 = vld [vmem:[#allocation29_spill] sm:$0xff]  ;;  %v3810_v21 = vld [vmem:[#allocation32_spill] sm:$0xff]  ;;  %v3813_v1 = vld [vmem:[#allocation27_spill] sm:$0xff] }
 0x258   :  { %v1122_v17 = vsel %vm1119_vm0, %v1121_v26, %v1117_v35  ;;  %v1141_v34 = vmul.f32 %v2405_v24, %v1107_v22  ;;  %vm1134_vm4 = vcmp.eq.f32.partialorder %v1133_v30, 8.507059e+37  ;;  %v3811_v31 = vld [vmem:[#allocation25_spill] sm:$0xff]  ;;  %v3812_v26 = vld [vmem:[#allocation26_spill] sm:$0xff]  ;;  %v3814_v24 = vld [vmem:[#allocation28_spill] sm:$0xff] }
 0x259   :  { %v1127_v18 = vmul.f32 %v2403_v27, %v1126_v20  ;;  %v1140_v3 = vmul.f32 %v1122_v17, %v3294_v19  ;;  %v3801_v19 = vld [vmem:[#allocation37_spill] sm:$0xff]  ;;  %v3804_v20 = vld [vmem:[#allocation34_spill] sm:$0xff] }
 0x25a   :  { %v3815_v22 = vld [vmem:[#allocation21_spill] sm:$0xff]  ;;  %v3816_v17 = vld [vmem:[#allocation22_spill] sm:$0xff] }
 0x25b   :  { %v3369_v6 = vadd.f32 %v1141_v34, %v1140_v3  ;;  %v1128_v0 = vadd.f32 %v2403_v27, %v1127_v18  ;;  %v3802_v18 = vld [vmem:[#allocation38_spill] sm:$0xff]  ;;  %v3803_v34 = vld [vmem:[#allocation33_spill] sm:$0xff]  ;;  %v3817_v3 = vld [vmem:[#allocation23_spill] sm:$0xff] }
 0x25c   :  { %v3820_v30 = vld [vmem:[#allocation18_spill] sm:$0xff] }
 0x25d   :  { %2406 = vtanh.f32 %v3369_v6  ;;  %v1132_v5 = vsel %vm1131_vm3, %v2403_v27, %v1128_v0  ;;  %v3805_v27 = vld [vmem:[#allocation35_spill] sm:$0xff]  ;;  %v3818_v0 = vld [vmem:[#allocation24_spill] sm:$0xff] }
 0x25e   :  { %v1137_v2 = vsel %vm1134_vm4, %v1136_v4, %v1132_v5  ;;  %v3821_v5 = vld [vmem:[#allocation19_spill] sm:$0xff]  ;;  %v3822_v4 = vld [vmem:[#allocation20_spill] sm:$0xff] }
 0x263   :  { %v2407_v29 = vpop.eup %2406 }
 0x264   :  { %v1144_v35 = vmul.f32 %v2407_v29, %v1137_v2  ;;  %v3823_v29 = vld [vmem:[#allocation13_spill] sm:$0xff]  ;;  %v3824_v2 = vld [vmem:[#allocation14_spill] sm:$0xff] }
 0x266   :  { %2338 = vst [vmem:[%s3623_s4 + $0x10] sm:$0xff] %v1144_v35  ;;  %1234 = vmatmul.f32.vlgmr.msra.gmra.mxu0 %v1144_v35  ;;  %1254 = vmatmul.f32.vlgmr.msra.gmra.mxu1 %v1144_v35 }
 0x267   :  { %1274 = vmatmul.f32.vlgmr.msra.gmra.mxu2 %v1144_v35  ;;  %1294 = vmatmul.f32.vlgmr.msra.gmra.mxu3 %v1144_v35  ;;  %v3825_v35 = vld [vmem:[#allocation15_spill] sm:$0xff] }
 0x268   :  { %1658 = vmatpush.msra.mxu0 %v2861_v15  ;;  %1678 = vmatpush.msra.mxu1 %v2866_v14 }
 0x269   :  { %1698 = vmatpush.msra.mxu2 %v2871_v13  ;;  %1718 = vmatpush.msra.mxu3 %v2876_v12 }
 0x26a   :  { %1659 = vmatpush.msra.mxu0 %v2841_v11  ;;  %1679 = vmatpush.msra.mxu1 %v2846_v10 }
 0x26b   :  { %1699 = vmatpush.msra.mxu2 %v2851_v9  ;;  %1719 = vmatpush.msra.mxu3 %v2856_v8 }
 0x26c   :  { %1660 = vmatpush.msra.mxu0 %v2821_v60  ;;  %1680 = vmatpush.msra.mxu1 %v2826_v61 }
 0x26d   :  { %1700 = vmatpush.msra.mxu2 %v2831_v62  ;;  %1720 = vmatpush.msra.mxu3 %v2836_v63 }
 0x26e   :  { %1661 = vmatpush.msra.mxu0 %v2801_v56  ;;  %1681 = vmatpush.msra.mxu1 %v2806_v57 }
 0x26f   :  { %1701 = vmatpush.msra.mxu2 %v2811_v58  ;;  %1721 = vmatpush.msra.mxu3 %v2816_v59 }
 0x270   :  { %1662 = vmatpush.msra.mxu0 %v2781_v52  ;;  %1682 = vmatpush.msra.mxu1 %v2786_v53 }
 0x271   :  { %1702 = vmatpush.msra.mxu2 %v2791_v54  ;;  %1722 = vmatpush.msra.mxu3 %v2796_v55 }
 0x272   :  { %1663 = vmatpush.msra.mxu0 %v2761_v48  ;;  %1683 = vmatpush.msra.mxu1 %v2766_v49 }
 0x273   :  { %1703 = vmatpush.msra.mxu2 %v2771_v50  ;;  %1723 = vmatpush.msra.mxu3 %v2776_v51 }
 0x274   :  { %1664 = vmatpush.msra.mxu0 %v2741_v44  ;;  %1684 = vmatpush.msra.mxu1 %v2746_v45 }
 0x275   :  { %1704 = vmatpush.msra.mxu2 %v2751_v46  ;;  %1724 = vmatpush.msra.mxu3 %v2756_v47 }
 0x276   :  { %1665 = vmatpush.msra.mxu0 %v2721_v40  ;;  %1685 = vmatpush.msra.mxu1 %v2726_v41 }
 0x277   :  { %1705 = vmatpush.msra.mxu2 %v2731_v42  ;;  %1725 = vmatpush.msra.mxu3 %v2736_v43 }
 0x278   :  { %1666 = vmatpush.msra.mxu0 %v2701_v36  ;;  %1686 = vmatpush.msra.mxu1 %v2706_v37 }
 0x279   :  { %1706 = vmatpush.msra.mxu2 %v2711_v38  ;;  %1726 = vmatpush.msra.mxu3 %v2716_v39 }
 0x27a   :  { %1667 = vmatpush.msra.mxu0 %v2681_v32  ;;  %1687 = vmatpush.msra.mxu1 %v2686_v33 }
 0x27b   :  { %1707 = vmatpush.msra.mxu2 %v3801_v19  ;;  %1727 = vmatpush.msra.mxu3 %v3802_v18 }
 0x27c   :  { %1668 = vmatpush.msra.mxu0 %v3803_v34  ;;  %1688 = vmatpush.msra.mxu1 %v3804_v20 }
 0x27d   :  { %1708 = vmatpush.msra.mxu2 %v3805_v27  ;;  %1728 = vmatpush.msra.mxu3 %v3806_v23 }
 0x27e   :  { %1669 = vmatpush.msra.mxu0 %v3807_v7  ;;  %1689 = vmatpush.msra.mxu1 %v3808_v25 }
 0x27f   :  { %1709 = vmatpush.msra.mxu2 %v3809_v16  ;;  %1729 = vmatpush.msra.mxu3 %v3810_v21 }
 0x280   :  { %1670 = vmatpush.msra.mxu0 %v3811_v31  ;;  %1690 = vmatpush.msra.mxu1 %v3812_v26 }
 0x281   :  { %1710 = vmatpush.msra.mxu2 %v3813_v1  ;;  %1730 = vmatpush.msra.mxu3 %v3814_v24  ;;  %v3827_v24 = vld [vmem:[#allocation47_spill] sm:$0xff]  ;;  %v3828_v1 = vld [vmem:[#allocation48_spill] sm:$0xff] }
 0x282   :  { %1671 = vmatpush.msra.mxu0 %v3815_v22  ;;  %1691 = vmatpush.msra.mxu1 %v3816_v17  ;;  %v3826_v22 = vld [vmem:[#allocation16_spill] sm:$0xff] }
 0x283   :  { %1711 = vmatpush.msra.mxu2 %v3817_v3  ;;  %1731 = vmatpush.msra.mxu3 %v3818_v0 }
 0x284   :  { %1672 = vmatpush.msra.mxu0 %v3819_v28  ;;  %1692 = vmatpush.msra.mxu1 %v3820_v30 }
 0x285   :  { %1712 = vmatpush.msra.mxu2 %v3821_v5  ;;  %1732 = vmatpush.msra.mxu3 %v3822_v4  ;;  %v3829_v4 = vld [vmem:[#allocation49_spill] sm:$0xff] }
 0x286   :  { %1673 = vmatpush.msra.mxu0 %v3823_v29  ;;  %1693 = vmatpush.msra.mxu1 %v3824_v2 }
 0x287   :  { %1713 = vmatpush.msra.mxu2 %v3825_v35  ;;  %1733 = vmatpush.msra.mxu3 %v3826_v22 }
 0x2e3   :  { %v1235_v17 = vpop.f32.mrf.mxu0  ;;  %v1255_v3 = vpop.f32.mrf.mxu1 }
 0x2e4   :  { %v1298_v0 = vadd.f32 %v1235_v17, %v3827_v24  ;;  %v1299_v28 = vadd.f32 %v1255_v3, %v3828_v1  ;;  %v3830_v1 = vld [vmem:[#allocation50_spill] sm:$0xff] }
 0x2e6   :  { %v2339_v26 = vmul.f32 -1.442695, %v1298_v0  ;;  %v2340_v30 = vmul.f32 -1.442695, %v1299_v28 }
 0x2e8   :  { %2408 = vpow2.f32 %v2339_v26 }
 0x2e9   :  { %2410 = vpow2.f32 %v2340_v30 }
 0x2ea   :  { %v1275_v5 = vpop.f32.mrf.mxu2  ;;  %v1295_v22 = vpop.f32.mrf.mxu3 }
 0x2eb   :  { %v1300_v31 = vadd.f32 %v1275_v5, %v3829_v4  ;;  %v1301_v3 = vadd.f32 %v1295_v22, %v3830_v1 }
 0x2ed   :  { %v2341_v29 = vmul.f32 -1.442695, %v1300_v31 }
 0x2ee   :  { %v2409_v21 = vpop.eup %2408 }
 0x2ef   :  { %v2411_v2 = vpop.eup %2410  ;;  %v1311_v16 = vadd.f32 1.0, %v2409_v21  ;;  %2412 = vpow2.f32 %v2341_v29 }
 0x2f0   :  { %v1312_v35 = vadd.f32 1.0, %v2411_v2 }
 0x2f1   :  { %2414 = vrcp.f32 %v1311_v16  ;;  %v1325_v31 = vand.u32 2147483648, %v1311_v16  ;;  %v1323_v29 = vand.u32 2147483647, %v1311_v16  ;;  %vm1319_vm7 = vweird.f32 %v1311_v16 }
 0x2f2   :  { %2416 = vrcp.f32 %v1312_v35  ;;  %v1340_v4 = vand.u32 2147483648, %v1312_v35  ;;  %v1338_v7 = vand.u32 2147483647, %v1312_v35  ;;  %vm1334_vm8 = vweird.f32 %v1312_v35 }
 0x2f3   :  { %v1326_v1 = vor.u32 1.1754944e-38, %v1325_v31  ;;  %vm1324_vm11 = vcmp.eq.f32.partialorder %v1323_v29, 8.507059e+37 }
 0x2f4   :  { %vm1339_vm12 = vcmp.eq.f32.partialorder %v1338_v7, 8.507059e+37 }
 0x2f5   :  { %v2413_v25 = vpop.eup %2412 }
 0x2f6   :  { %v1313_v24 = vadd.f32 1.0, %v2413_v25 }
 0x2f7   :  { %v2415_v17 = vpop.eup %2414 }
 0x2f8   :  { %v2417_v0 = vpop.eup %2416  ;;  %v1315_v26 = vmul.f32 %v2415_v17, %v1311_v16  ;;  %2418 = vrcp.f32 %v1313_v24  ;;  %vm1320_vm5 = vweird.f32 %v2415_v17  ;;  %v1355_v31 = vand.u32 2147483648, %v1313_v24 }
 0x2f9   :  { %v1330_v28 = vmul.f32 %v2417_v0, %v1312_v35  ;;  %2420 = vtanh.f32 %v1301_v3  ;;  %vm1335_vm6 = vweird.f32 %v2417_v0  ;;  %vm1321_vm9 = vmor %vm1319_vm7, %vm1320_vm5  ;;  %vm1349_vm14 = vweird.f32 %v1313_v24 }
 0x2fa   :  { %v1316_v30 = vsub.f32 1.0, %v1315_v26  ;;  %vm1336_vm10 = vmor %vm1334_vm8, %vm1335_vm6  ;;  %v1341_v26 = vor.u32 1.1754944e-38, %v1340_v4  ;;  %v1356_v29 = vor.u32 1.1754944e-38, %v1355_v31  ;;  %v3849_v31 = vld [vmem:[#allocation17_spill] sm:$0xff] }
 0x2fb   :  { %v1331_v5 = vsub.f32 1.0, %v1330_v28 }
 0x2fc   :  { %v1317_v21 = vmul.f32 %v2415_v17, %v1316_v30 }
 0x2fd   :  { %v1332_v2 = vmul.f32 %v2417_v0, %v1331_v5 }
 0x2fe   :  { %v2419_v23 = vpop.eup %2418  ;;  %v1318_v25 = vadd.f32 %v2415_v17, %v1317_v21 }
 0x2ff   :  { %v1345_v22 = vmul.f32 %v2419_v23, %v1313_v24  ;;  %v1333_v27 = vadd.f32 %v2417_v0, %v1332_v2  ;;  %v2421_v3 = vpop.eup %2420  ;;  %vm1350_vm13 = vweird.f32 %v2419_v23  ;;  %v3838_v2 = vld [vmem:[#allocation30_spill] sm:$0xff] }
 0x300   :  { %v1322_v28 = vsel %vm1321_vm9, %v2415_v17, %v1318_v25  ;;  %v1353_v17 = vand.u32 2147483647, %v1313_v24  ;;  %vm1351_vm15 = vmor %vm1349_vm14, %vm1350_vm13  ;;  %v3836_v24 = vld [vmem:[#allocation36_spill] sm:$0xff]  ;;  %v3839_v25 = vld [vmem:[#allocation31_spill] sm:$0xff] }
 0x301   :  { %v1346_v20 = vsub.f32 1.0, %v1345_v22  ;;  %v1327_v30 = vsel %vm1324_vm11, %v1326_v1, %v1322_v28  ;;  %v1337_v34 = vsel %vm1336_vm10, %v2417_v0, %v1333_v27  ;;  %v3837_v0 = vld [vmem:[#allocation29_spill] sm:$0xff]  ;;  %v3840_v22 = vld [vmem:[#allocation32_spill] sm:$0xff]  ;;  %v3843_v28 = vld [vmem:[#allocation27_spill] sm:$0xff] }
 0x302   :  { %v1342_v5 = vsel %vm1339_vm12, %v1341_v26, %v1337_v34  ;;  %v1361_v18 = vmul.f32 %v2421_v3, %v1327_v30  ;;  %vm1354_vm0 = vcmp.eq.f32.partialorder %v1353_v17, 8.507059e+37  ;;  %v3841_v1 = vld [vmem:[#allocation25_spill] sm:$0xff]  ;;  %v3842_v26 = vld [vmem:[#allocation26_spill] sm:$0xff]  ;;  %v3844_v3 = vld [vmem:[#allocation28_spill] sm:$0xff] }
 0x303   :  { %v1347_v19 = vmul.f32 %v2419_v23, %v1346_v20  ;;  %v1360_v21 = vmul.f32 %v1342_v5, %v3369_v6  ;;  %v3831_v6 = vld [vmem:[#allocation37_spill] sm:$0xff]  ;;  %v3834_v20 = vld [vmem:[#allocation34_spill] sm:$0xff] }
 0x304   :  { %v3845_v30 = vld [vmem:[#allocation21_spill] sm:$0xff]  ;;  %v3846_v5 = vld [vmem:[#allocation22_spill] sm:$0xff] }
 0x305   :  { %v3444_v16 = vadd.f32 %v1361_v18, %v1360_v21  ;;  %v1348_v35 = vadd.f32 %v2419_v23, %v1347_v19  ;;  %v3832_v19 = vld [vmem:[#allocation38_spill] sm:$0xff]  ;;  %v3833_v18 = vld [vmem:[#allocation33_spill] sm:$0xff]  ;;  %v3847_v21 = vld [vmem:[#allocation23_spill] sm:$0xff] }
 0x306   :  { %v3850_v17 = vld [vmem:[#allocation18_spill] sm:$0xff] }
 0x307   :  { %2422 = vtanh.f32 %v3444_v16  ;;  %v1352_v4 = vsel %vm1351_vm15, %v2419_v23, %v1348_v35  ;;  %v3835_v23 = vld [vmem:[#allocation35_spill] sm:$0xff]  ;;  %v3848_v35 = vld [vmem:[#allocation24_spill] sm:$0xff] }
 0x308   :  { %v1357_v7 = vsel %vm1354_vm0, %v1356_v29, %v1352_v4  ;;  %v3851_v4 = vld [vmem:[#allocation19_spill] sm:$0xff]  ;;  %v3852_v29 = vld [vmem:[#allocation20_spill] sm:$0xff] }
 0x30d   :  { %v2423_v27 = vpop.eup %2422 }
 0x30e   :  { %v1364_v34 = vmul.f32 %v2423_v27, %v1357_v7  ;;  %v3853_v27 = vld [vmem:[#allocation13_spill] sm:$0xff]  ;;  %v3854_v7 = vld [vmem:[#allocation14_spill] sm:$0xff] }
 0x310   :  { %2342 = vst [vmem:[%s3623_s4 + $0x18] sm:$0xff] %v1364_v34  ;;  %1454 = vmatmul.f32.vlgmr.msrb.gmra.mxu0 %v1364_v34  ;;  %1474 = vmatmul.f32.vlgmr.msrb.gmra.mxu1 %v1364_v34 }
 0x311   :  { %1494 = vmatmul.f32.vlgmr.msrb.gmra.mxu2 %v1364_v34  ;;  %1514 = vmatmul.f32.vlgmr.msrb.gmra.mxu3 %v1364_v34  ;;  %v3855_v34 = vld [vmem:[#allocation15_spill] sm:$0xff] }
 0x312   :  { %1878 = vmatpush.msrb.mxu0 %v2861_v15  ;;  %1898 = vmatpush.msrb.mxu1 %v2866_v14 }
 0x313   :  { %1918 = vmatpush.msrb.mxu2 %v2871_v13  ;;  %1938 = vmatpush.msrb.mxu3 %v2876_v12 }
 0x314   :  { %1879 = vmatpush.msrb.mxu0 %v2841_v11  ;;  %1899 = vmatpush.msrb.mxu1 %v2846_v10 }
 0x315   :  { %1919 = vmatpush.msrb.mxu2 %v2851_v9  ;;  %1939 = vmatpush.msrb.mxu3 %v2856_v8 }
 0x316   :  { %1880 = vmatpush.msrb.mxu0 %v2821_v60  ;;  %1900 = vmatpush.msrb.mxu1 %v2826_v61 }
 0x317   :  { %1920 = vmatpush.msrb.mxu2 %v2831_v62  ;;  %1940 = vmatpush.msrb.mxu3 %v2836_v63 }
 0x318   :  { %1881 = vmatpush.msrb.mxu0 %v2801_v56  ;;  %1901 = vmatpush.msrb.mxu1 %v2806_v57 }
 0x319   :  { %1921 = vmatpush.msrb.mxu2 %v2811_v58  ;;  %1941 = vmatpush.msrb.mxu3 %v2816_v59 }
 0x31a   :  { %1882 = vmatpush.msrb.mxu0 %v2781_v52  ;;  %1902 = vmatpush.msrb.mxu1 %v2786_v53 }
 0x31b   :  { %1922 = vmatpush.msrb.mxu2 %v2791_v54  ;;  %1942 = vmatpush.msrb.mxu3 %v2796_v55 }
 0x31c   :  { %1883 = vmatpush.msrb.mxu0 %v2761_v48  ;;  %1903 = vmatpush.msrb.mxu1 %v2766_v49 }
 0x31d   :  { %1923 = vmatpush.msrb.mxu2 %v2771_v50  ;;  %1943 = vmatpush.msrb.mxu3 %v2776_v51 }
 0x31e   :  { %1884 = vmatpush.msrb.mxu0 %v2741_v44  ;;  %1904 = vmatpush.msrb.mxu1 %v2746_v45 }
 0x31f   :  { %1924 = vmatpush.msrb.mxu2 %v2751_v46  ;;  %1944 = vmatpush.msrb.mxu3 %v2756_v47 }
 0x320   :  { %1885 = vmatpush.msrb.mxu0 %v2721_v40  ;;  %1905 = vmatpush.msrb.mxu1 %v2726_v41 }
 0x321   :  { %1925 = vmatpush.msrb.mxu2 %v2731_v42  ;;  %1945 = vmatpush.msrb.mxu3 %v2736_v43 }
 0x322   :  { %1886 = vmatpush.msrb.mxu0 %v2701_v36  ;;  %1906 = vmatpush.msrb.mxu1 %v2706_v37 }
 0x323   :  { %1926 = vmatpush.msrb.mxu2 %v2711_v38  ;;  %1946 = vmatpush.msrb.mxu3 %v2716_v39 }
 0x324   :  { %1887 = vmatpush.msrb.mxu0 %v2681_v32  ;;  %1907 = vmatpush.msrb.mxu1 %v2686_v33 }
 0x325   :  { %1927 = vmatpush.msrb.mxu2 %v3831_v6  ;;  %1947 = vmatpush.msrb.mxu3 %v3832_v19 }
 0x326   :  { %1888 = vmatpush.msrb.mxu0 %v3833_v18  ;;  %1908 = vmatpush.msrb.mxu1 %v3834_v20 }
 0x327   :  { %1928 = vmatpush.msrb.mxu2 %v3835_v23  ;;  %1948 = vmatpush.msrb.mxu3 %v3836_v24 }
 0x328   :  { %1889 = vmatpush.msrb.mxu0 %v3837_v0  ;;  %1909 = vmatpush.msrb.mxu1 %v3838_v2 }
 0x329   :  { %1929 = vmatpush.msrb.mxu2 %v3839_v25  ;;  %1949 = vmatpush.msrb.mxu3 %v3840_v22 }
 0x32a   :  { %1890 = vmatpush.msrb.mxu0 %v3841_v1  ;;  %1910 = vmatpush.msrb.mxu1 %v3842_v26 }
 0x32b   :  { %1930 = vmatpush.msrb.mxu2 %v3843_v28  ;;  %1950 = vmatpush.msrb.mxu3 %v3844_v3  ;;  %v3857_v3 = vld [vmem:[#allocation51_spill] sm:$0xff]  ;;  %v3858_v28 = vld [vmem:[#allocation52_spill] sm:$0xff] }
 0x32c   :  { %1891 = vmatpush.msrb.mxu0 %v3845_v30  ;;  %1911 = vmatpush.msrb.mxu1 %v3846_v5  ;;  %v3856_v30 = vld [vmem:[#allocation16_spill] sm:$0xff] }
 0x32d   :  { %1931 = vmatpush.msrb.mxu2 %v3847_v21  ;;  %1951 = vmatpush.msrb.mxu3 %v3848_v35 }
 0x32e   :  { %1892 = vmatpush.msrb.mxu0 %v3849_v31  ;;  %1912 = vmatpush.msrb.mxu1 %v3850_v17 }
 0x32f   :  { %1932 = vmatpush.msrb.mxu2 %v3851_v4  ;;  %1952 = vmatpush.msrb.mxu3 %v3852_v29  ;;  %v3859_v29 = vld [vmem:[#allocation53_spill] sm:$0xff] }
 0x330   :  { %1893 = vmatpush.msrb.mxu0 %v3853_v27  ;;  %1913 = vmatpush.msrb.mxu1 %v3854_v7 }
 0x331   :  { %1933 = vmatpush.msrb.mxu2 %v3855_v34  ;;  %1953 = vmatpush.msrb.mxu3 %v3856_v30 }
 0x38d   :  { %v1455_v5 = vpop.f32.mrf.mxu0  ;;  %v1475_v21 = vpop.f32.mrf.mxu1 }
 0x38e   :  { %v1518_v35 = vadd.f32 %v1455_v5, %v3857_v3  ;;  %v1519_v31 = vadd.f32 %v1475_v21, %v3858_v28  ;;  %v3860_v28 = vld [vmem:[#allocation54_spill] sm:$0xff] }
 0x390   :  { %v2343_v26 = vmul.f32 -1.442695, %v1518_v35  ;;  %v2344_v17 = vmul.f32 -1.442695, %v1519_v31 }
 0x392   :  { %2424 = vpow2.f32 %v2343_v26 }
 0x393   :  { %2426 = vpow2.f32 %v2344_v17 }
 0x394   :  { %v1495_v4 = vpop.f32.mrf.mxu2  ;;  %v1515_v30 = vpop.f32.mrf.mxu3 }
 0x395   :  { %v1520_v1 = vadd.f32 %v1495_v4, %v3859_v29  ;;  %v1521_v21 = vadd.f32 %v1515_v30, %v3860_v28 }
 0x397   :  { %v2345_v27 = vmul.f32 -1.442695, %v1520_v1 }
 0x398   :  { %v2425_v22 = vpop.eup %2424 }
 0x399   :  { %v2427_v7 = vpop.eup %2426  ;;  %v1531_v25 = vadd.f32 1.0, %v2425_v22  ;;  %2428 = vpow2.f32 %v2345_v27 }
 0x39a   :  { %v1532_v34 = vadd.f32 1.0, %v2427_v7 }
 0x39b   :  { %2430 = vrcp.f32 %v1531_v25  ;;  %v1545_v1 = vand.u32 2147483648, %v1531_v25  ;;  %v1543_v27 = vand.u32 2147483647, %v1531_v25  ;;  %vm1539_vm3 = vweird.f32 %v1531_v25 }
 0x39c   :  { %2432 = vrcp.f32 %v1532_v34  ;;  %v1560_v29 = vand.u32 2147483648, %v1532_v34  ;;  %v1558_v0 = vand.u32 2147483647, %v1532_v34  ;;  %vm1554_vm4 = vweird.f32 %v1532_v34 }
 0x39d   :  { %v1546_v28 = vor.u32 1.1754944e-38, %v1545_v1  ;;  %vm1544_vm7 = vcmp.eq.f32.partialorder %v1543_v27, 8.507059e+37 }
 0x39e   :  { %vm1559_vm8 = vcmp.eq.f32.partialorder %v1558_v0, 8.507059e+37 }
 0x39f   :  { %v2429_v2 = vpop.eup %2428 }
 0x3a0   :  { %v1533_v3 = vadd.f32 1.0, %v2429_v2 }
 0x3a1   :  { %v2431_v5 = vpop.eup %2430 }
 0x3a2   :  { %v2433_v35 = vpop.eup %2432  ;;  %v1535_v26 = vmul.f32 %v2431_v5, %v1531_v25  ;;  %2434 = vrcp.f32 %v1533_v3  ;;  %vm1540_vm1 = vweird.f32 %v2431_v5  ;;  %v1575_v1 = vand.u32 2147483648, %v1533_v3 }
 0x3a3   :  { %v1550_v31 = vmul.f32 %v2433_v35, %v1532_v34  ;;  %2436 = vtanh.f32 %v1521_v21  ;;  %vm1555_vm2 = vweird.f32 %v2433_v35  ;;  %vm1541_vm5 = vmor %vm1539_vm3, %vm1540_vm1  ;;  %vm1569_vm10 = vweird.f32 %v1533_v3 }
 0x3a4   :  { %v1536_v17 = vsub.f32 1.0, %v1535_v26  ;;  %vm1556_vm6 = vmor %vm1554_vm4, %vm1555_vm2  ;;  %v1561_v26 = vor.u32 1.1754944e-38, %v1560_v29  ;;  %v1576_v27 = vor.u32 1.1754944e-38, %v1575_v1 }
 0x3a5   :  { %v1551_v4 = vsub.f32 1.0, %v1550_v31 }
 0x3a6   :  { %v1537_v22 = vmul.f32 %v2431_v5, %v1536_v17 }
 0x3a7   :  { %v1552_v7 = vmul.f32 %v2433_v35, %v1551_v4 }
 0x3a8   :  { %v2435_v24 = vpop.eup %2434  ;;  %v1538_v2 = vadd.f32 %v2431_v5, %v1537_v22 }
 0x3a9   :  { %v1565_v30 = vmul.f32 %v2435_v24, %v1533_v3  ;;  %v1553_v23 = vadd.f32 %v2433_v35, %v1552_v7  ;;  %v2437_v21 = vpop.eup %2436  ;;  %vm1570_vm9 = vweird.f32 %v2435_v24 }
 0x3aa   :  { %v1542_v31 = vsel %vm1541_vm5, %v2431_v5, %v1538_v2  ;;  %v1573_v5 = vand.u32 2147483647, %v1533_v3  ;;  %vm1571_vm11 = vmor %vm1569_vm10, %vm1570_vm9  ;;  %v3890_v2 = vld [vmem:[#allocation58_spill] sm:$0xff] }
 0x3ab   :  { %v1566_v20 = vsub.f32 1.0, %v1565_v30  ;;  %v1547_v17 = vsel %vm1544_vm7, %v1546_v28, %v1542_v31  ;;  %v1557_v18 = vsel %vm1556_vm6, %v2433_v35, %v1553_v23 }
 0x3ac   :  { %v1562_v4 = vsel %vm1559_vm8, %v1561_v26, %v1557_v18  ;;  %v1581_v19 = vmul.f32 %v2437_v21, %v1547_v17  ;;  %vm1574_vm12 = vcmp.eq.f32.partialorder %v1573_v5, 8.507059e+37 }
 0x3ad   :  { %v1567_v6 = vmul.f32 %v2435_v24, %v1566_v20  ;;  %v1580_v22 = vmul.f32 %v1562_v4, %v3444_v16 }
 0x3af   :  { %v3519_v25 = vadd.f32 %v1581_v19, %v1580_v22  ;;  %v1568_v34 = vadd.f32 %v2435_v24, %v1567_v6 }
 0x3b1   :  { %2438 = vtanh.f32 %v3519_v25  ;;  %v1572_v29 = vsel %vm1571_vm11, %v2435_v24, %v1568_v34 }
 0x3b2   :  { %v1577_v0 = vsel %vm1574_vm12, %v1576_v27, %v1572_v29 }
 0x3b7   :  { %v2439_v23 = vpop.eup %2438 }
 0x3b8   :  { %v1584_v18 = vmul.f32 %v2439_v23, %v1577_v0 }
 0x3ba   :  { %2346 = vst [vmem:[%s3623_s4 + $0x20] sm:$0xff] %v1584_v18  ;;  %1674 = vmatmul.f32.vlgmr.msra.gmra.mxu0 %v1584_v18  ;;  %1694 = vmatmul.f32.vlgmr.msra.gmra.mxu1 %v1584_v18 }
 0x3bb   :  { %1714 = vmatmul.f32.vlgmr.msra.gmra.mxu2 %v1584_v18  ;;  %1734 = vmatmul.f32.vlgmr.msra.gmra.mxu3 %v1584_v18 }
 0x3bc   :  { %2098 = vmatpush.msra.mxu0 %v2861_v15  ;;  %2118 = vmatpush.msra.mxu1 %v2866_v14  ;;  %v3867_v14 = vld [vmem:[#allocation29_spill] sm:$0xff]  ;;  %v3868_v15 = vld [vmem:[#allocation30_spill] sm:$0xff] }
 0x3bd   :  { %2138 = vmatpush.msra.mxu2 %v2871_v13  ;;  %2158 = vmatpush.msra.mxu3 %v2876_v12  ;;  %v3865_v12 = vld [vmem:[#allocation35_spill] sm:$0xff]  ;;  %v3866_v13 = vld [vmem:[#allocation36_spill] sm:$0xff] }
 0x3be   :  { %2099 = vmatpush.msra.mxu0 %v2841_v11  ;;  %2119 = vmatpush.msra.mxu1 %v2846_v10  ;;  %v3863_v10 = vld [vmem:[#allocation33_spill] sm:$0xff]  ;;  %v3864_v11 = vld [vmem:[#allocation34_spill] sm:$0xff] }
 0x3bf   :  { %2139 = vmatpush.msra.mxu2 %v2851_v9  ;;  %2159 = vmatpush.msra.mxu3 %v2856_v8  ;;  %v3861_v8 = vld [vmem:[#allocation37_spill] sm:$0xff]  ;;  %v3862_v9 = vld [vmem:[#allocation38_spill] sm:$0xff] }
 0x3c0   :  { %2100 = vmatpush.msra.mxu0 %v2821_v60  ;;  %2120 = vmatpush.msra.mxu1 %v2826_v61  ;;  %v3889_v61 = vld [vmem:[#allocation57_spill] sm:$0xff] }
 0x3c1   :  { %2140 = vmatpush.msra.mxu2 %v2831_v62  ;;  %2160 = vmatpush.msra.mxu3 %v2836_v63 }
 0x3c2   :  { %2101 = vmatpush.msra.mxu0 %v2801_v56  ;;  %2121 = vmatpush.msra.mxu1 %v2806_v57  ;;  %v3888_v56 = vld [vmem:[#allocation56_spill] sm:$0xff] }
 0x3c3   :  { %2141 = vmatpush.msra.mxu2 %v2811_v58  ;;  %2161 = vmatpush.msra.mxu3 %v2816_v59 }
 0x3c4   :  { %2102 = vmatpush.msra.mxu0 %v2781_v52  ;;  %2122 = vmatpush.msra.mxu1 %v2786_v53 }
 0x3c5   :  { %2142 = vmatpush.msra.mxu2 %v2791_v54  ;;  %2162 = vmatpush.msra.mxu3 %v2796_v55  ;;  %v3887_v54 = vld [vmem:[#allocation55_spill] sm:$0xff] }
 0x3c6   :  { %2103 = vmatpush.msra.mxu0 %v2761_v48  ;;  %2123 = vmatpush.msra.mxu1 %v2766_v49  ;;  %v3883_v48 = vld [vmem:[#allocation13_spill] sm:$0xff]  ;;  %v3884_v49 = vld [vmem:[#allocation14_spill] sm:$0xff] }
 0x3c7   :  { %2143 = vmatpush.msra.mxu2 %v2771_v50  ;;  %2163 = vmatpush.msra.mxu3 %v2776_v51  ;;  %v3885_v50 = vld [vmem:[#allocation15_spill] sm:$0xff]  ;;  %v3886_v51 = vld [vmem:[#allocation16_spill] sm:$0xff] }
 0x3c8   :  { %2104 = vmatpush.msra.mxu0 %v2741_v44  ;;  %2124 = vmatpush.msra.mxu1 %v2746_v45  ;;  %v3879_v44 = vld [vmem:[#allocation17_spill] sm:$0xff]  ;;  %v3880_v45 = vld [vmem:[#allocation18_spill] sm:$0xff] }
 0x3c9   :  { %2144 = vmatpush.msra.mxu2 %v2751_v46  ;;  %2164 = vmatpush.msra.mxu3 %v2756_v47  ;;  %v3881_v46 = vld [vmem:[#allocation19_spill] sm:$0xff]  ;;  %v3882_v47 = vld [vmem:[#allocation20_spill] sm:$0xff] }
 0x3ca   :  { %2105 = vmatpush.msra.mxu0 %v2721_v40  ;;  %2125 = vmatpush.msra.mxu1 %v2726_v41  ;;  %v3875_v40 = vld [vmem:[#allocation21_spill] sm:$0xff]  ;;  %v3876_v41 = vld [vmem:[#allocation22_spill] sm:$0xff] }
 0x3cb   :  { %2145 = vmatpush.msra.mxu2 %v2731_v42  ;;  %2165 = vmatpush.msra.mxu3 %v2736_v43  ;;  %v3877_v42 = vld [vmem:[#allocation23_spill] sm:$0xff]  ;;  %v3878_v43 = vld [vmem:[#allocation24_spill] sm:$0xff] }
 0x3cc   :  { %2106 = vmatpush.msra.mxu0 %v2701_v36  ;;  %2126 = vmatpush.msra.mxu1 %v2706_v37  ;;  %v3869_v36 = vld [vmem:[#allocation31_spill] sm:$0xff]  ;;  %v3872_v37 = vld [vmem:[#allocation26_spill] sm:$0xff] }
 0x3cd   :  { %2146 = vmatpush.msra.mxu2 %v2711_v38  ;;  %2166 = vmatpush.msra.mxu3 %v2716_v39  ;;  %v3873_v38 = vld [vmem:[#allocation27_spill] sm:$0xff]  ;;  %v3874_v39 = vld [vmem:[#allocation28_spill] sm:$0xff] }
 0x3ce   :  { %2107 = vmatpush.msra.mxu0 %v2681_v32  ;;  %2127 = vmatpush.msra.mxu1 %v2686_v33  ;;  %v3870_v32 = vld [vmem:[#allocation32_spill] sm:$0xff]  ;;  %v3871_v33 = vld [vmem:[#allocation25_spill] sm:$0xff] }
 0x3cf   :  { %2147 = vmatpush.msra.mxu2 %v3861_v8  ;;  %2167 = vmatpush.msra.mxu3 %v3862_v9 }
 0x3d0   :  { %2108 = vmatpush.msra.mxu0 %v3863_v10  ;;  %2128 = vmatpush.msra.mxu1 %v3864_v11 }
 0x3d1   :  { %2148 = vmatpush.msra.mxu2 %v3865_v12  ;;  %2168 = vmatpush.msra.mxu3 %v3866_v13 }
 0x3d2   :  { %2109 = vmatpush.msra.mxu0 %v3867_v14  ;;  %2129 = vmatpush.msra.mxu1 %v3868_v15 }
 0x3d3   :  { %2149 = vmatpush.msra.mxu2 %v3869_v36  ;;  %2169 = vmatpush.msra.mxu3 %v3870_v32 }
 0x3d4   :  { %2110 = vmatpush.msra.mxu0 %v3871_v33  ;;  %2130 = vmatpush.msra.mxu1 %v3872_v37 }
 0x3d5   :  { %2150 = vmatpush.msra.mxu2 %v3873_v38  ;;  %2170 = vmatpush.msra.mxu3 %v3874_v39 }
 0x3d6   :  { %2111 = vmatpush.msra.mxu0 %v3875_v40  ;;  %2131 = vmatpush.msra.mxu1 %v3876_v41 }
 0x3d7   :  { %2151 = vmatpush.msra.mxu2 %v3877_v42  ;;  %2171 = vmatpush.msra.mxu3 %v3878_v43 }
 0x3d8   :  { %2112 = vmatpush.msra.mxu0 %v3879_v44  ;;  %2132 = vmatpush.msra.mxu1 %v3880_v45 }
 0x3d9   :  { %2152 = vmatpush.msra.mxu2 %v3881_v46  ;;  %2172 = vmatpush.msra.mxu3 %v3882_v47  ;;  %v3891_v47 = vld [vmem:[#allocation59_spill] sm:$0xff] }
 0x3da   :  { %2113 = vmatpush.msra.mxu0 %v3883_v48  ;;  %2133 = vmatpush.msra.mxu1 %v3884_v49  ;;  %v3892_v49 = vld [vmem:[#allocation60_spill] sm:$0xff] }
 0x3db   :  { %2153 = vmatpush.msra.mxu2 %v3885_v50  ;;  %2173 = vmatpush.msra.mxu3 %v3886_v51 }
 0x437   :  { %v1675_v52 = vpop.f32.mrf.mxu0  ;;  %v1695_v53 = vpop.f32.mrf.mxu1 }
 0x438   :  { %v1738_v55 = vadd.f32 %v1675_v52, %v3887_v54  ;;  %v1739_v57 = vadd.f32 %v1695_v53, %v3888_v56  ;;  %v3893_v54 = vld [vmem:[#allocation61_spill] sm:$0xff] }
 0x43a   :  { %v2347_v58 = vmul.f32 -1.442695, %v1738_v55  ;;  %v2348_v59 = vmul.f32 -1.442695, %v1739_v57 }
 0x43c   :  { %2440 = vpow2.f32 %v2347_v58 }
 0x43d   :  { %2442 = vpow2.f32 %v2348_v59 }
 0x43e   :  { %v1715_v60 = vpop.f32.mrf.mxu2  ;;  %v1735_v24 = vpop.f32.mrf.mxu3 }
 0x43f   :  { %v1740_v62 = vadd.f32 %v1715_v60, %v3889_v61  ;;  %v1741_v30 = vadd.f32 %v1735_v24, %v3890_v2 }
 0x441   :  { %v2349_v63 = vmul.f32 -1.442695, %v1740_v62 }
 0x442   :  { %v2441_v16 = vpop.eup %2440 }
 0x443   :  { %v2443_v6 = vpop.eup %2442  ;;  %v1751_v19 = vadd.f32 1.0, %v2441_v16  ;;  %2444 = vpow2.f32 %v2349_v63 }
 0x444   :  { %v1752_v20 = vadd.f32 1.0, %v2443_v6  ;;  %v3894_v6 = vld [vmem:[#allocation62_spill] sm:$0xff] }
 0x445   :  { %2446 = vrcp.f32 %v1751_v19  ;;  %v1765_v4 = vand.u32 2147483648, %v1751_v19  ;;  %v1763_v1 = vand.u32 2147483647, %v1751_v19  ;;  %vm1759_vm15 = vweird.f32 %v1751_v19 }
 0x446   :  { %2448 = vrcp.f32 %v1752_v20  ;;  %v1780_v22 = vand.u32 2147483648, %v1752_v20  ;;  %v1778_v29 = vand.u32 2147483647, %v1752_v20  ;;  %vm1774_vm0 = vweird.f32 %v1752_v20 }
 0x447   :  { %v1766_v18 = vor.u32 1.1754944e-38, %v1765_v4  ;;  %vm1764_vm3 = vcmp.eq.f32.partialorder %v1763_v1, 8.507059e+37 }
 0x448   :  { %v1781_v9 = vor.u32 1.1754944e-38, %v1780_v22  ;;  %vm1779_vm4 = vcmp.eq.f32.partialorder %v1778_v29, 8.507059e+37 }
 0x449   :  { %v2445_v3 = vpop.eup %2444 }
 0x44a   :  { %v1753_v35 = vadd.f32 1.0, %v2445_v3 }
 0x44b   :  { %v2447_v7 = vpop.eup %2446 }
 0x44c   :  { %v2449_v28 = vpop.eup %2448  ;;  %v1755_v26 = vmul.f32 %v2447_v7, %v1751_v19  ;;  %2450 = vrcp.f32 %v1753_v35  ;;  %vm1760_vm13 = vweird.f32 %v2447_v7  ;;  %v1795_v39 = vand.u32 2147483648, %v1753_v35 }
 0x44d   :  { %v1770_v31 = vmul.f32 %v2449_v28, %v1752_v20  ;;  %2452 = vtanh.f32 %v1741_v30  ;;  %vm1775_vm14 = vweird.f32 %v2449_v28  ;;  %vm1761_vm1 = vmor %vm1759_vm15, %vm1760_vm13  ;;  %vm1789_vm6 = vweird.f32 %v1753_v35 }
 0x44e   :  { %v1756_v21 = vsub.f32 1.0, %v1755_v26  ;;  %vm1776_vm2 = vmor %vm1774_vm0, %vm1775_vm14  ;;  %v1793_v40 = vand.u32 2147483647, %v1753_v35  ;;  %v1796_v42 = vor.u32 1.1754944e-38, %v1795_v39 }
 0x44f   :  { %v1771_v17 = vsub.f32 1.0, %v1770_v31 }
 0x450   :  { %v1757_v34 = vmul.f32 %v2447_v7, %v1756_v21  ;;  %vm1794_vm8 = vcmp.eq.f32.partialorder %v1793_v40, 8.507059e+37 }
 0x451   :  { %v1772_v5 = vmul.f32 %v2449_v28, %v1771_v17 }
 0x452   :  { %v2451_v27 = vpop.eup %2450  ;;  %v1758_v23 = vadd.f32 %v2447_v7, %v1757_v34 }
 0x453   :  { %v1785_v0 = vmul.f32 %v2451_v27, %v1753_v35  ;;  %v1773_v8 = vadd.f32 %v2449_v28, %v1772_v5  ;;  %v2453_v11 = vpop.eup %2452  ;;  %vm1790_vm5 = vweird.f32 %v2451_v27 }
 0x454   :  { %v1762_v10 = vsel %vm1761_vm1, %v2447_v7, %v1758_v23  ;;  %vm1791_vm7 = vmor %vm1789_vm6, %vm1790_vm5 }
 0x455   :  { %v1786_v12 = vsub.f32 1.0, %v1785_v0  ;;  %v1767_v13 = vsel %vm1764_vm3, %v1766_v18, %v1762_v10  ;;  %v1777_v14 = vsel %vm1776_vm2, %v2449_v28, %v1773_v8 }
 0x456   :  { %v1782_v15 = vsel %vm1779_vm4, %v1781_v9, %v1777_v14  ;;  %v1801_v36 = vmul.f32 %v2453_v11, %v1767_v13 }
 0x457   :  { %v1787_v32 = vmul.f32 %v2451_v27, %v1786_v12  ;;  %v1800_v33 = vmul.f32 %v1782_v15, %v3519_v25 }
 0x459   :  { %v3594_v37 = vadd.f32 %v1801_v36, %v1800_v33  ;;  %v1788_v38 = vadd.f32 %v2451_v27, %v1787_v32 }
 0x45b   :  { %2454 = vtanh.f32 %v3594_v37  ;;  %v1792_v41 = vsel %vm1791_vm7, %v2451_v27, %v1788_v38 }
 0x45c   :  { %v1797_v44 = vsel %vm1794_vm8, %v1796_v42, %v1792_v41  ;;  %v3895_v41 = vld [vmem:[#allocation63_spill] sm:$0xff] }
 0x461   :  { %v2455_v43 = vpop.eup %2454 }
 0x462   :  { %v1804_v45 = vmul.f32 %v2455_v43, %v1797_v44  ;;  %v3896_v43 = vld [vmem:[#allocation64_spill] sm:$0xff] }
 0x464   :  { %2350 = vst [vmem:[%s3623_s4 + $0x28] sm:$0xff] %v1804_v45  ;;  %1894 = vmatmul.f32.vlgmr.msrb.gmra.mxu0 %v1804_v45  ;;  %1914 = vmatmul.f32.vlgmr.msrb.gmra.mxu1 %v1804_v45 }
 0x465   :  { %1934 = vmatmul.f32.vlgmr.msrb.gmra.mxu2 %v1804_v45  ;;  %1954 = vmatmul.f32.vlgmr.msrb.gmra.mxu3 %v1804_v45 }
 0x4e1   :  { %v1895_v25 = vpop.f32.mrf.mxu0  ;;  %v1915_v46 = vpop.f32.mrf.mxu1 }
 0x4e2   :  { %v1958_v48 = vadd.f32 %v1895_v25, %v3891_v47  ;;  %v1959_v50 = vadd.f32 %v1915_v46, %v3892_v49  ;;  %v3897_v47 = vld [vmem:[#allocation65_spill] sm:$0xff] }
 0x4e4   :  { %v2351_v51 = vmul.f32 -1.442695, %v1958_v48  ;;  %v2352_v52 = vmul.f32 -1.442695, %v1959_v50 }
 0x4e6   :  { %2456 = vpow2.f32 %v2351_v51 }
 0x4e7   :  { %2458 = vpow2.f32 %v2352_v52 }
 0x4e8   :  { %v1935_v53 = vpop.f32.mrf.mxu2  ;;  %v1955_v61 = vpop.f32.mrf.mxu3 }
 0x4e9   :  { %v1960_v55 = vadd.f32 %v1935_v53, %v3893_v54  ;;  %v1961_v19 = vadd.f32 %v1955_v61, %v3894_v6 }
 0x4eb   :  { %v2353_v56 = vmul.f32 -1.442695, %v1960_v55 }
 0x4ec   :  { %v2457_v57 = vpop.eup %2456 }
 0x4ed   :  { %v2459_v58 = vpop.eup %2458  ;;  %v1971_v59 = vadd.f32 1.0, %v2457_v57  ;;  %2460 = vpow2.f32 %v2353_v56 }
 0x4ee   :  { %v1972_v60 = vadd.f32 1.0, %v2459_v58  ;;  %v3898_v58 = vld [vmem:[#allocation66_spill] sm:$0xff] }
 0x4ef   :  { %2462 = vrcp.f32 %v1971_v59  ;;  %v1985_v2 = vand.u32 2147483648, %v1971_v59  ;;  %v1983_v26 = vand.u32 2147483647, %v1971_v59  ;;  %vm1979_vm11 = vweird.f32 %v1971_v59 }
 0x4f0   :  { %2464 = vrcp.f32 %v1972_v60  ;;  %v2000_v30 = vand.u32 2147483648, %v1972_v60  ;;  %v1998_v21 = vand.u32 2147483647, %v1972_v60  ;;  %vm1994_vm12 = vweird.f32 %v1972_v60 }
 0x4f1   :  { %v1986_v34 = vor.u32 1.1754944e-38, %v1985_v2  ;;  %vm1984_vm15 = vcmp.eq.f32.partialorder %v1983_v26, 8.507059e+37 }
 0x4f2   :  { %v2001_v5 = vor.u32 1.1754944e-38, %v2000_v30  ;;  %vm1999_vm0 = vcmp.eq.f32.partialorder %v1998_v21, 8.507059e+37 }
 0x4f3   :  { %v2461_v62 = vpop.eup %2460 }
 0x4f4   :  { %v1973_v63 = vadd.f32 1.0, %v2461_v62 }
 0x4f5   :  { %v2463_v16 = vpop.eup %2462 }
 0x4f6   :  { %v2465_v20 = vpop.eup %2464  ;;  %v1975_v24 = vmul.f32 %v2463_v16, %v1971_v59  ;;  %2466 = vrcp.f32 %v1973_v63  ;;  %vm1980_vm9 = vweird.f32 %v2463_v16  ;;  %v2015_v14 = vand.u32 2147483648, %v1973_v63 }
 0x4f7   :  { %v1990_v3 = vmul.f32 %v2465_v20, %v1972_v60  ;;  %2468 = vtanh.f32 %v1961_v19  ;;  %vm1995_vm10 = vweird.f32 %v2465_v20  ;;  %vm1981_vm13 = vmor %vm1979_vm11, %vm1980_vm9  ;;  %vm2009_vm2 = vweird.f32 %v1973_v63 }
 0x4f8   :  { %v1976_v35 = vsub.f32 1.0, %v1975_v24  ;;  %vm1996_vm14 = vmor %vm1994_vm12, %vm1995_vm10  ;;  %v2013_v15 = vand.u32 2147483647, %v1973_v63  ;;  %v2016_v32 = vor.u32 1.1754944e-38, %v2015_v14 }
 0x4f9   :  { %v1991_v7 = vsub.f32 1.0, %v1990_v3 }
 0x4fa   :  { %v1977_v28 = vmul.f32 %v2463_v16, %v1976_v35  ;;  %vm2014_vm4 = vcmp.eq.f32.partialorder %v2013_v15, 8.507059e+37 }
 0x4fb   :  { %v1992_v31 = vmul.f32 %v2465_v20, %v1991_v7 }
 0x4fc   :  { %v2467_v17 = vpop.eup %2466  ;;  %v1978_v4 = vadd.f32 %v2463_v16, %v1977_v28 }
 0x4fd   :  { %v2005_v22 = vmul.f32 %v2467_v17, %v1973_v63  ;;  %v1993_v1 = vadd.f32 %v2465_v20, %v1992_v31  ;;  %v2469_v27 = vpop.eup %2468  ;;  %vm2010_vm1 = vweird.f32 %v2467_v17 }
 0x4fe   :  { %v1982_v29 = vsel %vm1981_vm13, %v2463_v16, %v1978_v4  ;;  %vm2011_vm3 = vmor %vm2009_vm2, %vm2010_vm1 }
 0x4ff   :  { %v2006_v23 = vsub.f32 1.0, %v2005_v22  ;;  %v1987_v0 = vsel %vm1984_vm15, %v1986_v34, %v1982_v29  ;;  %v1997_v18 = vsel %vm1996_vm14, %v2465_v20, %v1993_v1 }
 0x500   :  { %v2002_v8 = vsel %vm1999_vm0, %v2001_v5, %v1997_v18  ;;  %v2021_v9 = vmul.f32 %v2469_v27, %v1987_v0 }
 0x501   :  { %v2007_v10 = vmul.f32 %v2467_v17, %v2006_v23  ;;  %v2020_v11 = vmul.f32 %v2002_v8, %v3594_v37 }
 0x503   :  { %v3605_v12 = vadd.f32 %v2021_v9, %v2020_v11  ;;  %v2008_v13 = vadd.f32 %v2467_v17, %v2007_v10 }
 0x505   :  { %2470 = vtanh.f32 %v3605_v12  ;;  %v2012_v36 = vsel %vm2011_vm3, %v2467_v17, %v2008_v13 }
 0x506   :  { %v2017_v38 = vsel %vm2014_vm4, %v2016_v32, %v2012_v36 }
 0x50b   :  { %v2471_v33 = vpop.eup %2470 }
 0x50c   :  { %v2024_v39 = vmul.f32 %v2471_v33, %v2017_v38 }
 0x50e   :  { %2354 = vst [vmem:[%s3623_s4 + $0x30] sm:$0xff] %v2024_v39  ;;  %2114 = vmatmul.f32.vlgmr.msra.gmra.mxu0 %v2024_v39  ;;  %2134 = vmatmul.f32.vlgmr.msra.gmra.mxu1 %v2024_v39 }
 0x50f   :  { %2154 = vmatmul.f32.vlgmr.msra.gmra.mxu2 %v2024_v39  ;;  %2174 = vmatmul.f32.vlgmr.msra.gmra.mxu3 %v2024_v39 }
 0x58b   :  { %v2115_v37 = vpop.f32.mrf.mxu0  ;;  %v2135_v40 = vpop.f32.mrf.mxu1 }
 0x58c   :  { %v2178_v42 = vadd.f32 %v2115_v37, %v3895_v41  ;;  %v2179_v44 = vadd.f32 %v2135_v40, %v3896_v43 }
 0x58e   :  { %v2355_v45 = vmul.f32 -1.442695, %v2178_v42  ;;  %v2356_v25 = vmul.f32 -1.442695, %v2179_v44 }
 0x590   :  { %2472 = vpow2.f32 %v2355_v45 }
 0x591   :  { %2474 = vpow2.f32 %v2356_v25 }
 0x592   :  { %v2155_v46 = vpop.f32.mrf.mxu2  ;;  %v2175_v54 = vpop.f32.mrf.mxu3 }
 0x593   :  { %v2180_v48 = vadd.f32 %v2155_v46, %v3897_v47  ;;  %v2181_v59 = vadd.f32 %v2175_v54, %v3898_v58 }
 0x595   :  { %v2357_v49 = vmul.f32 -1.442695, %v2180_v48 }
 0x596   :  { %v2473_v50 = vpop.eup %2472 }
 0x597   :  { %v2475_v51 = vpop.eup %2474  ;;  %v2191_v52 = vadd.f32 1.0, %v2473_v50  ;;  %2476 = vpow2.f32 %v2357_v49 }
 0x598   :  { %v2192_v53 = vadd.f32 1.0, %v2475_v51 }
 0x599   :  { %2478 = vrcp.f32 %v2191_v52  ;;  %v2205_v6 = vand.u32 2147483648, %v2191_v52  ;;  %v2203_v24 = vand.u32 2147483647, %v2191_v52  ;;  %vm2199_vm7 = vweird.f32 %v2191_v52 }
 0x59a   :  { %2480 = vrcp.f32 %v2192_v53  ;;  %v2220_v19 = vand.u32 2147483648, %v2192_v53  ;;  %v2218_v35 = vand.u32 2147483647, %v2192_v53  ;;  %vm2214_vm8 = vweird.f32 %v2192_v53 }
 0x59b   :  { %v2206_v28 = vor.u32 1.1754944e-38, %v2205_v6  ;;  %vm2204_vm11 = vcmp.eq.f32.partialorder %v2203_v24, 8.507059e+37 }
 0x59c   :  { %v2221_v31 = vor.u32 1.1754944e-38, %v2220_v19  ;;  %vm2219_vm12 = vcmp.eq.f32.partialorder %v2218_v35, 8.507059e+37 }
 0x59d   :  { %v2477_v55 = vpop.eup %2476 }
 0x59e   :  { %v2193_v56 = vadd.f32 1.0, %v2477_v55 }
 0x59f   :  { %v2479_v57 = vpop.eup %2478 }
 0x5a0   :  { %v2481_v60 = vpop.eup %2480  ;;  %v2195_v61 = vmul.f32 %v2479_v57, %v2191_v52  ;;  %2482 = vrcp.f32 %v2193_v56  ;;  %vm2200_vm5 = vweird.f32 %v2479_v57  ;;  %v2235_v18 = vand.u32 2147483648, %v2193_v56 }
 0x5a1   :  { %v2210_v62 = vmul.f32 %v2481_v60, %v2192_v53  ;;  %2484 = vtanh.f32 %v2181_v59  ;;  %vm2215_vm6 = vweird.f32 %v2481_v60  ;;  %vm2201_vm9 = vmor %vm2199_vm7, %vm2200_vm5  ;;  %vm2229_vm14 = vweird.f32 %v2193_v56 }
 0x5a2   :  { %v2196_v63 = vsub.f32 1.0, %v2195_v61  ;;  %vm2216_vm10 = vmor %vm2214_vm8, %vm2215_vm6  ;;  %v2233_v8 = vand.u32 2147483647, %v2193_v56  ;;  %v2236_v10 = vor.u32 1.1754944e-38, %v2235_v18 }
 0x5a3   :  { %v2211_v16 = vsub.f32 1.0, %v2210_v62 }
 0x5a4   :  { %v2197_v20 = vmul.f32 %v2479_v57, %v2196_v63  ;;  %vm2234_vm0 = vcmp.eq.f32.partialorder %v2233_v8, 8.507059e+37 }
 0x5a5   :  { %v2212_v3 = vmul.f32 %v2481_v60, %v2211_v16 }
 0x5a6   :  { %v2483_v7 = vpop.eup %2482  ;;  %v2198_v2 = vadd.f32 %v2479_v57, %v2197_v20 }
 0x5a7   :  { %v2225_v30 = vmul.f32 %v2483_v7, %v2193_v56  ;;  %v2213_v26 = vadd.f32 %v2481_v60, %v2212_v3  ;;  %v2485_v17 = vpop.eup %2484  ;;  %vm2230_vm13 = vweird.f32 %v2483_v7 }
 0x5a8   :  { %v2202_v21 = vsel %vm2201_vm9, %v2479_v57, %v2198_v2  ;;  %vm2231_vm15 = vmor %vm2229_vm14, %vm2230_vm13 }
 0x5a9   :  { %v2226_v4 = vsub.f32 1.0, %v2225_v30  ;;  %v2207_v22 = vsel %vm2204_vm11, %v2206_v28, %v2202_v21  ;;  %v2217_v34 = vsel %vm2216_vm10, %v2481_v60, %v2213_v26 }
 0x5aa   :  { %v2222_v1 = vsel %vm2219_vm12, %v2221_v31, %v2217_v34  ;;  %v2241_v5 = vmul.f32 %v2485_v17, %v2207_v22 }
 0x5ab   :  { %v2227_v29 = vmul.f32 %v2483_v7, %v2226_v4  ;;  %v2240_v27 = vmul.f32 %v2222_v1, %v3605_v12 }
 0x5ad   :  { %v2242_v23 = vadd.f32 %v2241_v5, %v2240_v27  ;;  %v2228_v0 = vadd.f32 %v2483_v7, %v2227_v29 }
 0x5af   :  { %2486 = vtanh.f32 %v2242_v23  ;;  %v2232_v9 = vsel %vm2231_vm15, %v2483_v7, %v2228_v0 }
 0x5b0   :  { %v2237_v13 = vsel %vm2234_vm0, %v2236_v10, %v2232_v9 }
 0x5b5   :  { %v2487_v11 = vpop.eup %2486 }
 0x5b6   :  { %v2244_v14 = vmul.f32 %v2487_v11, %v2237_v13 }
 0x5b8   :  { %2358 = vst [vmem:[%s3623_s4 + $0x38] sm:$0xff] %v2244_v14 }

</bundles_post_ra>
